<compile_context>
chip_gen: v7x
topology: tpu7x:2x2x1
jax: 0.10.0
libtpu: 0.0.40
codegen_flags: <defaults>
</compile_context>

<pallas_src>
import functools

import jax
import jax.numpy as jnp
import numpy as np
from jax.experimental import pallas as pl
from jax.experimental.pallas import tpu as pltpu

# ----------------------------- config (small) -------------------------------
BATCH = 2
SEQ = 64
DIM = 64
NUM_HEADS = 2
HEAD_DIM = DIM // NUM_HEADS
MLP_DIM = 4 * DIM          # mlp_ratio = 4.0
NUM_BLOCKS = 2             # wrapper loops over a list of single blocks
EPS_LN = 1e-6
EPS_RMS = 1e-6
GELU_C = 0.7978845608028654  # sqrt(2/pi)


# ------------------------------ Pallas kernel --------------------------------
def _fused_stack_kernel(
    x_ref, temb_ref, cos_ref, sin_ref, rotm_ref, seg_ref,
    w_shift_ref, w_scale_ref, w_gate_ref,
    b_shift_ref, b_scale_ref, b_gate_ref,
    w_fused_ref, b_fused_ref, rms_q_ref, rms_k_ref,
    w_out_attn_ref, w_out_mlp_ref, b_out_ref,
    o_ref,
    *, num_heads, head_dim, dim, mlp_dim,
):
    """One grid step = (batch element b, transformer block l).

    The hidden state is carried in the resident output block across the block
    axis (output BlockSpec index is constant along l), so the whole stack runs
    inside a single pallas_call with no HBM round-trips between blocks.
    """
    l = pl.program_id(1)
    D, Dm = dim, mlp_dim

    # Initialize the carried hidden state from the input at the first block.
    @pl.when(l == 0)
    def _():
        o_ref[...] = x_ref[...]

    x = o_ref[0]                      # [S, D]  carried residual stream (f32)
    temb = temb_ref[0]                # [1, D]

    # ---- AdaLayerNormZeroSingle: linear(silu(temb)) -> shift, 1+scale, gate --
    t = (temb * jax.nn.sigmoid(temb)).astype(jnp.bfloat16)
    shift = jnp.dot(t, w_shift_ref[0], preferred_element_type=jnp.float32) + b_shift_ref[0]
    scale1 = jnp.dot(t, w_scale_ref[0], preferred_element_type=jnp.float32) + b_scale_ref[0]  # bias pre-shifted (+1)
    gate = jnp.dot(t, w_gate_ref[0], preferred_element_type=jnp.float32) + b_gate_ref[0]

    # ---- LayerNorm (no affine, eps=1e-6) + modulation (f32 stats) -----------
    xc = x - jnp.mean(x, axis=-1, keepdims=True)
    var = jnp.mean(xc * xc, axis=-1, keepdims=True)
    norm_mod = xc * jax.lax.rsqrt(var + EPS_LN) * scale1 + shift      # [S, D]
    nm_bf = norm_mod.astype(jnp.bfloat16)

    # ---- fused [proj_mlp | to_q | to_k | to_v] : one wide MXU matmul ---------
    fused = jnp.dot(nm_bf, w_fused_ref[0], preferred_element_type=jnp.float32) + b_fused_ref[0]
    mlp = fused[:, :Dm]
    q = fused[:, Dm:Dm + D]
    k = fused[:, Dm + D:Dm + 2 * D]
    v = fused[:, Dm + 2 * D:]

    # ---- MLP branch: GELU(tanh) ----
    mlp_act = 0.5 * mlp * (1.0 + jnp.tanh(GELU_C * (mlp + 0.044715 * mlp * mlp * mlp)))

    # ---- per-head RMSNorm, vectorized across heads (block-diag mean matmul) --
    seg = seg_ref[...]                                                 # [D, D] bf16, blockdiag 1/Dh
    q_ms = jnp.dot((q * q).astype(jnp.bfloat16), seg, preferred_element_type=jnp.float32)
    k_ms = jnp.dot((k * k).astype(jnp.bfloat16), seg, preferred_element_type=jnp.float32)
    qn = q * jax.lax.rsqrt(q_ms + EPS_RMS) * rms_q_ref[0]              # rms_q has 1/sqrt(Dh) folded in
    kn = k * jax.lax.rsqrt(k_ms + EPS_RMS) * rms_k_ref[0]

    # ---- RoPE, vectorized across heads (block-diag pair-rotation matmul) -----
    cos = cos_ref[...]                                                 # [S, D]
    sin = sin_ref[...]
    rot = rotm_ref[...]                                                # [D, D] bf16
    qr = (qn * cos
          + jnp.dot(qn.astype(jnp.bfloat16), rot, preferred_element_type=jnp.float32) * sin
          ).astype(jnp.bfloat16)
    kr = (kn * cos
          + jnp.dot(kn.astype(jnp.bfloat16), rot, preferred_element_type=jnp.float32) * sin
          ).astype(jnp.bfloat16)
    vb = v.astype(jnp.bfloat16)

    # ---- attention (non-causal, softmax scale already folded into q) --------
    heads = []
    for h in range(num_heads):
        c0 = h * head_dim
        qh = qr[:, c0:c0 + head_dim]
        kh = kr[:, c0:c0 + head_dim]
        vh = vb[:, c0:c0 + head_dim]
        s = jax.lax.dot_general(qh, kh, (((1,), (1,)), ((), ())),
                                preferred_element_type=jnp.float32)    # [S, S]
        s = s - jnp.max(s, axis=-1, keepdims=True)
        p = jnp.exp(s)
        p = p * pl.reciprocal(jnp.sum(p, axis=-1, keepdims=True), approx=True)
        heads.append(jnp.dot(p.astype(jnp.bfloat16), vh, preferred_element_type=jnp.float32))
    attn = jnp.concatenate(heads, axis=-1).astype(jnp.bfloat16)        # [S, D]

    # ---- proj_out(cat([attn, mlp])) with gate + residual ---------------------
    proj = (jnp.dot(attn, w_out_attn_ref[0], preferred_element_type=jnp.float32)
            + jnp.dot(mlp_act.astype(jnp.bfloat16), w_out_mlp_ref[0], preferred_element_type=jnp.float32)
            + b_out_ref[0])
    o_ref[0] = x + gate * proj
    # TODO(synk): torch clips to +/-65504 only when dtype is fp16; this kernel carries fp32.


# --------------------------- host-side weight packing ------------------------
def pack_block_params(block_params):
    """Stack per-block weights along a leading block axis; bf16 for MXU operands."""
    D, Dm, H, Dh = DIM, MLP_DIM, NUM_HEADS, HEAD_DIM
    stk = lambda fn: jnp.stack([fn(p) for p in block_params], axis=0)
    bf = lambda a: a.astype(jnp.bfloat16)
    sm_scale = 1.0 / float(np.sqrt(Dh))
    return {
        "w_shift": bf(stk(lambda p: p["w_ada"][:, 0 * D:1 * D])),
        "w_scale": bf(stk(lambda p: p["w_ada"][:, 1 * D:2 * D])),
        "w_gate":  bf(stk(lambda p: p["w_ada"][:, 2 * D:3 * D])),
        "b_shift": stk(lambda p: p["b_ada"][:, 0 * D:1 * D]),
        "b_scale": stk(lambda p: p["b_ada"][:, 1 * D:2 * D] + 1.0),   # fold (1 + scale)
        "b_gate":  stk(lambda p: p["b_ada"][:, 2 * D:3 * D]),
        "w_fused": bf(stk(lambda p: jnp.concatenate(
            [p["w_mlp"], p["w_q"], p["w_k"], p["w_v"]], axis=1))),     # [L, D, Dm+3D]
        "b_fused": stk(lambda p: jnp.concatenate(
            [p["b_mlp"], p["b_q"], p["b_k"], p["b_v"]], axis=1)),      # [L, 1, Dm+3D]
        "rms_q":   stk(lambda p: jnp.tile(p["rms_q"], (1, H)) * sm_scale),  # softmax scale folded
        "rms_k":   stk(lambda p: jnp.tile(p["rms_k"], (1, H))),
        "w_out_attn": bf(stk(lambda p: p["w_out_attn"])),
        "w_out_mlp":  bf(stk(lambda p: p["w_out_mlp"])),
        "b_out":      stk(lambda p: p["b_out"]),
    }


def make_shared_consts(cos, sin):
    """cos/sin tiled over heads; block-diagonal RoPE rotation and per-head mean matrices."""
    H, Dh = NUM_HEADS, HEAD_DIM
    cos_full = jnp.tile(cos, (1, H))                 # [S, D]
    sin_full = jnp.tile(sin, (1, H))
    rot1 = np.zeros((Dh, Dh), np.float32)            # x @ rot1 == (-x1, x0, -x3, x2, ...)
    for i in range(Dh // 2):
        rot1[2 * i + 1, 2 * i] = -1.0
        rot1[2 * i, 2 * i + 1] = 1.0
    rotm = np.kron(np.eye(H, dtype=np.float32), rot1)                                   # [D, D]
    seg = np.kron(np.eye(H, dtype=np.float32), np.full((Dh, Dh), 1.0 / Dh, np.float32))  # [D, D]
    return cos_full, sin_full, jnp.asarray(rotm, jnp.bfloat16), jnp.asarray(seg, jnp.bfloat16)


# ------------------------------ host wrapper ---------------------------------
def tracing_single_transformer_block_wrapper(hidden_states, temb, image_rotary_emb, block_params):
    """Matches the PyTorch wrapper: sequentially apply each single block (fused in one kernel)."""
    cos, sin = image_rotary_emb
    B, S, D = hidden_states.shape
    L = len(block_params)
    Dm, H, Dh = MLP_DIM, NUM_HEADS, HEAD_DIM

    packed = pack_block_params(block_params)
    cos_f, sin_f, rotm, seg = make_shared_consts(cos, sin)
    temb3 = temb.reshape(B, 1, D)

    kernel = functools.partial(_fused_stack_kernel,
                               num_heads=H, head_dim=Dh, dim=D, mlp_dim=Dm)

    def per_batch(shape):
        return pl.BlockSpec(shape, lambda b, l: (b,) + (0,) * (len(shape) - 1))

    def shared(shape):
        return pl.BlockSpec(shape, lambda b, l: (0,) * len(shape))

    def per_block(shape):
        return pl.BlockSpec(shape, lambda b, l: (l,) + (0,) * (len(shape) - 1))

    return pl.pallas_call(
        kernel,
        out_shape=jax.ShapeDtypeStruct((B, S, D), jnp.float32),
        grid=(B, L),
        in_specs=[
            per_batch((1, S, D)),            # hidden_states
            per_batch((1, 1, D)),            # temb
            shared((S, D)),                  # cos (tiled over heads)
            shared((S, D)),                  # sin (tiled over heads)
            shared((D, D)),                  # block-diag RoPE rotation (bf16)
            shared((D, D)),                  # block-diag per-head mean (bf16)
            per_block((1, D, D)),            # w_shift
            per_block((1, D, D)),            # w_scale
            per_block((1, D, D)),            # w_gate
            per_block((1, 1, D)),            # b_shift
            per_block((1, 1, D)),            # b_scale (+1 folded)
            per_block((1, 1, D)),            # b_gate
            per_block((1, D, Dm + 3 * D)),   # fused [mlp|q|k|v] weight
            per_block((1, 1, Dm + 3 * D)),   # fused bias
            per_block((1, 1, D)),            # rms_q (sm_scale folded)
            per_block((1, 1, D)),            # rms_k
            per_block((1, D, D)),            # proj_out attn slab
            per_block((1, Dm, D)),           # proj_out mlp slab
            per_block((1, 1, D)),            # proj_out bias
        ],
        out_specs=per_batch((1, S, D)),
        compiler_params=pltpu.CompilerParams(
            dimension_semantics=("parallel", "arbitrary")),
    )(
        hidden_states, temb3, cos_f, sin_f, rotm, seg,
        packed["w_shift"], packed["w_scale"], packed["w_gate"],
        packed["b_shift"], packed["b_scale"], packed["b_gate"],
        packed["w_fused"], packed["b_fused"], packed["rms_q"], packed["rms_k"],
        packed["w_out_attn"], packed["w_out_mlp"], packed["b_out"],
    )


# --------------------------- pure-JAX reference ------------------------------
def _ref_single_block(x, temb, cos, sin, p):
    B, S, D = x.shape
    H, Dh = NUM_HEADS, HEAD_DIM
    t = temb * jax.nn.sigmoid(temb)
    mod = t @ p["w_ada"] + p["b_ada"][0]
    shift, scale, gate = mod[:, :D], mod[:, D:2 * D], mod[:, 2 * D:]
    mean = x.mean(-1, keepdims=True)
    var = ((x - mean) ** 2).mean(-1, keepdims=True)
    nx = (x - mean) * jax.lax.rsqrt(var + EPS_LN) * (1.0 + scale[:, None, :]) + shift[:, None, :]
    mlp = nx @ p["w_mlp"] + p["b_mlp"][0]
    mlp = 0.5 * mlp * (1.0 + jnp.tanh(GELU_C * (mlp + 0.044715 * mlp ** 3)))
    q = (nx @ p["w_q"] + p["b_q"][0]).reshape(B, S, H, Dh).transpose(0, 2, 1, 3)
    k = (nx @ p["w_k"] + p["b_k"][0]).reshape(B, S, H, Dh).transpose(0, 2, 1, 3)
    v = (nx @ p["w_v"] + p["b_v"][0]).reshape(B, S, H, Dh).transpose(0, 2, 1, 3)

    def rms(u, w):
        return u * jax.lax.rsqrt(jnp.mean(u * u, -1, keepdims=True) + EPS_RMS) * w

    q, k = rms(q, p["rms_q"][0]), rms(k, p["rms_k"][0])

    def rope(u):
        ur, ui = u[..., 0::2], u[..., 1::2]
        rot = jnp.stack([-ui, ur], axis=-1).reshape(u.shape)
        return u * cos[None, None] + rot * sin[None, None]

    q, k = rope(q), rope(k)
    scores = jnp.einsum("bhqd,bhkd->bhqk", q, k) / jnp.sqrt(jnp.float32(Dh))
    attn = jnp.einsum("bhqk,bhkd->bhqd", jax.nn.softmax(scores, -1), v)
    attn = attn.transpose(0, 2, 1, 3).reshape(B, S, D)
    proj = attn @ p["w_out_attn"] + mlp @ p["w_out_mlp"] + p["b_out"][0]
    return x + gate[:, None, :] * proj


# ----------------------------- parameter setup -------------------------------
def make_block_params(key):
    ks = jax.random.split(key, 12)
    n = lambda k, shape, s=0.02: (jax.random.normal(k, shape, jnp.float32) * s)
    return {
        "w_ada": n(ks[0], (DIM, 3 * DIM)), "b_ada": n(ks[1], (1, 3 * DIM), 0.01),
        "w_mlp": n(ks[2], (DIM, MLP_DIM)), "b_mlp": n(ks[3], (1, MLP_DIM), 0.01),
        "w_q": n(ks[4], (DIM, DIM)), "b_q": n(ks[5], (1, DIM), 0.01),
        "w_k": n(ks[6], (DIM, DIM)), "b_k": n(ks[7], (1, DIM), 0.01),
        "w_v": n(ks[8], (DIM, DIM)), "b_v": n(ks[9], (1, DIM), 0.01),
        "rms_q": jnp.ones((1, HEAD_DIM), jnp.float32),
        "rms_k": jnp.ones((1, HEAD_DIM), jnp.float32),
        "w_out_attn": n(ks[10], (DIM, DIM)),
        "w_out_mlp": n(ks[11], (MLP_DIM, DIM)),
        "b_out": jnp.zeros((1, DIM), jnp.float32),
    }


def make_rotary(seq, head_dim):
    pos = np.arange(seq, dtype=np.float32)
    freqs = 1.0 / (10000.0 ** (np.arange(0, head_dim, 2, dtype=np.float32) / head_dim))
    ang = np.outer(pos, freqs)                      # [S, Dh/2]
    cos = np.repeat(np.cos(ang), 2, axis=-1)        # repeat_interleave -> [S, Dh]
    sin = np.repeat(np.sin(ang), 2, axis=-1)
    return jnp.asarray(cos), jnp.asarray(sin)


# ----------------------------------- main -------------------------------------
if __name__ == "__main__":
    root = jax.random.PRNGKey(0)
    k_x, k_t, *k_blocks = jax.random.split(root, 2 + NUM_BLOCKS)

    hidden_states = jax.random.normal(k_x, (BATCH, SEQ, DIM), jnp.float32)
    temb = jax.random.normal(k_t, (BATCH, DIM), jnp.float32)
    cos, sin = make_rotary(SEQ, HEAD_DIM)
    block_params = [make_block_params(k) for k in k_blocks]

    out = tracing_single_transformer_block_wrapper(
        hidden_states, temb, (cos, sin), block_params
    )
    out = jax.block_until_ready(out)

    # cross-check against a pure-JAX f32 reference of the same math
    ref = hidden_states
    for p in block_params:
        ref = _ref_single_block(ref, temb, cos, sin, p)
    ref = jax.block_until_ready(ref)

    assert out.shape == (BATCH, SEQ, DIM)
    assert bool(jnp.all(jnp.isfinite(out)))
    err = float(jnp.max(jnp.abs(out - ref)))
    # bf16 MXU inputs with f32 accumulation (+ approx reciprocal) vs pure-f32 reference.
    assert bool(jnp.allclose(out, ref, rtol=5e-3, atol=5e-3)), err
    print("KERNEL_OK")
</pallas_src>

<mosaic_0001>
module attributes {stable_mosaic.version = 11 : i64} {
  func.func @_fused_stack_kernel(%arg0: i32, %arg1: i32, %arg2: memref<1x64x64xf32, #tpu.memory_space<vmem>>, %arg3: memref<1x1x64xf32, #tpu.memory_space<vmem>>, %arg4: memref<64x64xf32, #tpu.memory_space<vmem>>, %arg5: memref<64x64xf32, #tpu.memory_space<vmem>>, %arg6: memref<64x64xbf16, #tpu.memory_space<vmem>>, %arg7: memref<64x64xbf16, #tpu.memory_space<vmem>>, %arg8: memref<1x64x64xbf16, #tpu.memory_space<vmem>>, %arg9: memref<1x64x64xbf16, #tpu.memory_space<vmem>>, %arg10: memref<1x64x64xbf16, #tpu.memory_space<vmem>>, %arg11: memref<1x1x64xf32, #tpu.memory_space<vmem>>, %arg12: memref<1x1x64xf32, #tpu.memory_space<vmem>>, %arg13: memref<1x1x64xf32, #tpu.memory_space<vmem>>, %arg14: memref<1x64x448xbf16, #tpu.memory_space<vmem>>, %arg15: memref<1x1x448xf32, #tpu.memory_space<vmem>>, %arg16: memref<1x1x64xf32, #tpu.memory_space<vmem>>, %arg17: memref<1x1x64xf32, #tpu.memory_space<vmem>>, %arg18: memref<1x64x64xbf16, #tpu.memory_space<vmem>>, %arg19: memref<1x256x64xbf16, #tpu.memory_space<vmem>>, %arg20: memref<1x1x64xf32, #tpu.memory_space<vmem>>, %arg21: memref<1x64x64xf32, #tpu.memory_space<vmem>>) attributes {dimension_semantics = [#tpu.dimension_semantics<parallel>, #tpu.dimension_semantics<arbitrary>], iteration_bounds = array<i64: 2, 2>, scalar_prefetch = 0 : i64, scratch_operands = 0 : i64, tpu.core_type = #tpu.core_type<tc>, window_params = [{transform_indices = @transform_0, window_bounds = array<i64: 1, 64, 64>}, {transform_indices = @transform_1, window_bounds = array<i64: 1, 1, 64>}, {pipeline_mode = #tpu.pipeline_mode<synchronous>, transform_indices = @transform_2, window_bounds = array<i64: 64, 64>}, {pipeline_mode = #tpu.pipeline_mode<synchronous>, transform_indices = @transform_3, window_bounds = array<i64: 64, 64>}, {pipeline_mode = #tpu.pipeline_mode<synchronous>, transform_indices = @transform_4, window_bounds = array<i64: 64, 64>}, {pipeline_mode = #tpu.pipeline_mode<synchronous>, transform_indices = @transform_5, window_bounds = array<i64: 64, 64>}, {transform_indices = @transform_6, window_bounds = array<i64: 1, 64, 64>}, {transform_indices = @transform_7, window_bounds = array<i64: 1, 64, 64>}, {transform_indices = @transform_8, window_bounds = array<i64: 1, 64, 64>}, {transform_indices = @transform_9, window_bounds = array<i64: 1, 1, 64>}, {transform_indices = @transform_10, window_bounds = array<i64: 1, 1, 64>}, {transform_indices = @transform_11, window_bounds = array<i64: 1, 1, 64>}, {transform_indices = @transform_12, window_bounds = array<i64: 1, 64, 448>}, {transform_indices = @transform_13, window_bounds = array<i64: 1, 1, 448>}, {transform_indices = @transform_14, window_bounds = array<i64: 1, 1, 64>}, {transform_indices = @transform_15, window_bounds = array<i64: 1, 1, 64>}, {transform_indices = @transform_16, window_bounds = array<i64: 1, 64, 64>}, {transform_indices = @transform_17, window_bounds = array<i64: 1, 256, 64>}, {transform_indices = @transform_18, window_bounds = array<i64: 1, 1, 64>}, {transform_indices = @transform_19, window_bounds = array<i64: 1, 64, 64>}]} {
    %c0_i32 = arith.constant 0 : i32
    %0 = arith.cmpi eq, %arg1, %c0_i32 : i32
    %1 = arith.extui %0 : i1 to i32
    %c0_i32_0 = arith.constant 0 : i32
    %2 = arith.cmpi ne, %1, %c0_i32_0 : i32
    scf.if %2 {
      %c0_85 = arith.constant 0 : index
      %c0_86 = arith.constant 0 : index
      %c0_87 = arith.constant 0 : index
      %168 = vector.load %arg2[%c0_85, %c0_86, %c0_87] : memref<1x64x64xf32, #tpu.memory_space<vmem>>, vector<1x64x64xf32>
      %c0_88 = arith.constant 0 : index
      %c0_89 = arith.constant 0 : index
      %c0_90 = arith.constant 0 : index
      %169 = vector.load %arg21[%c0_88, %c0_89, %c0_90] : memref<1x64x64xf32, #tpu.memory_space<vmem>>, vector<1x64x64xf32>
      tpu.vector_store %arg21[%c0_88, %c0_89, %c0_90], %168 {strides = array<i32>} : memref<1x64x64xf32, #tpu.memory_space<vmem>>, vector<1x64x64xf32>,
    } else {
    }
    %c0 = arith.constant 0 : index
    %c0_1 = arith.constant 0 : index
    %c0_2 = arith.constant 0 : index
    %3 = vector.load %arg21[%c0, %c0_1, %c0_2] : memref<1x64x64xf32, #tpu.memory_space<vmem>>, vector<1x64x64xf32>
    %4 = vector.shape_cast %3 : vector<1x64x64xf32> to vector<64x64xf32>
    %c0_3 = arith.constant 0 : index
    %c0_4 = arith.constant 0 : index
    %c0_5 = arith.constant 0 : index
    %5 = vector.load %arg3[%c0_3, %c0_4, %c0_5] : memref<1x1x64xf32, #tpu.memory_space<vmem>>, vector<1x1x64xf32>
    %6 = vector.shape_cast %5 : vector<1x1x64xf32> to vector<1x64xf32>
    %7 = arith.negf %6 : vector<1x64xf32>
    %8 = math.exp %7 : vector<1x64xf32>
    %cst = arith.constant 1.000000e+00 : f32
    %9 = vector.broadcast %cst : f32 to vector<1x64xf32>
    %10 = arith.addf %9, %8 : vector<1x64xf32>
    %11 = arith.divf %9, %10 : vector<1x64xf32>
    %12 = arith.mulf %6, %11 : vector<1x64xf32>
    %13 = arith.truncf %12 : vector<1x64xf32> to vector<1x64xbf16>
    %c0_6 = arith.constant 0 : index
    %c0_7 = arith.constant 0 : index
    %c0_8 = arith.constant 0 : index
    %14 = vector.load %arg8[%c0_6, %c0_7, %c0_8] : memref<1x64x64xbf16, #tpu.memory_space<vmem>>, vector<1x64x64xbf16>
    %15 = vector.shape_cast %14 : vector<1x64x64xbf16> to vector<64x64xbf16>
    %cst_9 = arith.constant dense<0.000000e+00> : vector<1x64xf32>
    %16 = tpu.matmul %13, %15, %cst_9 {dimension_numbers = #tpu.dot_dimension_numbers<[1], [0], [0], [1], [0, 0, 1, 1], [], []>} : vector<1x64xbf16>, vector<64x64xbf16>, vector<1x64xf32> -> vector<1x64xf32>
    %c0_10 = arith.constant 0 : index
    %c0_11 = arith.constant 0 : index
    %c0_12 = arith.constant 0 : index
    %17 = vector.load %arg11[%c0_10, %c0_11, %c0_12] : memref<1x1x64xf32, #tpu.memory_space<vmem>>, vector<1x1x64xf32>
    %18 = vector.shape_cast %17 : vector<1x1x64xf32> to vector<1x64xf32>
    %19 = arith.addf %16, %18 : vector<1x64xf32>
    %c0_13 = arith.constant 0 : index
    %c0_14 = arith.constant 0 : index
    %c0_15 = arith.constant 0 : index
    %20 = vector.load %arg9[%c0_13, %c0_14, %c0_15] : memref<1x64x64xbf16, #tpu.memory_space<vmem>>, vector<1x64x64xbf16>
    %21 = vector.shape_cast %20 : vector<1x64x64xbf16> to vector<64x64xbf16>
    %cst_16 = arith.constant dense<0.000000e+00> : vector<1x64xf32>
    %22 = tpu.matmul %13, %21, %cst_16 {dimension_numbers = #tpu.dot_dimension_numbers<[1], [0], [0], [1], [0, 0, 1, 1], [], []>} : vector<1x64xbf16>, vector<64x64xbf16>, vector<1x64xf32> -> vector<1x64xf32>
    %c0_17 = arith.constant 0 : index
    %c0_18 = arith.constant 0 : index
    %c0_19 = arith.constant 0 : index
    %23 = vector.load %arg12[%c0_17, %c0_18, %c0_19] : memref<1x1x64xf32, #tpu.memory_space<vmem>>, vector<1x1x64xf32>
    %24 = vector.shape_cast %23 : vector<1x1x64xf32> to vector<1x64xf32>
    %25 = arith.addf %22, %24 : vector<1x64xf32>
    %c0_20 = arith.constant 0 : index
    %c0_21 = arith.constant 0 : index
    %c0_22 = arith.constant 0 : index
    %26 = vector.load %arg10[%c0_20, %c0_21, %c0_22] : memref<1x64x64xbf16, #tpu.memory_space<vmem>>, vector<1x64x64xbf16>
    %27 = vector.shape_cast %26 : vector<1x64x64xbf16> to vector<64x64xbf16>
    %cst_23 = arith.constant dense<0.000000e+00> : vector<1x64xf32>
    %28 = tpu.matmul %13, %27, %cst_23 {dimension_numbers = #tpu.dot_dimension_numbers<[1], [0], [0], [1], [0, 0, 1, 1], [], []>} : vector<1x64xbf16>, vector<64x64xbf16>, vector<1x64xf32> -> vector<1x64xf32>
    %c0_24 = arith.constant 0 : index
    %c0_25 = arith.constant 0 : index
    %c0_26 = arith.constant 0 : index
    %29 = vector.load %arg13[%c0_24, %c0_25, %c0_26] : memref<1x1x64xf32, #tpu.memory_space<vmem>>, vector<1x1x64xf32>
    %30 = vector.shape_cast %29 : vector<1x1x64xf32> to vector<1x64xf32>
    %31 = arith.addf %28, %30 : vector<1x64xf32>
    %cst_27 = arith.constant dense<0.000000e+00> : vector<64xf32>
    %32 = vector.multi_reduction <add>, %4, %cst_27 [1] : vector<64x64xf32> to vector<64xf32>
    %33 = vector.shape_cast %32 : vector<64xf32> to vector<64x1xf32>
    %cst_28 = arith.constant 6.400000e+01 : f32
    %34 = vector.broadcast %cst_28 : f32 to vector<64x1xf32>
    %35 = arith.divf %33, %34 : vector<64x1xf32>
    %36 = vector.broadcast %35 : vector<64x1xf32> to vector<64x64xf32>
    %37 = arith.subf %4, %36 : vector<64x64xf32>
    %38 = arith.mulf %37, %37 : vector<64x64xf32>
    %cst_29 = arith.constant dense<0.000000e+00> : vector<64xf32>
    %39 = vector.multi_reduction <add>, %38, %cst_29 [1] : vector<64x64xf32> to vector<64xf32>
    %40 = vector.shape_cast %39 : vector<64xf32> to vector<64x1xf32>
    %cst_30 = arith.constant 6.400000e+01 : f32
    %41 = vector.broadcast %cst_30 : f32 to vector<64x1xf32>
    %42 = arith.divf %40, %41 : vector<64x1xf32>
    %cst_31 = arith.constant 9.99999997E-7 : f32
    %43 = vector.broadcast %cst_31 : f32 to vector<64x1xf32>
    %44 = arith.addf %42, %43 : vector<64x1xf32>
    %45 = math.rsqrt %44 : vector<64x1xf32>
    %46 = vector.broadcast %45 : vector<64x1xf32> to vector<64x64xf32>
    %47 = arith.mulf %37, %46 : vector<64x64xf32>
    %48 = vector.broadcast %25 : vector<1x64xf32> to vector<64x64xf32>
    %49 = arith.mulf %47, %48 : vector<64x64xf32>
    %50 = vector.broadcast %19 : vector<1x64xf32> to vector<64x64xf32>
    %51 = arith.addf %49, %50 : vector<64x64xf32>
    %52 = arith.truncf %51 : vector<64x64xf32> to vector<64x64xbf16>
    %c0_32 = arith.constant 0 : index
    %c0_33 = arith.constant 0 : index
    %c0_34 = arith.constant 0 : index
    %53 = vector.load %arg14[%c0_32, %c0_33, %c0_34] : memref<1x64x448xbf16, #tpu.memory_space<vmem>>, vector<1x64x448xbf16>
    %54 = vector.shape_cast %53 : vector<1x64x448xbf16> to vector<64x448xbf16>
    %cst_35 = arith.constant dense<0.000000e+00> : vector<64x448xf32>
    %55 = tpu.matmul %52, %54, %cst_35 {dimension_numbers = #tpu.dot_dimension_numbers<[1], [0], [0], [1], [0, 0, 1, 1], [], []>} : vector<64x64xbf16>, vector<64x448xbf16>, vector<64x448xf32> -> vector<64x448xf32>
    %c0_36 = arith.constant 0 : index
    %c0_37 = arith.constant 0 : index
    %c0_38 = arith.constant 0 : index
    %56 = vector.load %arg15[%c0_36, %c0_37, %c0_38] : memref<1x1x448xf32, #tpu.memory_space<vmem>>, vector<1x1x448xf32>
    %57 = vector.shape_cast %56 : vector<1x1x448xf32> to vector<1x448xf32>
    %58 = vector.broadcast %57 : vector<1x448xf32> to vector<64x448xf32>
    %59 = arith.addf %55, %58 : vector<64x448xf32>
    %60 = vector.extract_strided_slice %59 {offsets = [0, 0], sizes = [64, 256], strides = [1, 1]} : vector<64x448xf32> to vector<64x256xf32>
    %61 = vector.extract_strided_slice %59 {offsets = [0, 256], sizes = [64, 64], strides = [1, 1]} : vector<64x448xf32> to vector<64x64xf32>
    %62 = vector.extract_strided_slice %59 {offsets = [0, 320], sizes = [64, 64], strides = [1, 1]} : vector<64x448xf32> to vector<64x64xf32>
    %63 = vector.extract_strided_slice %59 {offsets = [0, 384], sizes = [64, 64], strides = [1, 1]} : vector<64x448xf32> to vector<64x64xf32>
    %cst_39 = arith.constant 5.000000e-01 : f32
    %64 = vector.broadcast %cst_39 : f32 to vector<64x256xf32>
    %65 = arith.mulf %64, %60 : vector<64x256xf32>
    %cst_40 = arith.constant 4.471500e-02 : f32
    %66 = vector.broadcast %cst_40 : f32 to vector<64x256xf32>
    %67 = arith.mulf %66, %60 : vector<64x256xf32>
    %68 = arith.mulf %67, %60 : vector<64x256xf32>
    %69 = arith.mulf %68, %60 : vector<64x256xf32>
    %70 = arith.addf %60, %69 : vector<64x256xf32>
    %cst_41 = arith.constant 0.797884583 : f32
    %71 = vector.broadcast %cst_41 : f32 to vector<64x256xf32>
    %72 = arith.mulf %71, %70 : vector<64x256xf32>
    %73 = math.tanh %72 : vector<64x256xf32>
    %cst_42 = arith.constant 1.000000e+00 : f32
    %74 = vector.broadcast %cst_42 : f32 to vector<64x256xf32>
    %75 = arith.addf %74, %73 : vector<64x256xf32>
    %76 = arith.mulf %65, %75 : vector<64x256xf32>
    %c0_43 = arith.constant 0 : index
    %c0_44 = arith.constant 0 : index
    %77 = vector.load %arg7[%c0_43, %c0_44] : memref<64x64xbf16, #tpu.memory_space<vmem>>, vector<64x64xbf16>
    %78 = arith.mulf %61, %61 : vector<64x64xf32>
    %79 = arith.truncf %78 : vector<64x64xf32> to vector<64x64xbf16>
    %cst_45 = arith.constant dense<0.000000e+00> : vector<64x64xf32>
    %80 = tpu.matmul %79, %77, %cst_45 {dimension_numbers = #tpu.dot_dimension_numbers<[1], [0], [0], [1], [0, 0, 1, 1], [], []>} : vector<64x64xbf16>, vector<64x64xbf16>, vector<64x64xf32> -> vector<64x64xf32>
    %81 = arith.mulf %62, %62 : vector<64x64xf32>
    %82 = arith.truncf %81 : vector<64x64xf32> to vector<64x64xbf16>
    %cst_46 = arith.constant dense<0.000000e+00> : vector<64x64xf32>
    %83 = tpu.matmul %82, %77, %cst_46 {dimension_numbers = #tpu.dot_dimension_numbers<[1], [0], [0], [1], [0, 0, 1, 1], [], []>} : vector<64x64xbf16>, vector<64x64xbf16>, vector<64x64xf32> -> vector<64x64xf32>
    %cst_47 = arith.constant 9.99999997E-7 : f32
    %84 = vector.broadcast %cst_47 : f32 to vector<64x64xf32>
    %85 = arith.addf %80, %84 : vector<64x64xf32>
    %86 = math.rsqrt %85 : vector<64x64xf32>
    %87 = arith.mulf %61, %86 : vector<64x64xf32>
    %c0_48 = arith.constant 0 : index
    %c0_49 = arith.constant 0 : index
    %c0_50 = arith.constant 0 : index
    %88 = vector.load %arg16[%c0_48, %c0_49, %c0_50] : memref<1x1x64xf32, #tpu.memory_space<vmem>>, vector<1x1x64xf32>
    %89 = vector.shape_cast %88 : vector<1x1x64xf32> to vector<1x64xf32>
    %90 = vector.broadcast %89 : vector<1x64xf32> to vector<64x64xf32>
    %91 = arith.mulf %87, %90 : vector<64x64xf32>
    %cst_51 = arith.constant 9.99999997E-7 : f32
    %92 = vector.broadcast %cst_51 : f32 to vector<64x64xf32>
    %93 = arith.addf %83, %92 : vector<64x64xf32>
    %94 = math.rsqrt %93 : vector<64x64xf32>
    %95 = arith.mulf %62, %94 : vector<64x64xf32>
    %c0_52 = arith.constant 0 : index
    %c0_53 = arith.constant 0 : index
    %c0_54 = arith.constant 0 : index
    %96 = vector.load %arg17[%c0_52, %c0_53, %c0_54] : memref<1x1x64xf32, #tpu.memory_space<vmem>>, vector<1x1x64xf32>
    %97 = vector.shape_cast %96 : vector<1x1x64xf32> to vector<1x64xf32>
    %98 = vector.broadcast %97 : vector<1x64xf32> to vector<64x64xf32>
    %99 = arith.mulf %95, %98 : vector<64x64xf32>
    %c0_55 = arith.constant 0 : index
    %c0_56 = arith.constant 0 : index
    %100 = vector.load %arg4[%c0_55, %c0_56] : memref<64x64xf32, #tpu.memory_space<vmem>>, vector<64x64xf32>
    %c0_57 = arith.constant 0 : index
    %c0_58 = arith.constant 0 : index
    %101 = vector.load %arg5[%c0_57, %c0_58] : memref<64x64xf32, #tpu.memory_space<vmem>>, vector<64x64xf32>
    %c0_59 = arith.constant 0 : index
    %c0_60 = arith.constant 0 : index
    %102 = vector.load %arg6[%c0_59, %c0_60] : memref<64x64xbf16, #tpu.memory_space<vmem>>, vector<64x64xbf16>
    %103 = arith.mulf %91, %100 : vector<64x64xf32>
    %104 = arith.truncf %91 : vector<64x64xf32> to vector<64x64xbf16>
    %cst_61 = arith.constant dense<0.000000e+00> : vector<64x64xf32>
    %105 = tpu.matmul %104, %102, %cst_61 {dimension_numbers = #tpu.dot_dimension_numbers<[1], [0], [0], [1], [0, 0, 1, 1], [], []>} : vector<64x64xbf16>, vector<64x64xbf16>, vector<64x64xf32> -> vector<64x64xf32>
    %106 = arith.mulf %105, %101 : vector<64x64xf32>
    %107 = arith.addf %103, %106 : vector<64x64xf32>
    %108 = arith.truncf %107 : vector<64x64xf32> to vector<64x64xbf16>
    %109 = arith.mulf %99, %100 : vector<64x64xf32>
    %110 = arith.truncf %99 : vector<64x64xf32> to vector<64x64xbf16>
    %cst_62 = arith.constant dense<0.000000e+00> : vector<64x64xf32>
    %111 = tpu.matmul %110, %102, %cst_62 {dimension_numbers = #tpu.dot_dimension_numbers<[1], [0], [0], [1], [0, 0, 1, 1], [], []>} : vector<64x64xbf16>, vector<64x64xbf16>, vector<64x64xf32> -> vector<64x64xf32>
    %112 = arith.mulf %111, %101 : vector<64x64xf32>
    %113 = arith.addf %109, %112 : vector<64x64xf32>
    %114 = arith.truncf %113 : vector<64x64xf32> to vector<64x64xbf16>
    %115 = arith.truncf %63 : vector<64x64xf32> to vector<64x64xbf16>
    %116 = vector.extract_strided_slice %108 {offsets = [0, 0], sizes = [64, 32], strides = [1, 1]} : vector<64x64xbf16> to vector<64x32xbf16>
    %117 = vector.extract_strided_slice %114 {offsets = [0, 0], sizes = [64, 32], strides = [1, 1]} : vector<64x64xbf16> to vector<64x32xbf16>
    %118 = vector.extract_strided_slice %115 {offsets = [0, 0], sizes = [64, 32], strides = [1, 1]} : vector<64x64xbf16> to vector<64x32xbf16>
    %cst_63 = arith.constant dense<0.000000e+00> : vector<64x64xf32>
    %119 = tpu.matmul %116, %117, %cst_63 {dimension_numbers = #tpu.dot_dimension_numbers<[1], [1], [0], [0], [0, 0, 1, 0], [], []>} : vector<64x32xbf16>, vector<64x32xbf16>, vector<64x64xf32> -> vector<64x64xf32>
    %cst_64 = arith.constant dense<0xFF800000> : vector<64xf32>
    %120 = vector.multi_reduction <maximumf>, %119, %cst_64 [1] : vector<64x64xf32> to vector<64xf32>
    %121 = vector.shape_cast %120 : vector<64xf32> to vector<64x1xf32>
    %122 = vector.broadcast %121 : vector<64x1xf32> to vector<64x64xf32>
    %123 = arith.subf %119, %122 : vector<64x64xf32>
    %124 = math.exp %123 : vector<64x64xf32>
    %cst_65 = arith.constant dense<0.000000e+00> : vector<64xf32>
    %125 = vector.multi_reduction <add>, %124, %cst_65 [1] : vector<64x64xf32> to vector<64xf32>
    %126 = vector.shape_cast %125 : vector<64xf32> to vector<64x1xf32>
    %127 = tpu.reciprocal %126 {approx = true} : vector<64x1xf32> -> vector<64x1xf32>
    %128 = vector.broadcast %127 : vector<64x1xf32> to vector<64x64xf32>
    %129 = arith.mulf %124, %128 : vector<64x64xf32>
    %130 = arith.truncf %129 : vector<64x64xf32> to vector<64x64xbf16>
    %cst_66 = arith.constant dense<0.000000e+00> : vector<64x32xf32>
    %131 = tpu.matmul %130, %118, %cst_66 {dimension_numbers = #tpu.dot_dimension_numbers<[1], [0], [0], [1], [0, 0, 1, 1], [], []>} : vector<64x64xbf16>, vector<64x32xbf16>, vector<64x32xf32> -> vector<64x32xf32>
    %132 = vector.extract_strided_slice %108 {offsets = [0, 32], sizes = [64, 32], strides = [1, 1]} : vector<64x64xbf16> to vector<64x32xbf16>
    %133 = vector.extract_strided_slice %114 {offsets = [0, 32], sizes = [64, 32], strides = [1, 1]} : vector<64x64xbf16> to vector<64x32xbf16>
    %134 = vector.extract_strided_slice %115 {offsets = [0, 32], sizes = [64, 32], strides = [1, 1]} : vector<64x64xbf16> to vector<64x32xbf16>
    %cst_67 = arith.constant dense<0.000000e+00> : vector<64x64xf32>
    %135 = tpu.matmul %132, %133, %cst_67 {dimension_numbers = #tpu.dot_dimension_numbers<[1], [1], [0], [0], [0, 0, 1, 0], [], []>} : vector<64x32xbf16>, vector<64x32xbf16>, vector<64x64xf32> -> vector<64x64xf32>
    %cst_68 = arith.constant dense<0xFF800000> : vector<64xf32>
    %136 = vector.multi_reduction <maximumf>, %135, %cst_68 [1] : vector<64x64xf32> to vector<64xf32>
    %137 = vector.shape_cast %136 : vector<64xf32> to vector<64x1xf32>
    %138 = vector.broadcast %137 : vector<64x1xf32> to vector<64x64xf32>
    %139 = arith.subf %135, %138 : vector<64x64xf32>
    %140 = math.exp %139 : vector<64x64xf32>
    %cst_69 = arith.constant dense<0.000000e+00> : vector<64xf32>
    %141 = vector.multi_reduction <add>, %140, %cst_69 [1] : vector<64x64xf32> to vector<64xf32>
    %142 = vector.shape_cast %141 : vector<64xf32> to vector<64x1xf32>
    %143 = tpu.reciprocal %142 {approx = true} : vector<64x1xf32> -> vector<64x1xf32>
    %144 = vector.broadcast %143 : vector<64x1xf32> to vector<64x64xf32>
    %145 = arith.mulf %140, %144 : vector<64x64xf32>
    %146 = arith.truncf %145 : vector<64x64xf32> to vector<64x64xbf16>
    %cst_70 = arith.constant dense<0.000000e+00> : vector<64x32xf32>
    %147 = tpu.matmul %146, %134, %cst_70 {dimension_numbers = #tpu.dot_dimension_numbers<[1], [0], [0], [1], [0, 0, 1, 1], [], []>} : vector<64x64xbf16>, vector<64x32xbf16>, vector<64x32xf32> -> vector<64x32xf32>
    %148 = tpu.concatenate %131, %147 in 1 : vector<64x32xf32>, vector<64x32xf32> -> vector<64x64xf32>
    %149 = arith.truncf %148 : vector<64x64xf32> to vector<64x64xbf16>
    %c0_71 = arith.constant 0 : index
    %c0_72 = arith.constant 0 : index
    %c0_73 = arith.constant 0 : index
    %150 = vector.load %arg18[%c0_71, %c0_72, %c0_73] : memref<1x64x64xbf16, #tpu.memory_space<vmem>>, vector<1x64x64xbf16>
    %151 = vector.shape_cast %150 : vector<1x64x64xbf16> to vector<64x64xbf16>
    %cst_74 = arith.constant dense<0.000000e+00> : vector<64x64xf32>
    %152 = tpu.matmul %149, %151, %cst_74 {dimension_numbers = #tpu.dot_dimension_numbers<[1], [0], [0], [1], [0, 0, 1, 1], [], []>} : vector<64x64xbf16>, vector<64x64xbf16>, vector<64x64xf32> -> vector<64x64xf32>
    %153 = arith.truncf %76 : vector<64x256xf32> to vector<64x256xbf16>
    %c0_75 = arith.constant 0 : index
    %c0_76 = arith.constant 0 : index
    %c0_77 = arith.constant 0 : index
    %154 = vector.load %arg19[%c0_75, %c0_76, %c0_77] : memref<1x256x64xbf16, #tpu.memory_space<vmem>>, vector<1x256x64xbf16>
    %155 = vector.shape_cast %154 : vector<1x256x64xbf16> to vector<256x64xbf16>
    %cst_78 = arith.constant dense<0.000000e+00> : vector<64x64xf32>
    %156 = tpu.matmul %153, %155, %cst_78 {dimension_numbers = #tpu.dot_dimension_numbers<[1], [0], [0], [1], [0, 0, 1, 1], [], []>} : vector<64x256xbf16>, vector<256x64xbf16>, vector<64x64xf32> -> vector<64x64xf32>
    %157 = arith.addf %152, %156 : vector<64x64xf32>
    %c0_79 = arith.constant 0 : index
    %c0_80 = arith.constant 0 : index
    %c0_81 = arith.constant 0 : index
    %158 = vector.load %arg20[%c0_79, %c0_80, %c0_81] : memref<1x1x64xf32, #tpu.memory_space<vmem>>, vector<1x1x64xf32>
    %159 = vector.shape_cast %158 : vector<1x1x64xf32> to vector<1x64xf32>
    %160 = vector.broadcast %159 : vector<1x64xf32> to vector<64x64xf32>
    %161 = arith.addf %157, %160 : vector<64x64xf32>
    %162 = vector.broadcast %31 : vector<1x64xf32> to vector<64x64xf32>
    %163 = arith.mulf %162, %161 : vector<64x64xf32>
    %164 = arith.addf %4, %163 : vector<64x64xf32>
    %c0_82 = arith.constant 0 : index
    %c0_83 = arith.constant 0 : index
    %c0_84 = arith.constant 0 : index
    %165 = vector.load %arg21[%c0_82, %c0_83, %c0_84] : memref<1x64x64xf32, #tpu.memory_space<vmem>>, vector<1x64x64xf32>
    %166 = vector.shape_cast %165 : vector<1x64x64xf32> to vector<64x64xf32>
    %167 = vector.shape_cast %164 : vector<64x64xf32> to vector<1x64x64xf32>
    tpu.vector_store %arg21[%c0_82, %c0_83, %c0_84], %167 {strides = array<i32>} : memref<1x64x64xf32, #tpu.memory_space<vmem>>, vector<1x64x64xf32>,
    return
  }
  func.func @transform_0(%arg0: i32, %arg1: i32) -> (i32, i32, i32) {
    %c0_i32 = arith.constant 0 : i32
    %c0_i32_0 = arith.constant 0 : i32
    %c0_i32_1 = arith.constant 0 : i32
    return %arg0, %c0_i32, %c0_i32_0 : i32, i32, i32
  }
  func.func @transform_1(%arg0: i32, %arg1: i32) -> (i32, i32, i32) {
    %c0_i32 = arith.constant 0 : i32
    %c0_i32_0 = arith.constant 0 : i32
    %c0_i32_1 = arith.constant 0 : i32
    return %arg0, %c0_i32, %c0_i32_0 : i32, i32, i32
  }
  func.func @transform_2(%arg0: i32, %arg1: i32) -> (i32, i32) {
    %c0_i32 = arith.constant 0 : i32
    %c0_i32_0 = arith.constant 0 : i32
    %c0_i32_1 = arith.constant 0 : i32
    return %c0_i32, %c0_i32_0 : i32, i32
  }
  func.func @transform_3(%arg0: i32, %arg1: i32) -> (i32, i32) {
    %c0_i32 = arith.constant 0 : i32
    %c0_i32_0 = arith.constant 0 : i32
    %c0_i32_1 = arith.constant 0 : i32
    return %c0_i32, %c0_i32_0 : i32, i32
  }
  func.func @transform_4(%arg0: i32, %arg1: i32) -> (i32, i32) {
    %c0_i32 = arith.constant 0 : i32
    %c0_i32_0 = arith.constant 0 : i32
    %c0_i32_1 = arith.constant 0 : i32
    return %c0_i32, %c0_i32_0 : i32, i32
  }
  func.func @transform_5(%arg0: i32, %arg1: i32) -> (i32, i32) {
    %c0_i32 = arith.constant 0 : i32
    %c0_i32_0 = arith.constant 0 : i32
    %c0_i32_1 = arith.constant 0 : i32
    return %c0_i32, %c0_i32_0 : i32, i32
  }
  func.func @transform_6(%arg0: i32, %arg1: i32) -> (i32, i32, i32) {
    %c0_i32 = arith.constant 0 : i32
    %c0_i32_0 = arith.constant 0 : i32
    %c0_i32_1 = arith.constant 0 : i32
    return %arg1, %c0_i32, %c0_i32_0 : i32, i32, i32
  }
  func.func @transform_7(%arg0: i32, %arg1: i32) -> (i32, i32, i32) {
    %c0_i32 = arith.constant 0 : i32
    %c0_i32_0 = arith.constant 0 : i32
    %c0_i32_1 = arith.constant 0 : i32
    return %arg1, %c0_i32, %c0_i32_0 : i32, i32, i32
  }
  func.func @transform_8(%arg0: i32, %arg1: i32) -> (i32, i32, i32) {
    %c0_i32 = arith.constant 0 : i32
    %c0_i32_0 = arith.constant 0 : i32
    %c0_i32_1 = arith.constant 0 : i32
    return %arg1, %c0_i32, %c0_i32_0 : i32, i32, i32
  }
  func.func @transform_9(%arg0: i32, %arg1: i32) -> (i32, i32, i32) {
    %c0_i32 = arith.constant 0 : i32
    %c0_i32_0 = arith.constant 0 : i32
    %c0_i32_1 = arith.constant 0 : i32
    return %arg1, %c0_i32, %c0_i32_0 : i32, i32, i32
  }
  func.func @transform_10(%arg0: i32, %arg1: i32) -> (i32, i32, i32) {
    %c0_i32 = arith.constant 0 : i32
    %c0_i32_0 = arith.constant 0 : i32
    %c0_i32_1 = arith.constant 0 : i32
    return %arg1, %c0_i32, %c0_i32_0 : i32, i32, i32
  }
  func.func @transform_11(%arg0: i32, %arg1: i32) -> (i32, i32, i32) {
    %c0_i32 = arith.constant 0 : i32
    %c0_i32_0 = arith.constant 0 : i32
    %c0_i32_1 = arith.constant 0 : i32
    return %arg1, %c0_i32, %c0_i32_0 : i32, i32, i32
  }
  func.func @transform_12(%arg0: i32, %arg1: i32) -> (i32, i32, i32) {
    %c0_i32 = arith.constant 0 : i32
    %c0_i32_0 = arith.constant 0 : i32
    %c0_i32_1 = arith.constant 0 : i32
    return %arg1, %c0_i32, %c0_i32_0 : i32, i32, i32
  }
  func.func @transform_13(%arg0: i32, %arg1: i32) -> (i32, i32, i32) {
    %c0_i32 = arith.constant 0 : i32
    %c0_i32_0 = arith.constant 0 : i32
    %c0_i32_1 = arith.constant 0 : i32
    return %arg1, %c0_i32, %c0_i32_0 : i32, i32, i32
  }
  func.func @transform_14(%arg0: i32, %arg1: i32) -> (i32, i32, i32) {
    %c0_i32 = arith.constant 0 : i32
    %c0_i32_0 = arith.constant 0 : i32
    %c0_i32_1 = arith.constant 0 : i32
    return %arg1, %c0_i32, %c0_i32_0 : i32, i32, i32
  }
  func.func @transform_15(%arg0: i32, %arg1: i32) -> (i32, i32, i32) {
    %c0_i32 = arith.constant 0 : i32
    %c0_i32_0 = arith.constant 0 : i32
    %c0_i32_1 = arith.constant 0 : i32
    return %arg1, %c0_i32, %c0_i32_0 : i32, i32, i32
  }
  func.func @transform_16(%arg0: i32, %arg1: i32) -> (i32, i32, i32) {
    %c0_i32 = arith.constant 0 : i32
    %c0_i32_0 = arith.constant 0 : i32
    %c0_i32_1 = arith.constant 0 : i32
    return %arg1, %c0_i32, %c0_i32_0 : i32, i32, i32
  }
  func.func @transform_17(%arg0: i32, %arg1: i32) -> (i32, i32, i32) {
    %c0_i32 = arith.constant 0 : i32
    %c0_i32_0 = arith.constant 0 : i32
    %c0_i32_1 = arith.constant 0 : i32
    return %arg1, %c0_i32, %c0_i32_0 : i32, i32, i32
  }
  func.func @transform_18(%arg0: i32, %arg1: i32) -> (i32, i32, i32) {
    %c0_i32 = arith.constant 0 : i32
    %c0_i32_0 = arith.constant 0 : i32
    %c0_i32_1 = arith.constant 0 : i32
    return %arg1, %c0_i32, %c0_i32_0 : i32, i32, i32
  }
  func.func @transform_19(%arg0: i32, %arg1: i32) -> (i32, i32, i32) {
    %c0_i32 = arith.constant 0 : i32
    %c0_i32_0 = arith.constant 0 : i32
    %c0_i32_1 = arith.constant 0 : i32
    return %arg0, %c0_i32, %c0_i32_0 : i32, i32, i32
  }
}

</mosaic_0001>

<bundles_post_ra>
// kernel: tpu_custom_call.1
= control target key start
LH: loop header
LB: loop body
LE: loop exit
PB: predicated region body
PF: predicated region fallthrough
CT: control target
= control target key end

     0   :  { %s6716_s0 = inlined_call_operand.vmem [shape: f32[2,64,64], index: 0, kind: input, shape index: {}]   ;;  %s6717_s1 = inlined_call_operand.vmem [shape: f32[2,1,64], index: 1, kind: input, shape index: {}]   ;;  %s6718_s2 = inlined_call_operand.hbm [shape: f32[64,64], index: 2, kind: input, shape index: {}]   ;;  %s6719_s3 = inlined_call_operand.hbm [shape: f32[64,64], index: 3, kind: input, shape index: {}]   ;;  %s6720_s4 = inlined_call_operand.vmem [shape: bf16[64,64], index: 4, kind: input, shape index: {}]   ;;  %s6721_s5 = inlined_call_operand.hbm [shape: bf16[64,64], index: 5, kind: input, shape index: {}]   ;;  %s6722_s6 = inlined_call_operand.hbm [shape: bf16[2,64,64], index: 6, kind: input, shape index: {}]   ;;  %s6723_s7 = inlined_call_operand.hbm [shape: bf16[2,64,64], index: 7, kind: input, shape index: {}]   ;;  %s6724_s8 = inlined_call_operand.hbm [shape: bf16[2,64,64], index: 8, kind: input, shape index: {}]   ;;  %s6725_s9 = inlined_call_operand.vmem [shape: f32[2,1,64], index: 9, kind: input, shape index: {}]   ;;  %s6726_s10 = inlined_call_operand.hbm [shape: f32[2,1,64], index: 10, kind: input, shape index: {}]   ;;  %s6727_s11 = inlined_call_operand.hbm [shape: f32[2,1,64], index: 11, kind: input, shape index: {}]   ;;  %s6728_s12 = inlined_call_operand.vmem [shape: bf16[2,64,448], index: 12, kind: input, shape index: {}]   ;;  %s6729_s13 = inlined_call_operand.vmem [shape: f32[2,1,448], index: 13, kind: input, shape index: {}]   ;;  %s6730_s14 = inlined_call_operand.vmem [shape: f32[2,1,64], index: 14, kind: input, shape index: {}]   ;;  %s6731_s15 = inlined_call_operand.vmem [shape: f32[2,1,64], index: 15, kind: input, shape index: {}]   ;;  %s6732_s16 = inlined_call_operand.hbm [shape: bf16[2,64,64], index: 16, kind: input, shape index: {}]   ;;  %s6733_s17 = inlined_call_operand.vmem [shape: bf16[2,256,64], index: 17, kind: input, shape index: {}]   ;;  %s6734_s18 = inlined_call_operand.vmem [shape: f32[2,1,64], index: 18, kind: input, shape index: {}]   ;;  %s6735_s19 = inlined_call_operand.hbm [shape: f32[2,64,64], index: 19, kind: output, shape index: {}]  }
   0x1   :  { %6787 = sst [smem:[#allocation47_spill]] %s6716_s0 }
   0x2   :  { %6788 = sst [smem:[#allocation48_spill]] %s6717_s1 }
   0x3   :  { %6789 = sst [smem:[#allocation49_spill]] %s6718_s2 }
   0x4   :  { %6790 = sst [smem:[#allocation50_spill]] %s6719_s3 }
   0x5   :  { %6791 = sst [smem:[#allocation51_spill]] %s6720_s4 }
   0x6   :  { %6792 = sst [smem:[#allocation52_spill]] %s6721_s5 }
   0x7   :  { %6793 = sst [smem:[#allocation53_spill]] %s6722_s6 }
   0x8   :  { %6794 = sst [smem:[#allocation54_spill]] %s6723_s7 }
   0x9   :  { %6795 = sst [smem:[#allocation55_spill]] %s6724_s8 }
   0xa   :  { %6796 = sst [smem:[#allocation56_spill]] %s6725_s9 }
   0xb   :  { %6797 = sst [smem:[#allocation57_spill]] %s6726_s10 }
   0xc   :  { %6798 = sst [smem:[#allocation58_spill]] %s6727_s11 }
   0xd   :  { %6799 = sst [smem:[#allocation59_spill]] %s6728_s12 }
   0xe   :  { %6800 = sst [smem:[#allocation60_spill]] %s6729_s13 }
   0xf   :  { %6801 = sst [smem:[#allocation61_spill]] %s6730_s14 }
  0x10   :  { %6802 = sst [smem:[#allocation62_spill]] %s6731_s15 }
  0x11   :  { %6803 = sst [smem:[#allocation63_spill]] %s6732_s16 }
  0x12   :  { %6804 = sst [smem:[#allocation64_spill]] %s6733_s17 }
  0x13   :  { %6805 = sst [smem:[#allocation65_spill]] %s6734_s18 }
  0x14   :  { %6806 = sst [smem:[#allocation66_spill]] %s6735_s19 }
  0x15   :  { %24 = vsyncpa [#allocation3], 0 }
  0x16   :  { %25 = vsyncpa [#allocation6], 0 }
  0x17   :  { %26 = vsyncpa [#allocation9], 0 }
  0x18   :  { %28 = vsyncpa [#allocation9 + $0x1], 0 }
  0x19   :  { %29 = vsyncpa [#allocation12], 0 }
  0x1a   :  { %31 = vsyncpa [#allocation12 + $0x1], 0 }
  0x1b   :  { %32 = vsyncpa [#allocation15], 0 }
  0x1c   :  { %34 = vsyncpa [#allocation15 + $0x1], 0 }
  0x1d   :  { %35 = vsyncpa [#allocation4], 0 }
  0x1e   :  { %37 = vsyncpa [#allocation4 + $0x1], 0  ;;  %s5163_s0 = smov 0   ;;  %s5165_s30 = smov 0  }
  0x1f   :  { %s5167_s20 = smov 0   ;;  %s5169_s21 = smov 0  }
  0x20   :  { %s5171_s1 = smov 0   ;;  %s5173_s22 = smov 0  }
  0x21   :  { %s5175_s2 = smov 0   ;;  %s5177_s23 = smov 0  }
  0x22   :  { %s5179_s24 = smov 0   ;;  %s5181_s25 = smov 0  }
  0x23   :  { %s5183_s3 = smov 0  }
  0x24 LB: > { %6807 = sst [smem:[#allocation24_spill]] %s4999_s0  ;;  %s5217_s26 = sadd.s32 4294967295, %s5039_s3   ;;  %s5039_s3 = sphi %s5183_s3, %s43_s3   ;;  %s5035_s25 = sphi %s5181_s25, %s6929_s25   ;;  %s5031_s24 = sphi %s5179_s24, %s6928_s24   ;;  %s5027_s23 = sphi %s5177_s23, %s6927_s23   ;;  %s5023_s2 = sphi %s5175_s2, %s6926_s2   ;;  %s5019_s22 = sphi %s5173_s22, %s6925_s22   ;;  %s5015_s1 = sphi %s5171_s1, %s6924_s1   ;;  %s5011_s21 = sphi %s5169_s21, %s6923_s21   ;;  %s5007_s20 = sphi %s5167_s20, %s6922_s20   ;;  %s5003_s30 = sphi %s5165_s30, %s6921_s30   ;;  %s4999_s0 = sphi %s5163_s0, %s6920_s0  }
  0x25   : > { %6808 = sst [smem:[#allocation25_spill]] %s5003_s30  ;;  %s3755_s27 = sadd.s32 4294967294, %s5039_s3  }
  0x26   : > { %6809 = sst [smem:[#allocation26_spill]] %s5007_s20  ;;  %p205_p0 = scmp.ne.s32.totalorder %s5019_s22, %s5015_s1 }
  0x27   : > { %6810 = sst [smem:[#allocation27_spill]] %s5015_s1  ;;  %p206_p1 = scmp.eq.s32.totalorder %s5039_s3, 0 }
  0x28   : > { %6811 = sst [smem:[#allocation28_spill]] %s5019_s22  ;;  %p211_p2 = scmp.ne.s32.totalorder %s5015_s1, %s5011_s21 }
  0x29   : > { %6812 = sst [smem:[#allocation29_spill]] %s5023_s2  ;;  %p6744_p3 = scmp.eq.s32.totalorder %s5217_s26, 0 }
  0x2a   : > { %6813 = sst [smem:[#allocation30_spill]] %s5027_s23  ;;  %p5227_p4 = por %p206_p1, %p205_p0 }
  0x2b   : > { %6814 = sst [smem:[#allocation31_spill]] %s5031_s24  ;;  %p546_p5 = scmp.ne.s32.totalorder %s5007_s20, %s5003_s30 }
  0x2c   : > { %6815 = sst [smem:[#allocation32_spill]] %s5035_s25  ;;  %p5235_p6 = por %p6744_p3, %p211_p2 }
  0x2d   : > { %6816 = sst [smem:[#allocation33_spill]] %s5039_s3  ;;  %p547_p7 = scmp.eq.s32.totalorder %s5217_s26, 3 }
  0x2e   : > { %s6818_s4 = scalar_select %p5235_p6, 1, 0 }
  0x2f   : > { %p552_p8 = scmp.ne.s32.totalorder %s5003_s30, %s4999_s0  ;;  %p553_p9 = scmp.eq.s32.totalorder %s3755_s27, 3 }
  0x30   : > { %6819 = sst [smem:[#allocation34_spill]] %s6818_s4  ;;  %p5242_p10 = por %p547_p7, %p546_p5 }
  0x31   : > { %p3756_p11 = scmp.ge.s32.totalorder %s5039_s3, 1  ;;  %p5247_p12 = por %p553_p9, %p552_p8 }
  0x32   : > { %s6820_s21 = scalar_select %p5242_p10, 1, 0 }
  0x33   : > { %s6822_s29 = scalar_select %p5247_p12, 1, 0 }
  0x34   : > { %6821 = sst [smem:[#allocation35_spill]] %s6820_s21  ;;  %p560_p13 = scmp.lt.s32.totalorder %s5039_s3, 5 }
  0x35   : > { %6823 = sst [smem:[#allocation36_spill]] %s6822_s29  ;;  %s5041_s18 = smov [#allocation5]  }
  0x36   : > { %p5252_p0 = pnand %p3756_p11, %p560_p13  ;;  %s585_s0 = sshll.u32 %s5041_s18, 4  ;;  %s586_s0 = int_to_ptr.vmem [resolvable:$true] %s585_s0 }
  0x37   : > { %p4289_p2 = scmp.lt.s32.totalorder %s5039_s3, 4  ;;  %s6827_s15 = sld [smem:[#allocation50_spill]] }
  0x38   : > { %s6824_s28 = scalar_select %p5252_p0, 1, 0 }
  0x39   : > { %p4253_p1 = pneg %p5252_p0  ;;  %p5267_p7 = pnand %p4289_p2, %p5227_p4 }
  0x3b   : > { %p5261_p5 = pnand %p4253_p1, %p6744_p3 }
  0x3c   : > { %s6826_s29 = scalar_select %p5267_p7, 1, 0 }
  0x3d   : > { %s6825_s27 = scalar_select %p5261_p5, 1, 0 }
  0x3e   : > { %s4637_s14 = scalar_lea.hbm %s6827_s15, 1024  ;;  %p5279_p9 = pneg %p5261_p5 }
  0x3f   : > { %p4638_p8 = scmp.ne.s32.totalorder %s6827_s15, %s4637_s14  ;;  %p4644_p13 = scmp.lt.u32.totalorder %s4637_s14, %s6827_s15 }
  0x40   : > { %s6828_s18 = scalar_select %p5279_p9, 1, 0 }
  0x41   : > { %p4640_p11 = pnand %p5279_p9, %p4638_p8 }
  0x43   : > { %p4641_p4 = pneg %p4640_p11 }
  0x45   : > { %p4646_p1 = pnand %p4644_p13, %p4641_p4 }
  0x47   : > { %4649 = shalt.err (!%p4646_p1)
}
  0x48   : > { %s4650_s17 = scalar_lea.vmem %s586_s0, 1024  ;;  %p4658_p10 = scmp.lt.s32.totalorder %s586_s0, %s586_s0 }
  0x49   : > { %p4651_p2 = scmp.ne.s32.totalorder %s586_s0, %s4650_s17  ;;  %p4659_p6 = scmp.lt.s32.totalorder %s4650_s17, %s4650_s17 }
  0x4b   : > { %p4653_p3 = pnand %p4651_p2, %p5279_p9  ;;  %p4660_p0 = por %p4659_p6, %p4658_p10 }
  0x4d   : > { %p4654_p12 = pneg %p4653_p3 }
  0x4f   : > { %p4661_p7 = pnand %p4660_p0, %p4654_p12 }
  0x51   : > { %4664 = shalt.err (!%p4661_p7)
}
  0x52   : > { %s6751_s12 = smov 128   ;;  %s6752_s9 = smov 8  }
  0x53   : > { %4259 = dma.hbm_to_vmem [thread:$0]  (!%p5261_p5), %s6827_s15, 1024, %s586_s0, [#allocation6], %s6751_s12, %s6751_s12, %s6752_s9  }
  0x54   : > { %s52_s21 = sadd.s32 1, %s5031_s24  ;;  %s55_s19 = sadd.s32 1, %s5035_s25 }
  0x55   : > { %p53_p3 = scmp.ge.s32.totalorder %s52_s21, 2  ;;  %s5301_s17 = sand.u32 1, %s5039_s3  }
  0x56   : > { %s5309_s23 = sand.u32 1, %s5019_s22   ;;  %s5312_s0 = sshll.u32 %s5031_s24, 9 }
  0x57   : > { %s6931_s21 = smov (%p53_p3, %s52_s21), 0  ;;  %s6933_s19 = smov (!%p53_p3, %s55_s19), %s5035_s25 }
  0x58   : > { %6829 = sst [smem:[#allocation37_spill]] %s6931_s21  ;;  %s195_s2 = ssub.s32 %s5031_s24, %s6931_s21 }
  0x59   : > { %p57_p6 = scmp.ge.s32.totalorder %s6933_s19, 2  ;;  %p196_p10 = scmp.eq.s32.totalorder %s195_s2, 0 }
  0x5a   : > { %s6831_s13 = sadd.s32 1, %s5019_s22  ;;  %s5324_s9 = sshll.u32 %s5309_s23, 5 }
  0x5b   : > { %s6935_s19 = smov (%p57_p6, %s6933_s19), 0  ;;  %s6833_s6 = sld [smem:[#allocation53_spill]] }
  0x5c   : > { %6830 = sst [smem:[#allocation38_spill]] %s6935_s19  ;;  %s533_s12 = ssub.s32 %s5035_s25, %s6935_s19 }
  0x5d   : > { %s5319_s14 = scalar_select %p196_p10, %s5019_s22, %s6831_s13  }
  0x5e   : > { %p534_p12 = scmp.eq.s32.totalorder %s533_s12, 0  ;;  %s633_s3 = scalar_lea.vmem [#allocation8], %s5324_s9 }
  0x5f   : > { %6832 = sst [smem:[#allocation39_spill]] %s5319_s14  ;;  %s640_s30 = sshll.u32 %s633_s3, 4  ;;  %s5338_s30 = int_to_ptr.vmem [resolvable:$true] %s640_s30 }
  0x60   : > { %s6834_s4 = sadd.s32 1, %s5007_s20  ;;  %p6836_p7 = scmp.ne.s32.totalorder %s6826_s29, 0 }
  0x61   : > { %s5330_s21 = scalar_lea.hbm %s6833_s6, %s5312_s0  ;;  %s4670_s3 = scalar_lea.hbm %s6833_s6, 1024 }
  0x62   : > { %s5336_s1 = scalar_select %p534_p12, %s5007_s20, %s6834_s4  }
  0x63   : > { %s4665_s19 = scalar_lea.hbm %s5330_s21, 512  ;;  %p5345_p8 = pneg %p6836_p7 }
  0x64   : > { %6835 = sst [smem:[#allocation40_spill]] %s5336_s1  ;;  %p4666_p0 = scmp.ne.s32.totalorder %s5330_s21, %s4665_s19 }
  0x65   : > { %s6837_s12 = scalar_select %p5345_p8, 1, 0 }
  0x66   : > { %p4668_p11 = pnand %p5345_p8, %p4666_p0  ;;  %p4671_p13 = scmp.lt.u32.totalorder %s5330_s21, %s6833_s6 }
  0x67   : > { %p4672_p1 = scmp.lt.u32.totalorder %s4670_s3, %s4665_s19  ;;  %p4674_p3 = scmp.lt.u32.totalorder %s4665_s19, %s5330_s21 }
  0x68   : > { %p4669_p4 = pneg %p4668_p11 }
  0x69   : > { %p4673_p2 = por %p4672_p1, %p4671_p13 }
  0x6b   : > { %p4675_p6 = por %p4674_p3, %p4673_p2 }
  0x6d   : > { %p4676_p10 = pnand %p4675_p6, %p4669_p4 }
  0x6f   : > { %4679 = shalt.err (!%p4676_p10)
}
  0x70   : > { %s4680_s13 = scalar_lea.vmem %s5338_s30, 512  ;;  %s5044_s15 = smov [#allocation8]  }
  0x71   : > { %p4681_p12 = scmp.ne.s32.totalorder %s5338_s30, %s4680_s13  ;;  %s4685_s2 = sshll.u32 %s5044_s15, 4  ;;  %s4686_s2 = int_to_ptr.vmem [resolvable:$false] %s4685_s2 }
  0x72   : > { %s4687_s25 = scalar_lea.vmem %s4686_s2, 1024  ;;  %p4688_p5 = scmp.lt.s32.totalorder %s5338_s30, %s4686_s2 }
  0x73   : > { %p4683_p0 = pnand %p4681_p12, %p5345_p8  ;;  %p4689_p9 = scmp.lt.s32.totalorder %s4687_s25, %s4680_s13 }
  0x75   : > { %p4684_p11 = pneg %p4683_p0  ;;  %p4690_p13 = por %p4689_p9, %p4688_p5 }
  0x77   : > { %p4691_p1 = pnand %p4690_p13, %p4684_p11 }
  0x79   : > { %4694 = shalt.err (!%p4691_p1)
}
  0x7a   : > { %s6770_s19 = smov 64   ;;  %s6773_s3 = smov 4  }
  0x7b   : > { %s6838_s13 = scalar_lea.sflag [#allocation9], %s5301_s17  ;;  %s6839_s8 = sld [smem:[#allocation55_spill]] }
  0x7c   : > { %4266 = dma.hbm_to_vmem [thread:$0]  (!%p6836_p7), %s5330_s21, 512, %s5338_s30, %s6838_s13, %s6770_s19, %s6770_s19, %s6773_s3  }
  0x7d   : > { %s675_s25 = scalar_lea.vmem [#allocation11], %s5324_s9  ;;  %s3770_s14 = sshll.u32 %s5031_s24, 4 }
  0x7e   : > { %s682_s6 = sshll.u32 %s675_s25, 4  ;;  %s6840_s10 = sld [smem:[#allocation57_spill]]  ;;  %s5381_s6 = int_to_ptr.vmem [resolvable:$true] %s682_s6 }
  0x7f   : > { %s6772_s30 = scalar_lea.sflag [#allocation12], %s5301_s17 }
  0x81   : > { %s5377_s2 = scalar_lea.hbm %s6839_s8, %s5312_s0  ;;  %s4700_s15 = scalar_lea.hbm %s6839_s8, 1024 }
  0x82   : > { %s4695_s21 = scalar_lea.hbm %s5377_s2, 512  ;;  %p4701_p2 = scmp.lt.u32.totalorder %s5377_s2, %s6839_s8 }
  0x83   : > { %p4696_p5 = scmp.ne.s32.totalorder %s5377_s2, %s4695_s21  ;;  %p4702_p3 = scmp.lt.u32.totalorder %s4700_s15, %s4695_s21 }
  0x84   : > { %s5388_s20 = scalar_lea.hbm %s6840_s10, %s3770_s14  ;;  %p4704_p10 = scmp.lt.u32.totalorder %s4695_s21, %s5377_s2 }
  0x85   : > { %p4698_p9 = pnand %p4696_p5, %p5345_p8  ;;  %p4703_p6 = por %p4702_p3, %p4701_p2 }
  0x87   : > { %p4699_p4 = pneg %p4698_p9  ;;  %p4705_p12 = por %p4704_p10, %p4703_p6 }
  0x89   : > { %p4706_p0 = pnand %p4705_p12, %p4699_p4 }
  0x8b   : > { %4709 = shalt.err (!%p4706_p0)
}
  0x8c   : > { %s4710_s1 = scalar_lea.vmem %s5381_s6, 512  ;;  %s5047_s22 = smov [#allocation11]  }
  0x8d   : > { %p4711_p11 = scmp.ne.s32.totalorder %s5381_s6, %s4710_s1  ;;  %s4715_s13 = sshll.u32 %s5047_s22, 4  ;;  %s4716_s13 = int_to_ptr.vmem [resolvable:$false] %s4715_s13 }
  0x8e   : > { %s4717_s19 = scalar_lea.vmem %s4716_s13, 1024  ;;  %p4718_p5 = scmp.lt.s32.totalorder %s5381_s6, %s4716_s13 }
  0x8f   : > { %p4713_p13 = pnand %p4711_p11, %p5345_p8  ;;  %p4719_p9 = scmp.lt.s32.totalorder %s4717_s19, %s4710_s1 }
  0x91   : > { %p4714_p1 = pneg %p4713_p13  ;;  %p4720_p2 = por %p4719_p9, %p4718_p5 }
  0x93   : > { %p4721_p3 = pnand %p4720_p2, %p4714_p1 }
  0x95   : > { %4724 = shalt.err (!%p4721_p3)
}
  0x96   : > { %s6841_s21 = smov 64   ;;  %s6842_s11 = sld [smem:[#allocation58_spill]] }
  0x97   : > { %4272 = dma.hbm_to_vmem [thread:$0]  (!%p6836_p7), %s5377_s2, 512, %s5381_s6, %s6772_s30, %s6841_s21, %s6841_s21, %s6773_s3  }
  0x98   : > { %s718_s1 = scalar_lea.vmem [#allocation14], %s5309_s23  ;;  %s716_s13 = scalar_lea.sflag [#allocation15], %s5301_s17 }
  0x99   : > { %s725_s22 = sshll.u32 %s718_s1, 4  ;;  %s726_s22 = int_to_ptr.vmem [resolvable:$true] %s725_s22 }
  0x9c   : > { %s5422_s25 = scalar_lea.hbm %s6842_s11, %s3770_s14  ;;  %s4730_s30 = scalar_lea.hbm %s6842_s11, 32 }
  0x9d   : > { %s4725_s19 = scalar_lea.hbm %s5422_s25, 16  ;;  %p4731_p12 = scmp.lt.u32.totalorder %s5422_s25, %s6842_s11 }
  0x9e   : > { %p4726_p4 = scmp.ne.s32.totalorder %s5422_s25, %s4725_s19  ;;  %p4732_p0 = scmp.lt.u32.totalorder %s4730_s30, %s4725_s19 }
  0x9f   : > { %p4734_p13 = scmp.lt.u32.totalorder %s4725_s19, %s5422_s25 }
  0xa0   : > { %p4728_p6 = pnand %p4726_p4, %p5345_p8  ;;  %p4733_p11 = por %p4732_p0, %p4731_p12 }
  0xa2   : > { %p4729_p10 = pneg %p4728_p6  ;;  %p4735_p1 = por %p4734_p13, %p4733_p11 }
  0xa4   : > { %p4736_p5 = pnand %p4735_p1, %p4729_p10 }
  0xa6   : > { %4739 = shalt.err (!%p4736_p5)
}
  0xa7   : > { %s4740_s15 = scalar_lea.vmem %s726_s22, 16  ;;  %s5048_s1 = smov [#allocation14]  }
  0xa8   : > { %p4741_p9 = scmp.ne.s32.totalorder %s726_s22, %s4740_s15  ;;  %s4745_s3 = sshll.u32 %s5048_s1, 4  ;;  %s4746_s3 = int_to_ptr.vmem [resolvable:$false] %s4745_s3 }
  0xa9   : > { %s4747_s6 = scalar_lea.vmem %s4746_s3, 32  ;;  %p4748_p4 = scmp.lt.s32.totalorder %s726_s22, %s4746_s3 }
  0xaa   : > { %p4743_p2 = pnand %p4741_p9, %p5345_p8  ;;  %p4749_p6 = scmp.lt.s32.totalorder %s4747_s6, %s4740_s15 }
  0xac   : > { %p4744_p3 = pneg %p4743_p2  ;;  %p4750_p7 = por %p4749_p6, %p4748_p4 }
  0xae   : > { %p4751_p0 = pnand %p4750_p7, %p4744_p3 }
  0xb0   : > { %4754 = shalt.err (!%p4751_p0)
}
  0xb1   : > { %p6843_p12 = scmp.ne.s32.totalorder %s6826_s29, 0  ;;  %s5049_s30 = smov [#allocation2]  }
  0xb2   : > { %s572_s19 = sshll.u32 %s5049_s30, 4  ;;  %s5050_s2 = smov [#allocation7]   ;;  %s573_s19 = int_to_ptr.vmem [resolvable:$true] %s572_s19 }
  0xb3   : > { %4278 = dma.hbm_to_vmem [thread:$0]  (!%p6843_p12), %s5422_s25, 16, %s726_s22, %s716_s13  }
  0xb4   : > { %s601_s4 = sshll.u32 %s5050_s2, 4  ;;  %s6844_s8 = sld [smem:[#allocation49_spill]]  ;;  %s602_s4 = int_to_ptr.vmem [resolvable:$true] %s601_s4 }
  0xb5   : > { %p6845_p10 = scmp.ne.s32.totalorder %s6828_s18, 0 }
  0xba   : > { %s4755_s3 = scalar_lea.hbm %s6844_s8, 1024 }
  0xbb   : > { %p4756_p7 = scmp.ne.s32.totalorder %s6844_s8, %s4755_s3  ;;  %p4762_p1 = scmp.lt.u32.totalorder %s4755_s3, %s6844_s8 }
  0xbd   : > { %p4758_p11 = pnand %p4756_p7, %p6845_p10 }
  0xbf   : > { %p4759_p13 = pneg %p4758_p11 }
  0xc1   : > { %p4764_p5 = pnand %p4762_p1, %p4759_p13 }
  0xc3   : > { %4767 = shalt.err (!%p4764_p5)
}
  0xc4   : > { %s4768_s25 = scalar_lea.vmem %s573_s19, 1024  ;;  %p4776_p4 = scmp.lt.s32.totalorder %s573_s19, %s573_s19 }
  0xc5   : > { %p4769_p9 = scmp.ne.s32.totalorder %s573_s19, %s4768_s25  ;;  %p4777_p6 = scmp.lt.s32.totalorder %s4768_s25, %s4768_s25 }
  0xc7   : > { %p4771_p2 = pnand %p4769_p9, %p6845_p10  ;;  %p4778_p0 = por %p4777_p6, %p4776_p4 }
  0xc9   : > { %p4772_p3 = pneg %p4771_p2 }
  0xcb   : > { %p4779_p12 = pnand %p4778_p0, %p4772_p3 }
  0xcd   : > { %4782 = shalt.err (!%p4779_p12)
}
  0xce   : > { %p6846_p7 = scmp.ne.s32.totalorder %s6825_s27, 0  ;;  %s6847_s22 = smov 8  }
  0xcf   : > { %s6848_s30 = smov 128   ;;  %s6849_s5 = sld [smem:[#allocation52_spill]] }
  0xd0   : > { %4256 = dma.hbm_to_vmem [thread:$0]  (!%p6846_p7), %s6844_s8, 1024, %s573_s19, [#allocation3], %s6848_s30, %s6848_s30, %s6847_s22  }
  0xd5   : > { %s4783_s1 = scalar_lea.hbm %s6849_s5, 512 }
  0xd6   : > { %p4784_p11 = scmp.ne.s32.totalorder %s6849_s5, %s4783_s1  ;;  %p4790_p1 = scmp.lt.u32.totalorder %s4783_s1, %s6849_s5 }
  0xd8   : > { %p4786_p12 = pnand %p4784_p11, %p6845_p10 }
  0xda   : > { %p4787_p13 = pneg %p4786_p12 }
  0xdc   : > { %p4792_p5 = pnand %p4790_p1, %p4787_p13 }
  0xde   : > { %4795 = shalt.err (!%p4792_p5)
}
  0xdf   : > { %s4796_s11 = scalar_lea.vmem %s602_s4, 512  ;;  %p4804_p4 = scmp.lt.s32.totalorder %s602_s4, %s602_s4 }
  0xe0   : > { %p4797_p9 = scmp.ne.s32.totalorder %s602_s4, %s4796_s11  ;;  %p4805_p6 = scmp.lt.s32.totalorder %s4796_s11, %s4796_s11 }
  0xe2   : > { %p4799_p2 = pnand %p4797_p9, %p6845_p10  ;;  %p4806_p0 = por %p4805_p6, %p4804_p4 }
  0xe4   : > { %p4800_p3 = pneg %p4799_p2 }
  0xe6   : > { %p4807_p8 = pnand %p4806_p0, %p4800_p3 }
  0xe8   : > { %4810 = shalt.err (!%p4807_p8)
}
  0xe9   : > { %s6850_s19 = smov 4   ;;  %s6851_s7 = sld [smem:[#allocation54_spill]] }
  0xea   : > { %4262 = dma.hbm_to_vmem [thread:$0]  (!%p6846_p7), %s6849_s5, 512, %s602_s4, [#allocation6], %s6841_s21, %s6841_s21, %s6850_s19  }
  0xeb   : > { %s654_s27 = scalar_lea.vmem [#allocation10], %s5324_s9  ;;  %p6852_p10 = scmp.ne.s32.totalorder %s6837_s12, 0 }
  0xec   : > { %s661_s14 = sshll.u32 %s654_s27, 4  ;;  %s5494_s14 = int_to_ptr.vmem [resolvable:$true] %s661_s14 }
  0xef   : > { %s5491_s2 = scalar_lea.hbm %s6851_s7, %s5312_s0  ;;  %s4816_s15 = scalar_lea.hbm %s6851_s7, 1024 }
  0xf0   : > { %s4811_s1 = scalar_lea.hbm %s5491_s2, 512  ;;  %p4817_p7 = scmp.lt.u32.totalorder %s5491_s2, %s6851_s7 }
  0xf1   : > { %p4812_p8 = scmp.ne.s32.totalorder %s5491_s2, %s4811_s1  ;;  %p4818_p13 = scmp.lt.u32.totalorder %s4816_s15, %s4811_s1 }
  0xf2   : > { %p4820_p5 = scmp.lt.u32.totalorder %s4811_s1, %s5491_s2 }
  0xf3   : > { %p4814_p11 = pnand %p4812_p8, %p6852_p10  ;;  %p4819_p1 = por %p4818_p13, %p4817_p7 }
  0xf5   : > { %p4815_p12 = pneg %p4814_p11  ;;  %p4821_p9 = por %p4820_p5, %p4819_p1 }
  0xf7   : > { %p4822_p2 = pnand %p4821_p9, %p4815_p12 }
  0xf9   : > { %4825 = shalt.err (!%p4822_p2)
}
  0xfa   : > { %s4826_s11 = scalar_lea.vmem %s5494_s14, 512  ;;  %s5051_s22 = smov [#allocation10]  }
  0xfb   : > { %p4827_p3 = scmp.ne.s32.totalorder %s5494_s14, %s4826_s11  ;;  %s4831_s30 = sshll.u32 %s5051_s22, 4  ;;  %s4832_s30 = int_to_ptr.vmem [resolvable:$false] %s4831_s30 }
  0xfc   : > { %s4833_s18 = scalar_lea.vmem %s4832_s30, 1024  ;;  %p4834_p0 = scmp.lt.s32.totalorder %s5494_s14, %s4832_s30 }
  0xfd   : > { %p4829_p4 = pnand %p4827_p3, %p6852_p10  ;;  %p4835_p8 = scmp.lt.s32.totalorder %s4833_s18, %s4826_s11 }
  0xff   : > { %p4830_p6 = pneg %p4829_p4  ;;  %p4836_p11 = por %p4835_p8, %p4834_p0 }
 0x101   : > { %p4837_p7 = pnand %p4836_p11, %p4830_p6 }
 0x103   : > { %4840 = shalt.err (!%p4837_p7)
}
 0x104   : > { %p6853_p12 = scmp.ne.s32.totalorder %s6826_s29, 0  ;;  %s6854_s24 = scalar_lea.sflag [#allocation9], %s5301_s17 }
 0x105   : > { %s701_s27 = scalar_lea.vmem [#allocation13], %s5309_s23  ;;  %s6855_s16 = sld [smem:[#allocation63_spill]] }
 0x106   : > { %4269 = dma.hbm_to_vmem [thread:$0]  (!%p6853_p12), %s5491_s2, 512, %s5494_s14, %s6854_s24, %s6841_s21, %s6841_s21, %s6850_s19  }
 0x107   : > { %s708_s1 = sshll.u32 %s701_s27, 4  ;;  %s4841_s6 = scalar_lea.hbm %s5388_s20, 16  ;;  %s709_s1 = int_to_ptr.vmem [resolvable:$true] %s708_s1 }
 0x108   : > { %p4842_p13 = scmp.ne.s32.totalorder %s5388_s20, %s4841_s6  ;;  %s4846_s22 = scalar_lea.hbm %s6840_s10, 32 }
 0x109   : > { %p4847_p9 = scmp.lt.u32.totalorder %s5388_s20, %s6840_s10  ;;  %p4848_p2 = scmp.lt.u32.totalorder %s4846_s22, %s4841_s6 }
 0x10a   : > { %p4844_p1 = pnand %p4842_p13, %p6852_p10  ;;  %p4850_p4 = scmp.lt.u32.totalorder %s4841_s6, %s5388_s20 }
 0x10b   : > { %s5527_s15 = scalar_lea.hbm %s6855_s16, %s5312_s0  ;;  %p4849_p3 = por %p4848_p2, %p4847_p9 }
 0x10c   : > { %p4845_p5 = pneg %p4844_p1 }
 0x10d   : > { %p4851_p6 = por %p4850_p4, %p4849_p3 }
 0x10f   : > { %p4852_p0 = pnand %p4851_p6, %p4845_p5 }
 0x111   : > { %4855 = shalt.err (!%p4852_p0)
}
 0x112   : > { %s4856_s23 = scalar_lea.vmem %s709_s1, 16  ;;  %s5052_s0 = smov [#allocation13]  }
 0x113   : > { %p4857_p8 = scmp.ne.s32.totalorder %s709_s1, %s4856_s23  ;;  %s4861_s2 = sshll.u32 %s5052_s0, 4  ;;  %s4862_s2 = int_to_ptr.vmem [resolvable:$false] %s4861_s2 }
 0x114   : > { %s4863_s14 = scalar_lea.vmem %s4862_s2, 32  ;;  %p4864_p13 = scmp.lt.s32.totalorder %s709_s1, %s4862_s2 }
 0x115   : > { %p4859_p11 = pnand %p4857_p8, %p6852_p10  ;;  %p4865_p1 = scmp.lt.s32.totalorder %s4863_s14, %s4856_s23 }
 0x117   : > { %p4860_p7 = pneg %p4859_p11  ;;  %p4866_p12 = por %p4865_p1, %p4864_p13 }
 0x119   : > { %p4867_p2 = pnand %p4866_p12, %p4860_p7 }
 0x11b   : > { %4870 = shalt.err (!%p4867_p2)
}
 0x11c   : > { %p6856_p9 = scmp.ne.s32.totalorder %s6826_s29, 0  ;;  %s6857_s24 = scalar_lea.sflag [#allocation12], %s5301_s17 }
 0x11d   : > { %s763_s27 = scalar_lea.vmem [#allocation16], %s5324_s9  ;;  %s4871_s4 = scalar_lea.hbm %s5527_s15, 512 }
 0x11e   : > { %4275 = dma.hbm_to_vmem [thread:$0]  (!%p6856_p9), %s5388_s20, 16, %s709_s1, %s6857_s24  }
 0x11f   : > { %s770_s3 = sshll.u32 %s763_s27, 4  ;;  %p4872_p5 = scmp.ne.s32.totalorder %s5527_s15, %s4871_s4  ;;  %s5549_s3 = int_to_ptr.vmem [resolvable:$true] %s770_s3 }
 0x120   : > { %s4876_s11 = scalar_lea.hbm %s6855_s16, 1024  ;;  %p4877_p4 = scmp.lt.u32.totalorder %s5527_s15, %s6855_s16 }
 0x121   : > { %p4874_p12 = pnand %p4872_p5, %p6852_p10  ;;  %p4878_p6 = scmp.lt.u32.totalorder %s4876_s11, %s4871_s4 }
 0x122   : > { %p4880_p8 = scmp.lt.u32.totalorder %s4871_s4, %s5527_s15 }
 0x123   : > { %p4875_p3 = pneg %p4874_p12  ;;  %p4879_p0 = por %p4878_p6, %p4877_p4 }
 0x125   : > { %p4881_p11 = por %p4880_p8, %p4879_p0 }
 0x127   : > { %p4882_p7 = pnand %p4881_p11, %p4875_p3 }
 0x129   : > { %4885 = shalt.err (!%p4882_p7)
}
 0x12a   : > { %s4886_s20 = scalar_lea.vmem %s5549_s3, 512  ;;  %s5053_s9 = smov [#allocation16]  }
 0x12b   : > { %p4887_p13 = scmp.ne.s32.totalorder %s5549_s3, %s4886_s20  ;;  %s4891_s1 = sshll.u32 %s5053_s9, 4  ;;  %s4892_s1 = int_to_ptr.vmem [resolvable:$false] %s4891_s1 }
 0x12c   : > { %s4893_s18 = scalar_lea.vmem %s4892_s1, 1024  ;;  %p4894_p5 = scmp.lt.s32.totalorder %s5549_s3, %s4892_s1 }
 0x12d   : > { %p4889_p1 = pnand %p4887_p13, %p6852_p10  ;;  %p4895_p12 = scmp.lt.s32.totalorder %s4893_s18, %s4886_s20 }
 0x12f   : > { %p4890_p2 = pneg %p4889_p1  ;;  %p4896_p4 = por %p4895_p12, %p4894_p5 }
 0x131   : > { %p4897_p6 = pnand %p4896_p4, %p4890_p2 }
 0x133   : > { %4900 = shalt.err (!%p4897_p6)
}
 0x134   : > { %4281 = dma.hbm_to_vmem [thread:$0]  (!%p6856_p9), %s5527_s15, 512, %s5549_s3, %s716_s13, %s6841_s21, %s6841_s21, %s6850_s19  }
 0x135   : > { %p6858_p10 = scmp.ne.s32.totalorder %s6824_s28, 0 }
 0x137   : > { %796 = sbr.rel (%p6858_p10) target bundleno = 3709 (0xe7d), region = 96 }
 0x13e   : > { %p6859_p3 = scmp.eq.s32.totalorder %s5217_s26, 0 }
 0x140   : > { %4974 = dma.done.wait (%p6859_p3), [#allocation3], 1024   ;;  %p6860_p0 = pmov %p6859_p3 }
 0x142   : > { %4976 = vsyncadd (%p6860_p0), [#allocation3], 4294966272  ;;  %p6861_p8 = pmov %p6860_p0 }
 0x143   : > { %p6862_p11 = pmov %p6860_p0 }
 0x144   : > { %4978 = dma.done.wait (%p6861_p8), [#allocation6], 1536  }
 0x145   : > { %4980 = vsyncadd (%p6862_p11), [#allocation6], 4294965760  ;;  %s6863_s29 = sld [smem:[#allocation27_spill]]  ;;  %s6864_s17 = sld [smem:[#allocation34_spill]] }
 0x146   : > { %s810_s12 = sand.u32 1, %s5217_s26  }
 0x147   : > { %s811_s13 = scalar_lea.sflag [#allocation9], %s810_s12 }
 0x14b   : > { %s5589_s21 = sand.u32 1, %s6863_s29   ;;  %p6866_p9 = scmp.ne.s32.totalorder %s6864_s17, 0 }
 0x14c   : > { %6865 = sst [smem:[#allocation41_spill]] %s5589_s21  ;;  %s5592_s28 = sshll.u32 %s5589_s21, 5 }
 0x14d   : > { %s5595_s19 = scalar_lea.vmem [#allocation8], %s5592_s28 }
 0x14e   : > { %4982 = dma.done.wait (%p6866_p9), %s811_s13, 1024  }
 0x14f   : > { %4984 = vsyncadd (%p6866_p9), %s811_s13, 4294966272  ;;  %s5602_s15 = scalar_lea.vmem [#allocation10], %s5592_s28  ;;  %s829_s26 = scalar_lea.sflag [#allocation12], %s810_s12 }
 0x150   : > { %s5605_s23 = scalar_lea.vmem [#allocation11], %s5592_s28 }
 0x151   : > { %4986 = dma.done.wait (%p6866_p9), %s829_s26, 528  }
 0x152   : > { %4988 = vsyncadd (%p6866_p9), %s829_s26, 4294966768  ;;  %s846_s2 = scalar_lea.sflag [#allocation15], %s810_s12 }
 0x153   : > { %4990 = dma.done.wait (%p6866_p9), %s846_s2, 528  }
 0x154   : > { %4992 = vsyncadd (%p6866_p9), %s846_s2, 4294966768  ;;  %s6867_s24 = sld [smem:[#allocation25_spill]]  ;;  %s6868_s27 = sld [smem:[#allocation30_spill]] }
 0x155   : > { %s6869_s3 = sld [smem:[#allocation29_spill]]  ;;  %s6871_s29 = sld [smem:[#allocation47_spill]] }
 0x156   : > { %s6873_s5 = sld [smem:[#allocation59_spill]]  ;;  %s6875_s16 = sld [smem:[#allocation60_spill]] }
 0x157   : > { %s6876_s1 = sld [smem:[#allocation61_spill]]  ;;  %s6877_s12 = sld [smem:[#allocation62_spill]] }
 0x158   : > { %s6878_s9 = sld [smem:[#allocation64_spill]]  ;;  %s6879_s14 = sld [smem:[#allocation65_spill]] }
 0x159   : > { %s5670_s8 = scalar_lea.vmem [#allocation16], %s5592_s28 }
 0x15a   : > { %s6779_s4 = sand.u32 1, %s6867_s24   ;;  %p969_p7 = scmp.lt.s32.totalorder %s6868_s27, 1 }
 0x15b   : > { %s3783_s6 = sshll.u32 %s6779_s4, 6  ;;  %p977_p13 = scmp.lt.s32.totalorder %s6869_s3, 1 }
 0x15c   : > { %s6937_s27 = smov (!%p969_p7, %s6868_s27), 1  ;;  %s5672_s10 = scalar_lea.vmem [#allocation17], %s3783_s6 }
 0x15d   : > { %s5626_s25 = scalar_select %p977_p13, %s6869_s3, 1 }
 0x15e   : > { %s3908_s11 = sshll.u32 %s6937_s27, 6  ;;  %p3791_p1 = scmp.ne.s32.totalorder %s6869_s3, 0 }
 0x15f   : > { %s973_s17 = scalar_lea.vmem %s6871_s29, %s3908_s11  ;;  %s3909_s24 = sshll.u32 %s5626_s25, 7  ;;  %vm1016_vm0 = vcmask (!%p3791_p1), 523264  }
 0x160   : > { %s3788_s4 = sshll.u32 %s5626_s25, 2  ;;  %s5645_s7 = scalar_lea.vmem %s6873_s5, %s3909_s24  ;;  %v1008_v0 = vld [vmem:[%s973_s17] sm:$0xff] (!%p3791_p1)  ;;  %v1009_v1 = vld [vmem:[%s973_s17 + $0x8] sm:$0xff] (!%p3791_p1)  ;;  %v1010_v2 = vld [vmem:[%s973_s17 + $0x10] sm:$0xff] (!%p3791_p1) }
 0x161   : > { %6874 = sst [smem:[#allocation42_spill]] %s5645_s7  ;;  %s5650_s22 = scalar_lea.vmem %s6875_s16, %s3788_s4  ;;  %1017 = vst.msk [vmem:[%s5672_s10] sm:$0xff] (!%p3791_p1), %vm1016_vm0, %v1008_v0  ;;  %1018 = vst.msk [vmem:[%s5672_s10 + $0x8] sm:$0xff] (!%p3791_p1), %vm1016_vm0, %v1009_v1  ;;  %v1011_v3 = vld [vmem:[%s973_s17 + $0x18] sm:$0xff] (!%p3791_p1)  ;;  %v1012_v4 = vld [vmem:[%s973_s17 + $0x20] sm:$0xff] (!%p3791_p1) }
 0x162   : > { %s991_s11 = scalar_lea.vmem %s6876_s1, %s5626_s25  ;;  %s994_s13 = scalar_lea.vmem %s6877_s12, %s5626_s25  ;;  %1019 = vst.msk [vmem:[%s5672_s10 + $0x10] sm:$0xff] (!%p3791_p1), %vm1016_vm0, %v1010_v2  ;;  %v1013_v5 = vld [vmem:[%s973_s17 + $0x28] sm:$0xff] (!%p3791_p1)  ;;  %1020 = vst.msk [vmem:[%s5672_s10 + $0x18] sm:$0xff] (!%p3791_p1), %vm1016_vm0, %v1011_v3  ;;  %v1014_v6 = vld [vmem:[%s973_s17 + $0x30] sm:$0xff] (!%p3791_p1) }
 0x163   : > { %s5663_s21 = scalar_lea.vmem %s6878_s9, %s3909_s24  ;;  %s1002_s7 = scalar_lea.vmem %s6879_s14, %s5626_s25  ;;  %1021 = vst.msk [vmem:[%s5672_s10 + $0x20] sm:$0xff] (!%p3791_p1), %vm1016_vm0, %v1012_v4  ;;  %1022 = vst.msk [vmem:[%s5672_s10 + $0x28] sm:$0xff] (!%p3791_p1), %vm1016_vm0, %v1013_v5  ;;  %v1015_v7 = vld [vmem:[%s973_s17 + $0x38] sm:$0xff] (!%p3791_p1) }
 0x164   : > { %1007 = sbr.rel (%p3791_p1) target bundleno = 363 (0x16b), region = 136  ;;  %1023 = vst.msk [vmem:[%s5672_s10 + $0x30] sm:$0xff] (!%p3791_p1), %vm1016_vm0, %v1014_v6  ;;  %1024 = vst.msk [vmem:[%s5672_s10 + $0x38] sm:$0xff] (!%p3791_p1), %vm1016_vm0, %v1015_v7 }
 0x16b PF: > { %v5684_v8 = vld [vmem:[%s5672_s10] sm:$0xff]  ;;  %vm1075_vm1 = vcmask 523264   ;;  %v5687_v9 = vld [vmem:[%s5672_s10 + $0x10] sm:$0xff]  ;;  %v5690_v10 = vld [vmem:[%s5672_s10 + $0x8] sm:$0xff]  ;;  %v5054_v14 = vmov 0.0   ;;  %vm5055_vm2 = vmmov 0  }
 0x16c   : > { %v1265_v11 = vsel %vm1075_vm1, %v5684_v8, 0.0  ;;  %v1271_v12 = vsel %vm1075_vm1, %v5687_v9, 0.0  ;;  %v5697_v13 = vld [vmem:[%s5672_s10 + $0x18] sm:$0xff]  ;;  %4051 = vmatprep.subr.bf16.mxu1 %v5054_v14  ;;  %4039 = vmatprep.subr.bf16.mxu0 %v5054_v14  ;;  %v1268_v15 = vsel %vm1075_vm1, %v5690_v10, 0.0  ;;  %v5704_v16 = vld [vmem:[%s5672_s10 + $0x20] sm:$0xff]  ;;  %v5710_v19 = vld [vmem:[%s5672_s10 + $0x28] sm:$0xff] }
 0x16d   : > { %1266 = vadd.xlane.f32.xlu0 %v1265_v11  ;;  %1272 = vadd.xlane.f32.xlu1 %v1271_v12  ;;  %v4417_v17 = vld [vmem:[%s5602_s15] sm:$0xff]   ;;  %v1274_v18 = vsel %vm1075_vm1, %v5697_v13, 0.0  ;;  %v5717_v20 = vld [vmem:[%s5672_s10 + $0x30] sm:$0xff]  ;;  %v4419_v22 = vld [vmem:[%s5602_s15 + $0x8] sm:$0xff]   ;;  %v1277_v23 = vsel %vm1075_vm1, %v5704_v16, 0.0  ;;  %v1280_v25 = vsel %vm1075_vm1, %v5710_v19, 0.0 }
 0x16e   : > { %4059 = vmatprep.mubr.msk.bf16.mxu1 %vm5055_vm2, %v5054_v14  ;;  %4047 = vmatprep.mubr.msk.bf16.mxu0 %vm5055_vm2, %v5054_v14  ;;  %v4418_v21 = vld [vmem:[%s5595_s19] sm:$0xff]   ;;  %v4420_v26 = vld [vmem:[%s5595_s19 + $0x8] sm:$0xff]   ;;  %v4421_v27 = vld [vmem:[%s5602_s15 + $0x10] sm:$0xff]   ;;  %v1283_v28 = vsel %vm1075_vm1, %v5717_v20, 0.0  ;;  %s6880_s3 = sld [smem:[#allocation48_spill]]  ;;  %s5057_s30 = smov 64  }
 0x16f   : > { %4052 = vmatpush3.bf16.msra.mxu1 %v4417_v17  ;;  %v5725_v24 = vld [vmem:[%s5672_s10 + $0x38] sm:$0xff]  ;;  %4040 = vmatpush3.bf16.msra.mxu0 %v4418_v21  ;;  %v4422_v29 = vld [vmem:[%s5595_s19 + $0x10] sm:$0xff]   ;;  %v4426_v41 = vld [vmem:[%s5605_s23 + $0x8] sm:$0xff]   ;;  %s6885_s9 = sld [smem:[#allocation56_spill]]  ;;  %vm2482_vm3 = vcmask 261120   ;;  %s6911_s6 = sld [smem:[#allocation35_spill]] }
 0x170   : > { %4053 = vmatprep.subr.bf16.mxu1 %v5054_v14  ;;  %4041 = vmatprep.subr.bf16.mxu0 %v5054_v14  ;;  %v1286_v30 = vsel %vm1075_vm1, %v5725_v24, 0.0  ;;  %v4423_v31 = vld [vmem:[%s5602_s15 + $0x18] sm:$0xff]   ;;  %v4425_v39 = vld [vmem:[%s5605_s23] sm:$0xff]   ;;  %s6883_s15 = sld [smem:[#allocation41_spill]]  ;;  %s6912_s2 = sld [smem:[#allocation66_spill]] }
 0x171   : > { %1269 = vadd.xlane.f32.xlu0 %v1268_v15  ;;  %1275 = vadd.xlane.f32.xlu1 %v1274_v18  ;;  %v4424_v34 = vld [vmem:[%s5595_s19 + $0x18] sm:$0xff]   ;;  %s6882_s19 = sld [smem:[#allocation42_spill]]  ;;  %s5060_s1 = smov [#allocation17]  }
 0x172   : > { %s4905_s12 = sshll.u32 %s5060_s1, 4  ;;  %s4906_s12 = int_to_ptr.vmem [resolvable:$false] %s4905_s12 }
 0x173   : > { %4054 = vmatpush3.bf16.msra.mxu1 %v4419_v22  ;;  %4042 = vmatpush3.bf16.msra.mxu0 %v4420_v26  ;;  %s4907_s26 = scalar_lea.vmem %s4906_s12, 2048 }
 0x174   : > { %4055 = vmatprep.subr.bf16.mxu1 %v5054_v14  ;;  %s6881_s4 = scalar_lea.vmem %s6880_s3, %s6937_s27  ;;  %4043 = vmatprep.subr.bf16.mxu0 %v5054_v14  ;;  %s6910_s27 = sld [smem:[#allocation25_spill]] }
 0x175   : > { %1278 = vadd.xlane.f32.xlu0 %v1277_v23  ;;  %1281 = vadd.xlane.f32.xlu1 %v1280_v25  ;;  %v1033_v32 = vld [vmem:[%s6881_s4] sm:$0x1]  ;;  %s6886_s17 = scalar_lea.vmem %s6885_s9, %s5626_s25  ;;  %s5059_s4 = smov 96  }
 0x176   : > { %v3792_v33 = vmul.f32 -1.442695, %v1033_v32  ;;  %s6913_s29 = smov %s6912_s2  ;;  %p6915_p5 = scmp.ne.s32.totalorder %s6911_s6, 0 }
 0x177   : > { %4056 = vmatpush3.bf16.msra.mxu1 %v4421_v27  ;;  %4044 = vmatpush3.bf16.msra.mxu0 %v4422_v29  ;;  %v4431_v21 = vld [vmem:[%s6882_s19 + $0x4] ss:$16 sps:$4 sm:$0xff]   ;;  %v4434_v22 = vld [vmem:[%s6882_s19 + $0xc] ss:$16 sps:$4 sm:$0xff]   ;;  %v4429_v23 = vld [vmem:[%s6882_s19] ss:$16 sps:$4 sm:$0xff]  }
 0x178   : > { %4057 = vmatprep.subr.bf16.mxu1 %v5054_v14  ;;  %4481 = vpow2.f32 %v3792_v33  ;;  %4045 = vmatprep.subr.bf16.mxu0 %v5054_v14  ;;  %v4437_v25 = vld [vmem:[%s6882_s19 + $0x24] ss:$16 sps:$4 sm:$0xff]   ;;  %v4440_v26 = vld [vmem:[%s6882_s19 + $0x2c] ss:$16 sps:$4 sm:$0xff]   ;;  %v4438_v27 = vld [vmem:[%s6882_s19 + $0x28] ss:$16 sps:$4 sm:$0xff]  }
 0x179   : > { %1284 = vadd.xlane.f32.xlu0 %v1283_v28  ;;  %1287 = vadd.xlane.f32.xlu1 %v1286_v30  ;;  %v4443_v28 = vld [vmem:[%s6882_s19 + $0x44] ss:$16 sps:$4 sm:$0xff]   ;;  %v4446_v29 = vld [vmem:[%s6882_s19 + $0x4c] ss:$16 sps:$4 sm:$0xff]   ;;  %v4441_v30 = vld [vmem:[%s6882_s19 + $0x40] ss:$16 sps:$4 sm:$0xff]  }
 0x17a   : > { %v4449_v33 = vld [vmem:[%s6882_s19 + $0x64] ss:$16 sps:$4 sm:$0xff]  }
 0x17b   : > { %4058 = vmatpush3.bf16.msra.mxu1 %v4423_v31  ;;  %4046 = vmatpush3.bf16.msra.mxu0 %v4424_v34  ;;  %v4444_v31 = vld [vmem:[%s6882_s19 + $0x48] ss:$16 sps:$4 sm:$0xff]   ;;  %v4452_v34 = vld [vmem:[%s6882_s19 + $0x6c] ss:$16 sps:$4 sm:$0xff]  }
 0x17c   : > { %4063 = vmatprep.subr.bf16.mxu0 %v5054_v14  ;;  %1528 = vmatprep.subr.bf16.mxu1 %v4431_v21 }
 0x182   : > { %v4482_v35 = vpop.eup %4481 }
 0x183   : > { %v1037_v36 = vadd.f32 1.0, %v4482_v35  ;;  %v4447_v35 = vld [vmem:[%s6882_s19 + $0x60] ss:$16 sps:$4 sm:$0xff]  }
 0x185   : > { %4483 = vrcp.f32 %v1037_v36  ;;  %v4450_v36 = vld [vmem:[%s6882_s19 + $0x68] ss:$16 sps:$4 sm:$0xff]  }
 0x18f   : > { %v4484_v37 = vpop.eup %4483 }
 0x190   : > { %v1040_v38 = vmul.f32 %v4484_v37, %v1033_v32  ;;  %v1370_v32 = vlaneseq }
 0x192   : > { %v1041_v40 = vpack.c.bf16 %v1040_v38, %v1040_v38  ;;  %v5825_v37 = vshrl.u32 %v1370_v32, 7  ;;  %v5056_v38 = vmov 0  }
 0x194   : > { %4060 = vmatmul.mubr.msk.bf16.vlgmr.msra.gmra.mrb[0].mxu1 %vm1075_vm1, %v1041_v40  ;;  %4048 = vmatmul.mubr.msk.bf16.vlgmr.msra.gmra.mrb[0].mxu0 %vm1075_vm1, %v1041_v40 }
 0x195   : > { %4064 = vmatpush3.bf16.msra.mxu0 %v4425_v39  ;;  %4071 = vmatprep.mubr.msk.bf16.mxu0 %vm5055_vm2, %v5054_v14  ;;  %v5830_v39 = vld [vmem:[%s5650_s22] sm:$0xf]  ;;  %s6889_s22 = sld [smem:[#allocation51_spill]] }
 0x196   : > { %4065 = vmatprep.subr.bf16.mxu0 %v5054_v14  ;;  %1529 = vmatpush1.bf16.msra.mxu1 %v4429_v23 }
 0x197   : > { %1530 = vmatprep.subr.bf16.mxu1 %v4437_v25  ;;  %1560 = vmatprep.mubr.bf16.mxu1 %v5056_v38 }
 0x199   : > { %4066 = vmatpush3.bf16.msra.mxu0 %v4426_v41  ;;  %v1430_v41 = vsub.s32 3, %v5825_v37 }
 0x19a   : > { %4067 = vmatprep.subr.bf16.mxu0 %v5054_v14 }
 0x19b   : > { %s6890_s18 = smov %s6889_s22 }
 0x1fa   : > { %v1267_v42 = vpop.xlane.xlu0 %1266  ;;  %v1273_v43 = vpop.xlane.xlu1 %1272 }
 0x1fb   : > { %v1290_v44 = vmul.f32 0.015625, %v1267_v42  ;;  %v1292_v45 = vmul.f32 0.015625, %v1273_v43  ;;  %v5838_v43 = vrot.slane %v5830_v39, %v1430_v41 }
 0x1fd   : > { %v5758_v46 = vsub.f32 %v5684_v8, %v1290_v44  ;;  %v5761_v47 = vsub.f32 %v5687_v9, %v1292_v45 }
 0x1fe   : > { %v1270_v48 = vpop.xlane.xlu0 %1269  ;;  %v1276_v49 = vpop.xlane.xlu1 %1275 }
 0x1ff   : > { %v1291_v50 = vmul.f32 0.015625, %v1270_v48  ;;  %v1293_v51 = vmul.f32 0.015625, %v1276_v49  ;;  %v1306_v52 = vmul.f32 %v5758_v46, %v5758_v46  ;;  %v1308_v53 = vmul.f32 %v5761_v47, %v5761_v47 }
 0x201   : > { %v5768_v54 = vsub.f32 %v5690_v10, %v1291_v50  ;;  %v5771_v55 = vsub.f32 %v5697_v13, %v1293_v51  ;;  %v1314_v56 = vsel %vm1075_vm1, %v1306_v52, 0.0  ;;  %v1320_v59 = vsel %vm1075_vm1, %v1308_v53, 0.0 }
 0x202   : > { %1315 = vadd.xlane.f32.xlu0 %v1314_v56  ;;  %v1279_v57 = vpop.xlane.xlu0 %1278  ;;  %v1282_v58 = vpop.xlane.xlu1 %1281 }
 0x203   : > { %v1294_v60 = vmul.f32 0.015625, %v1279_v57  ;;  %v1295_v61 = vmul.f32 0.015625, %v1282_v58  ;;  %v1307_v62 = vmul.f32 %v5768_v54, %v5768_v54  ;;  %v1309_v63 = vmul.f32 %v5771_v55, %v5771_v55 }
 0x205   : > { %v5780_v0 = vsub.f32 %v5704_v16, %v1294_v60  ;;  %v5783_v1 = vsub.f32 %v5710_v19, %v1295_v61  ;;  %v1317_v2 = vsel %vm1075_vm1, %v1307_v62, 0.0  ;;  %v1323_v5 = vsel %vm1075_vm1, %v1309_v63, 0.0  ;;  %v4427_v19 = vld [vmem:[%s5605_s23 + $0x10] sm:$0xff]  }
 0x206   : > { %1321 = vadd.xlane.f32.xlu0 %v1320_v59  ;;  %1318 = vadd.xlane.f32.xlu1 %v1317_v2  ;;  %v1285_v3 = vpop.xlane.xlu0 %1284  ;;  %v1288_v4 = vpop.xlane.xlu1 %1287 }
 0x207   : > { %v1296_v6 = vmul.f32 0.015625, %v1285_v3  ;;  %v1297_v7 = vmul.f32 0.015625, %v1288_v4  ;;  %v1310_v8 = vmul.f32 %v5780_v0, %v5780_v0  ;;  %v1311_v9 = vmul.f32 %v5783_v1, %v5783_v1  ;;  %4068 = vmatpush3.bf16.msra.mxu0 %v4427_v19 }
 0x208   : > { %4069 = vmatprep.subr.bf16.mxu0 %v5054_v14  ;;  %v4435_v14 = vld [vmem:[%s6882_s19 + $0x20] ss:$16 sps:$4 sm:$0xff]  }
 0x209   : > { %v5792_v10 = vsub.f32 %v5717_v20, %v1296_v6  ;;  %v5795_v11 = vsub.f32 %v5725_v24, %v1297_v7  ;;  %v1326_v12 = vsel %vm1075_vm1, %v1310_v8, 0.0  ;;  %v1329_v13 = vsel %vm1075_vm1, %v1311_v9, 0.0  ;;  %v4428_v20 = vld [vmem:[%s5605_s23 + $0x18] sm:$0xff]   ;;  %1531 = vmatpush1.bf16.msra.mxu1 %v4435_v14  ;;  %s6884_s23 = scalar_lea.vmem [#allocation13], %s6883_s15  ;;  %v1050_v8 = vld [vmem:[%s6886_s17] sm:$0x1] }
 0x20a   : > { %1324 = vadd.xlane.f32.xlu1 %v1323_v5  ;;  %1327 = vadd.xlane.f32.xlu0 %v1326_v12  ;;  %v4432_v24 = vld [vmem:[%s6882_s19 + $0x8] ss:$16 sps:$4 sm:$0xff]   ;;  %v1127_v3 = vld [vmem:[%s6884_s23] sm:$0x1]  ;;  %v5848_v12 = vsub.s32 0, %v5825_v37 }
 0x20b   : > { %v1312_v15 = vmul.f32 %v5792_v10, %v5792_v10  ;;  %v1313_v16 = vmul.f32 %v5795_v11, %v5795_v11  ;;  %4070 = vmatpush3.bf16.msra.mxu0 %v4428_v20  ;;  %1532 = vmatprep.subr.bf16.mxu1 %v4443_v28 }
 0x20c   : > { %1601 = vmatprep.subr.bf16.mxu0 %v4434_v22  ;;  %6887 = vst [vmem:[#allocation43_spill] sm:$0xff] %v5848_v12 }
 0x20d   : > { %v1332_v17 = vsel %vm1075_vm1, %v1312_v15, 0.0  ;;  %v1335_v18 = vsel %vm1075_vm1, %v1313_v16, 0.0  ;;  %1533 = vmatpush1.bf16.msra.mxu1 %v4441_v30 }
 0x20e   : > { %1330 = vadd.xlane.f32.xlu1 %v1329_v13  ;;  %1333 = vadd.xlane.f32.xlu0 %v1332_v17 }
 0x20f   : > { %4072 = vmatmul.mubr.msk.bf16.vlgmr.msra.gmra.mrb[4].mxu0 %vm1075_vm1, %v1041_v40  ;;  %1534 = vmatprep.subr.bf16.mxu1 %v4449_v33  ;;  %v1422_v40 = vsub.s32 1, %v5825_v37 }
 0x210   : > { %1602 = vmatpush1.bf16.msra.mxu0 %v4432_v24  ;;  %1633 = vmatprep.mubr.bf16.mxu0 %v5056_v38 }
 0x211   : > { %1603 = vmatprep.subr.bf16.mxu0 %v4440_v26  ;;  %1535 = vmatpush1.bf16.msra.mxu1 %v4447_v35  ;;  %v5835_v42 = vrot.slane %v5830_v39, %v1422_v40 }
 0x212   : > { %1336 = vadd.xlane.f32.xlu1 %v1335_v18 }
 0x214   : > { %1604 = vmatpush1.bf16.msra.mxu0 %v4438_v27 }
 0x215   : > { %1605 = vmatprep.subr.bf16.mxu0 %v4446_v29 }
 0x218   : > { %1606 = vmatpush1.bf16.msra.mxu0 %v4444_v31 }
 0x219   : > { %1607 = vmatprep.subr.bf16.mxu0 %v4452_v34 }
 0x21c   : > { %1608 = vmatpush1.bf16.msra.mxu0 %v4450_v36 }
 0x267   : > { %v1186_v44 = vpop.f32.mrb[0].mxu1  ;;  %v1113_v45 = vpop.f32.mrb[0].mxu0 }
 0x268   : > { %v4061_v48 = vpop.f32.mrb[1].mxu1  ;;  %v4049_v49 = vpop.f32.mrb[1].mxu0  ;;  %v1187_v9 = vadd.f32 %v1186_v44, %v1127_v3  ;;  %v1114_v18 = vadd.f32 %v1113_v45, %v1050_v8  ;;  %v4456_v8 = vld [vmem:[#allocation7 + $0x18] sm:$0xff]  }
 0x269   : > { %v1189_v50 = vpop.f32.mrb[2].mxu1  ;;  %v1116_v51 = vpop.f32.mrb[2].mxu0 }
 0x26a   : > { %v4062_v52 = vpop.f32.mrb[3].mxu1  ;;  %v4050_v53 = vpop.f32.mrb[3].mxu0  ;;  %v1373_v21 = vrot.slane %v1187_v9, %v5848_v12  ;;  %v1385_v26 = vrot.slane %v1114_v18, %v5848_v12  ;;  %v1426_v9 = vsub.s32 2, %v5825_v37 }
 0x28f   : > { %v1316_v56 = vpop.xlane.xlu0 %1315 }
 0x290   : > { %v1338_v57 = vmul.f32 0.015625, %v1316_v56 }
 0x292   : > { %v1346_v58 = vadd.f32 1e-06, %v1338_v57 }
 0x293   : > { %v1319_v59 = vpop.xlane.xlu1 %1318  ;;  %v1322_v60 = vpop.xlane.xlu0 %1321 }
 0x294   : > { %4485 = vrsqrt.f32 %v1346_v58  ;;  %v1339_v61 = vmul.f32 0.015625, %v1319_v59  ;;  %v1340_v62 = vmul.f32 0.015625, %v1322_v60 }
 0x296   : > { %v1347_v63 = vadd.f32 1e-06, %v1339_v61  ;;  %v1348_v2 = vadd.f32 1e-06, %v1340_v62 }
 0x297   : > { %v1325_v4 = vpop.xlane.xlu1 %1324  ;;  %v1328_v5 = vpop.xlane.xlu0 %1327 }
 0x298   : > { %4487 = vrsqrt.f32 %v1347_v63  ;;  %v1341_v6 = vmul.f32 0.015625, %v1325_v4  ;;  %v1342_v7 = vmul.f32 0.015625, %v1328_v5 }
 0x299   : > { %4489 = vrsqrt.f32 %v1348_v2 }
 0x29a   : > { %v1349_v13 = vadd.f32 1e-06, %v1341_v6  ;;  %v1350_v15 = vadd.f32 1e-06, %v1342_v7  ;;  %v4453_v6 = vld [vmem:[#allocation7] sm:$0xff]   ;;  %v4454_v7 = vld [vmem:[#allocation7 + $0x8] sm:$0xff]  }
 0x29b   : > { %v1331_v16 = vpop.xlane.xlu1 %1330  ;;  %v1334_v17 = vpop.xlane.xlu0 %1333  ;;  %4075 = vmatprep.subr.bf16.mxu1 %v4453_v6  ;;  %4091 = vmatprep.subr.bf16.mxu0 %v4453_v6 }
 0x29c   : > { %4491 = vrsqrt.f32 %v1349_v13  ;;  %v1343_v19 = vmul.f32 0.015625, %v1331_v16  ;;  %v1344_v20 = vmul.f32 0.015625, %v1334_v17  ;;  %v5879_v13 = vrot.slane %v5830_v39, %v5848_v12  ;;  %v5887_v16 = vld [vmem:[%s6889_s22] sm:$0xff]   ;;  %s6914_s22 = sand.u32 1, %s6910_s27  }
 0x29d   : > { %4493 = vrsqrt.f32 %v1350_v15  ;;  %v5882_v15 = vrot.slane %v5830_v39, %v1426_v9 }
 0x29e   : > { %v4486_v22 = vpop.eup %4485  ;;  %v1351_v23 = vadd.f32 1e-06, %v1343_v19  ;;  %v1352_v24 = vadd.f32 1e-06, %v1344_v20 }
 0x29f   : > { %v1362_v25 = vmul.f32 %v4486_v22, %v5758_v46  ;;  %v1337_v14 = vpop.xlane.xlu1 %1336 }
 0x2a0   : > { %4495 = vrsqrt.f32 %v1351_v23  ;;  %v1345_v27 = vmul.f32 0.015625, %v1337_v14 }
 0x2a1   : > { %4497 = vrsqrt.f32 %v1352_v24  ;;  %v1374_v28 = vmul.f32 %v1373_v21, %v1362_v25 }
 0x2a2   : > { %v4488_v29 = vpop.eup %4487  ;;  %v1353_v30 = vadd.f32 1e-06, %v1345_v27 }
 0x2a3   : > { %v4490_v31 = vpop.eup %4489  ;;  %v1363_v32 = vmul.f32 %v4488_v29, %v5768_v54  ;;  %v1386_v33 = vadd.f32 %v1385_v26, %v1374_v28 }
 0x2a4   : > { %v1364_v34 = vmul.f32 %v4490_v31, %v5761_v47  ;;  %4499 = vrsqrt.f32 %v1353_v30 }
 0x2a5   : > { %v1375_v35 = vmul.f32 %v1373_v21, %v1363_v32 }
 0x2a6   : > { %v4492_v36 = vpop.eup %4491  ;;  %v1376_v40 = vmul.f32 %v1373_v21, %v1364_v34 }
 0x2a7   : > { %v4494_v46 = vpop.eup %4493  ;;  %v1365_v41 = vmul.f32 %v4492_v36, %v5771_v55  ;;  %v1387_v44 = vadd.f32 %v1385_v26, %v1375_v35 }
 0x2a8   : > { %v1366_v45 = vmul.f32 %v4494_v46, %v5780_v0  ;;  %v1388_v48 = vadd.f32 %v1385_v26, %v1376_v40 }
 0x2a9   : > { %v1394_v49 = vpack.c.bf16 %v1387_v44, %v1386_v33  ;;  %v1377_v50 = vmul.f32 %v1373_v21, %v1365_v41 }
 0x2aa   : > { %v4496_v51 = vpop.eup %4495  ;;  %v1378_v52 = vmul.f32 %v1373_v21, %v1366_v45 }
 0x2ab   : > { %v4498_v53 = vpop.eup %4497  ;;  %v1367_v54 = vmul.f32 %v4496_v51, %v5783_v1  ;;  %3824 = vmatmul.mubr.msk.bf16.vlgmr.msra.gmra.mrb[4].mxu1 %vm1075_vm1, %v1394_v49  ;;  %3828 = vmatmul.mubr.msk.bf16.vlgmr.msra.gmra.mrb[8].mxu0 %vm1075_vm1, %v1394_v49  ;;  %v1389_v47 = vadd.f32 %v1385_v26, %v1377_v50 }
 0x2ac   : > { %v1368_v56 = vmul.f32 %v4498_v53, %v5792_v10  ;;  %1570 = vmatprep.mubr.bf16.mxu1 %v5056_v38  ;;  %1643 = vmatprep.mubr.bf16.mxu0 %v5056_v38  ;;  %v1390_v55 = vadd.f32 %v1385_v26, %v1378_v52 }
 0x2ad   : > { %v1395_v0 = vpack.c.bf16 %v1389_v47, %v1388_v48  ;;  %v1379_v57 = vmul.f32 %v1373_v21, %v1367_v54  ;;  %4076 = vmatpush3.bf16.msra.mxu1 %v4453_v6  ;;  %4092 = vmatpush3.bf16.msra.mxu0 %v4453_v6 }
 0x2ae   : > { %v4500_v58 = vpop.eup %4499  ;;  %v1380_v59 = vmul.f32 %v1373_v21, %v1368_v56  ;;  %4077 = vmatprep.subr.bf16.mxu1 %v4454_v7  ;;  %4093 = vmatprep.subr.bf16.mxu0 %v4454_v7 }
 0x2af   : > { %v1369_v60 = vmul.f32 %v4500_v58, %v5795_v11  ;;  %v1391_v61 = vadd.f32 %v1385_v26, %v1379_v57 }
 0x2b0   : > { %v1392_v1 = vadd.f32 %v1385_v26, %v1380_v59 }
 0x2b1   : > { %v1396_v62 = vpack.c.bf16 %v1391_v61, %v1390_v55  ;;  %v1381_v63 = vmul.f32 %v1373_v21, %v1369_v60  ;;  %4078 = vmatpush3.bf16.msra.mxu1 %v4454_v7  ;;  %4094 = vmatpush3.bf16.msra.mxu0 %v4454_v7 }
 0x2b3   : > { %3825 = vmatmul.mubr.msk.bf16.gmra.mrb[8].mxu1 %vm1075_vm1, %v1395_v0  ;;  %3829 = vmatmul.mubr.msk.bf16.gmra.mrb[12].mxu0 %vm1075_vm1, %v1395_v0  ;;  %v1393_v10 = vadd.f32 %v1385_v26, %v1381_v63 }
 0x2b4   : > { %1580 = vmatprep.mubr.bf16.mxu1 %v5056_v38  ;;  %1653 = vmatprep.mubr.bf16.mxu0 %v5056_v38 }
 0x2b5   : > { %v1397_v2 = vpack.c.bf16 %v1393_v10, %v1392_v1 }
 0x2bb   : > { %3826 = vmatmul.mubr.msk.bf16.gmra.mrb[12].mxu1 %vm1075_vm1, %v1396_v62  ;;  %3830 = vmatmul.mubr.msk.bf16.gmra.mrb[16].mxu0 %vm1075_vm1, %v1396_v62 }
 0x2bc   : > { %1590 = vmatprep.mubr.bf16.mxu1 %v5056_v38  ;;  %1663 = vmatprep.mubr.bf16.mxu0 %v5056_v38  ;;  %v4455_v38 = vld [vmem:[#allocation7 + $0x10] sm:$0xff]  }
 0x2bd   : > { %4079 = vmatprep.subr.bf16.mxu1 %v4455_v38  ;;  %4095 = vmatprep.subr.bf16.mxu0 %v4455_v38 }
 0x2be   : > { %4080 = vmatpush3.bf16.msra.mxu1 %v4455_v38  ;;  %4096 = vmatpush3.bf16.msra.mxu0 %v4455_v38 }
 0x2bf   : > { %4081 = vmatprep.subr.bf16.mxu1 %v4456_v8  ;;  %4097 = vmatprep.subr.bf16.mxu0 %v4456_v8 }
 0x2c2   : > { %4082 = vmatpush3.bf16.msra.mxu1 %v4456_v8  ;;  %4098 = vmatpush3.bf16.msra.mxu0 %v4456_v8 }
 0x2c3   : > { %3827 = vmatmul.mubr.msk.bf16.gmra.mrb[16].mxu1 %vm1075_vm1, %v1397_v2  ;;  %3831 = vmatmul.mubr.msk.bf16.gmra.mrb[20].mxu0 %vm1075_vm1, %v1397_v2 }
 0x2c4   : > { %4123 = vmatprep.subr.bf16.mxu0 %v5887_v16  ;;  %4107 = vmatprep.subr.bf16.mxu1 %v5887_v16 }
 0x2e2   : > { %v5874_v11 = vpop.f32.mrb[4].mxu0 }
 0x2e3   : > { %6888 = vst [vmem:[#allocation44_spill] sm:$0xff] %v5874_v11  ;;  %v4073_v3 = vpop.f32.mrb[5].mxu0 }
 0x2e4   : > { %v1262_v4 = vpop.f32.mrb[6].mxu0 }
 0x2e5   : > { %v4074_v5 = vpop.f32.mrb[7].mxu0 }
 0x37e   : > { %v1562_v17 = vpop.f32.mrb[4].mxu1  ;;  %v1635_v18 = vpop.f32.mrb[8].mxu0 }
 0x37f   : > { %v1563_v37 = vadd.f32 %v1562_v17, %v5879_v13  ;;  %v5893_v19 = vadd.f32 %v1635_v18, %v5882_v15  ;;  %v1564_v20 = vpop.f32.mrb[5].mxu1  ;;  %v1637_v21 = vpop.f32.mrb[9].mxu0 }
 0x380   : > { %v5896_v39 = vadd.f32 %v1564_v20, %v5835_v42  ;;  %v1638_v22 = vadd.f32 %v1637_v21, %v5838_v43  ;;  %v1566_v23 = vpop.f32.mrb[6].mxu1  ;;  %v1639_v24 = vpop.f32.mrb[10].mxu0 }
 0x381   : > { %v1690_v25 = vmul.f32 0.044715, %v1563_v37  ;;  %v5900_v26 = vadd.f32 %v1566_v23, %v5879_v13  ;;  %v1568_v14 = vpop.f32.mrb[7].mxu1  ;;  %v1641_v27 = vpop.f32.mrb[11].mxu0  ;;  %v5904_v29 = vadd.f32 %v1639_v24, %v5882_v15  ;;  %v1826_v34 = vmul.f32 %v5893_v19, %v5893_v19 }
 0x382   : > { %v1691_v28 = vmul.f32 0.044715, %v5896_v39  ;;  %v5907_v30 = vadd.f32 %v1568_v14, %v5835_v42  ;;  %v1642_v31 = vadd.f32 %v1641_v27, %v5838_v43  ;;  %v5957_v20 = vmul.f32 0.5, %v1563_v37 }
 0x383   : > { %v1706_v32 = vmul.f32 %v1690_v25, %v1563_v37  ;;  %v1692_v33 = vmul.f32 0.044715, %v5900_v26  ;;  %v1827_v35 = vmul.f32 %v5904_v29, %v5904_v29 }
 0x384   : > { %v1693_v36 = vmul.f32 0.044715, %v5907_v30  ;;  %v5916_v40 = vpack.c.bf16 %v1642_v31, %v1638_v22  ;;  %v1707_v41 = vmul.f32 %v1691_v28, %v5896_v39 }
 0x385   : > { %v1722_v46 = vmul.f32 %v1706_v32, %v1563_v37  ;;  %v1708_v44 = vmul.f32 %v1692_v33, %v5900_v26  ;;  %v1834_v50 = vpack.c.bf16 %v1827_v35, %v1826_v34  ;;  %v5968_v33 = vmul.f32 0.5, %v5900_v26 }
 0x386   : > { %v1709_v45 = vmul.f32 %v1693_v36, %v5907_v30  ;;  %v1572_v48 = vpop.f32.mrb[8].mxu1  ;;  %v1645_v49 = vpop.f32.mrb[12].mxu0  ;;  %v1723_v60 = vmul.f32 %v1707_v41, %v5896_v39 }
 0x387   : > { %v1738_v51 = vadd.f32 %v1722_v46, %v1563_v37  ;;  %v1724_v52 = vmul.f32 %v1708_v44, %v5900_v26  ;;  %v5923_v53 = vadd.f32 %v1572_v48, %v5879_v13  ;;  %v5926_v54 = vadd.f32 %v1645_v49, %v5882_v15  ;;  %v1574_v47 = vpop.f32.mrb[9].mxu1  ;;  %v1647_v56 = vpop.f32.mrb[13].mxu0  ;;  %1974 = vrot.lane.b32.xlu0 %v1834_v50, %s5057_s30 }
 0x388   : > { %v5930_v55 = vadd.f32 %v1574_v47, %v5835_v42  ;;  %v1648_v0 = vadd.f32 %v1647_v56, %v5838_v43  ;;  %4083 = vmatprep.mubr.msk.bf16.mxu1 %vm1075_vm1, %v1834_v50  ;;  %v1576_v57 = vpop.f32.mrb[10].mxu1  ;;  %v1649_v58 = vpop.f32.mrb[14].mxu0  ;;  %v1725_v4 = vmul.f32 %v1709_v45, %v5907_v30  ;;  %v1739_v18 = vadd.f32 %v1723_v60, %v5896_v39  ;;  %v5988_v50 = vld [vmem:[%s6890_s18 + $0x8] sm:$0xff]  }
 0x389   : > { %v1754_v59 = vmul.f32 0.7978846, %v1738_v51  ;;  %v1740_v61 = vadd.f32 %v1724_v52, %v5900_v26  ;;  %v1578_v1 = vpop.f32.mrb[11].mxu1  ;;  %v1651_v62 = vpop.f32.mrb[15].mxu0  ;;  %v5937_v63 = vadd.f32 %v1576_v57, %v5879_v13  ;;  %v5940_v10 = vadd.f32 %v1649_v58, %v5882_v15 }
 0x38a   : > { %v5943_v2 = vadd.f32 %v1578_v1, %v5835_v42  ;;  %v1652_v5 = vadd.f32 %v1651_v62, %v5838_v43  ;;  %v1694_v6 = vmul.f32 0.044715, %v5923_v53  ;;  %v1828_v7 = vmul.f32 %v5926_v54, %v5926_v54 }
 0x38b   : > { %4501 = vtanh.f32 %v1754_v59  ;;  %v1756_v3 = vmul.f32 0.7978846, %v1740_v61  ;;  %v1695_v38 = vmul.f32 0.044715, %v5930_v55  ;;  %v1829_v8 = vmul.f32 %v5940_v10, %v5940_v10 }
 0x38c   : > { %v1696_v9 = vmul.f32 0.044715, %v5937_v63  ;;  %v5954_v17 = vpack.c.bf16 %v1652_v5, %v1648_v0  ;;  %v1697_v21 = vmul.f32 0.044715, %v5943_v2  ;;  %v1741_v31 = vadd.f32 %v1725_v4, %v5907_v30 }
 0x38d   : > { %4503 = vtanh.f32 %v1756_v3  ;;  %v1835_v24 = vpack.c.bf16 %v1829_v8, %v1828_v7  ;;  %v1755_v32 = vmul.f32 0.7978846, %v1739_v18  ;;  %v1710_v37 = vmul.f32 %v1694_v6, %v5923_v53  ;;  %v6024_v18 = vld [vmem:[%s6890_s18 + $0x10] sm:$0xff]  }
 0x38e   : > { %v1582_v22 = vpop.f32.mrb[12].mxu1  ;;  %v1655_v23 = vpop.f32.mrb[16].mxu0  ;;  %v1711_v41 = vmul.f32 %v1695_v38, %v5930_v55  ;;  %v1712_v44 = vmul.f32 %v1696_v9, %v5937_v63  ;;  %v1713_v51 = vmul.f32 %v1697_v21, %v5943_v2  ;;  %v1757_v56 = vmul.f32 0.7978846, %v1741_v31 }
 0x38f   : > { %v5961_v25 = vadd.f32 %v1582_v22, %v5879_v13  ;;  %v5964_v14 = vadd.f32 %v1655_v23, %v5882_v15  ;;  %v1584_v27 = vpop.f32.mrb[13].mxu1  ;;  %v1657_v28 = vpop.f32.mrb[17].mxu0  ;;  %1976 = vrot.lane.b32.xlu1 %v1835_v24, %s5057_s30  ;;  %4084 = vmatmul.mubr.msk.bf16.vlgmr.msra.gmra.mrb[20].mxu1 %vm1075_vm1, %v1835_v24  ;;  %4505 = vtanh.f32 %v1755_v32  ;;  %v6006_v61 = vmul.f32 0.5, %v5896_v39 }
 0x390   : > { %v5973_v34 = vadd.f32 %v1584_v27, %v5835_v42  ;;  %v1658_v35 = vadd.f32 %v1657_v28, %v5838_v43  ;;  %v1586_v36 = vpop.f32.mrb[14].mxu1  ;;  %v1659_v46 = vpop.f32.mrb[18].mxu0  ;;  %4108 = vmatpush3.bf16.msra.mxu1 %v5887_v16  ;;  %4507 = vtanh.f32 %v1757_v56  ;;  %v6011_v5 = vmul.f32 0.5, %v5907_v30  ;;  %v6053_v56 = vld [vmem:[%s6890_s18 + $0x18] sm:$0xff]  }
 0x391   : > { %v5980_v26 = vadd.f32 %v1586_v36, %v5879_v13  ;;  %v5983_v45 = vadd.f32 %v1659_v46, %v5882_v15  ;;  %v1588_v48 = vpop.f32.mrb[15].mxu1  ;;  %v1661_v49 = vpop.f32.mrb[19].mxu0  ;;  %v1698_v0 = vmul.f32 0.044715, %v5961_v25  ;;  %v1830_v57 = vmul.f32 %v5964_v14, %v5964_v14  ;;  %4109 = vmatprep.subr.bf16.mxu1 %v5988_v50 }
 0x392   : > { %v5992_v52 = vadd.f32 %v1588_v48, %v5835_v42  ;;  %v1662_v47 = vadd.f32 %v1661_v49, %v5838_v43  ;;  %v1699_v59 = vmul.f32 0.044715, %v5973_v34  ;;  %v6014_v6 = vmul.f32 %v1710_v37, %v5923_v53 }
 0x393   : > { %v1831_v58 = vmul.f32 %v5983_v45, %v5983_v45  ;;  %v1700_v62 = vmul.f32 0.044715, %v5980_v26  ;;  %v1727_v7 = vmul.f32 %v1711_v41, %v5930_v55  ;;  %v6018_v38 = vmul.f32 %v1712_v44, %v5937_v63 }
 0x394   : > { %v6003_v60 = vpack.c.bf16 %v1662_v47, %v1658_v35  ;;  %v1701_v3 = vmul.f32 0.044715, %v5992_v52  ;;  %v1729_v39 = vmul.f32 %v1713_v51, %v5943_v2  ;;  %4110 = vmatpush3.bf16.msra.mxu1 %v5988_v50  ;;  %v1714_v21 = vmul.f32 %v1698_v0, %v5961_v25 }
 0x395   : > { %v4502_v1 = vpop.eup %4501  ;;  %v1836_v4 = vpack.c.bf16 %v1831_v58, %v1830_v57  ;;  %v1715_v31 = vmul.f32 %v1699_v59, %v5973_v34  ;;  %4111 = vmatprep.subr.bf16.mxu1 %v6024_v18  ;;  %v1716_v41 = vmul.f32 %v1700_v62, %v5980_v26 }
 0x396   : > { %v1592_v8 = vpop.f32.mrb[16].mxu1  ;;  %v1665_v9 = vpop.f32.mrb[20].mxu0  ;;  %v1786_v28 = vadd.f32 1.0, %v4502_v1  ;;  %v1717_v44 = vmul.f32 %v1701_v3, %v5992_v52 }
 0x397   : > { %v4504_v30 = vpop.eup %4503  ;;  %v6029_v22 = vadd.f32 %v1592_v8, %v5879_v13  ;;  %v6032_v23 = vadd.f32 %v1665_v9, %v5882_v15  ;;  %1978 = vrot.lane.b32.xlu1 %v1836_v4, %s5057_s30  ;;  %v1594_v24 = vpop.f32.mrb[17].mxu1  ;;  %4087 = vmatprep.mubr.msk.bf16.mxu1 %vm1075_vm1, %v1836_v4  ;;  %v1743_v4 = vadd.f32 %v1727_v7, %v5930_v55 }
 0x398   : > { %v1667_v27 = vpop.f32.mrb[21].mxu0  ;;  %v6038_v32 = vadd.f32 %v1594_v24, %v5835_v42  ;;  %v1596_v35 = vpop.f32.mrb[18].mxu1  ;;  %v1788_v46 = vadd.f32 1.0, %v4504_v30  ;;  %4112 = vmatpush3.bf16.msra.mxu1 %v6024_v18  ;;  %v6068_v1 = vmul.f32 %v1786_v28, %v5957_v20  ;;  %v1730_v9 = vmul.f32 %v1714_v21, %v5961_v25  ;;  %v6282_v20 = vld [vmem:[#allocation5 + $0x28] sm:$0xff] }
 0x399   : > { %v1668_v37 = vadd.f32 %v1667_v27, %v5838_v43  ;;  %v1669_v36 = vpop.f32.mrb[22].mxu0  ;;  %v6045_v48 = vadd.f32 %v1596_v35, %v5879_v13  ;;  %v1598_v51 = vpop.f32.mrb[19].mxu1  ;;  %v1702_v0 = vmul.f32 0.044715, %v6029_v22  ;;  %4113 = vmatprep.subr.bf16.mxu1 %v6053_v56  ;;  %v1731_v30 = vmul.f32 %v1715_v31, %v5973_v34 }
 0x39a   : > { %v6048_v49 = vadd.f32 %v1669_v36, %v5882_v15  ;;  %v1671_v47 = vpop.f32.mrb[23].mxu0  ;;  %v1703_v57 = vmul.f32 0.044715, %v6038_v32  ;;  %v6058_v58 = vadd.f32 %v1598_v51, %v5835_v42  ;;  %v1832_v15 = vmul.f32 %v6032_v23, %v6032_v23  ;;  %v4506_v8 = vpop.eup %4505 }
 0x39b   : > { %v1672_v13 = vadd.f32 %v1671_v47, %v5838_v43  ;;  %v6071_v62 = vmul.f32 %v1788_v46, %v5968_v33  ;;  %v1704_v42 = vmul.f32 0.044715, %v6045_v48  ;;  %v4508_v27 = vpop.eup %4507  ;;  %v1732_v33 = vmul.f32 %v1716_v41, %v5980_v26 }
 0x39c   : > { %v1833_v59 = vmul.f32 %v6048_v49, %v6048_v49  ;;  %v1705_v43 = vmul.f32 0.044715, %v6058_v58  ;;  %v1719_v28 = vmul.f32 %v1703_v57, %v6038_v32  ;;  %4114 = vmatpush3.bf16.msra.mxu1 %v6053_v56  ;;  %v1745_v35 = vadd.f32 %v1729_v39, %v5943_v2 }
 0x39d   : > { %v6075_v3 = vpack.c.bf16 %v1672_v13, %v1668_v37  ;;  %v1787_v37 = vadd.f32 1.0, %v4506_v8  ;;  %v1733_v7 = vmul.f32 %v1717_v44, %v5992_v52  ;;  %v1789_v31 = vadd.f32 1.0, %v4508_v27 }
 0x39e   : > { %v1837_v24 = vpack.c.bf16 %v1833_v59, %v1832_v15  ;;  %v1721_v21 = vmul.f32 %v1705_v43, %v6058_v58  ;;  %v1759_v36 = vmul.f32 0.7978846, %v1743_v4  ;;  %v1718_v46 = vmul.f32 %v1702_v0, %v6029_v22 }
 0x39f   : > { %v1720_v41 = vmul.f32 %v1704_v42, %v6045_v48  ;;  %v1761_v51 = vmul.f32 0.7978846, %v1745_v35  ;;  %v1742_v47 = vadd.f32 %v6014_v6, %v5923_v53  ;;  %v6095_v39 = vmul.f32 %v1787_v37, %v6006_v61 }
 0x3a0   : > { %1980 = vrot.lane.b32.xlu1 %v1837_v24, %s5057_s30  ;;  %4088 = vmatmul.mubr.msk.bf16.gmra.mrb[24].mxu1 %vm1075_vm1, %v1837_v24  ;;  %v6098_v44 = vmul.f32 %v1789_v31, %v6011_v5  ;;  %4509 = vtanh.f32 %v1759_v36  ;;  %v1744_v57 = vadd.f32 %v6018_v38, %v5937_v63  ;;  %v1735_v13 = vmul.f32 %v1719_v28, %v6038_v32 }
 0x3a1   : > { %4511 = vtanh.f32 %v1761_v51  ;;  %v1758_v0 = vmul.f32 0.7978846, %v1742_v47  ;;  %v1747_v15 = vadd.f32 %v1731_v30, %v5973_v34  ;;  %v1737_v59 = vmul.f32 %v1721_v21, %v6058_v58 }
 0x3a2   : > { %v1760_v61 = vmul.f32 0.7978846, %v1744_v57  ;;  %v1749_v42 = vadd.f32 %v1733_v7, %v5992_v52  ;;  %v1734_v5 = vmul.f32 %v1718_v46, %v6029_v22  ;;  %v1746_v38 = vadd.f32 %v1730_v9, %v5961_v25 }
 0x3a3   : > { %4513 = vtanh.f32 %v1758_v0  ;;  %v1763_v43 = vmul.f32 0.7978846, %v1747_v15  ;;  %v1736_v4 = vmul.f32 %v1720_v41, %v6045_v48  ;;  %v1748_v30 = vadd.f32 %v1732_v33, %v5980_v26 }
 0x3a4   : > { %4515 = vtanh.f32 %v1760_v61  ;;  %v1765_v8 = vmul.f32 0.7978846, %v1749_v42  ;;  %v1762_v24 = vmul.f32 0.7978846, %v1746_v38  ;;  %v1751_v27 = vadd.f32 %v1735_v13, %v6038_v32 }
 0x3a5   : > { %4517 = vtanh.f32 %v1763_v43  ;;  %v1764_v28 = vmul.f32 0.7978846, %v1748_v30  ;;  %v1753_v37 = vadd.f32 %v1737_v59, %v6058_v58  ;;  %v1750_v7 = vadd.f32 %v1734_v5, %v6029_v22 }
 0x3a6   : > { %4519 = vtanh.f32 %v1765_v8  ;;  %v1767_v35 = vmul.f32 0.7978846, %v1751_v27  ;;  %v1752_v21 = vadd.f32 %v1736_v4, %v6045_v48  ;;  %v1679_v51 = vmul.f32 0.5, %v5930_v55 }
 0x3a7   : > { %4521 = vtanh.f32 %v1762_v24  ;;  %v1769_v9 = vmul.f32 0.7978846, %v1753_v37  ;;  %v1766_v31 = vmul.f32 0.7978846, %v1750_v7  ;;  %v1681_v47 = vmul.f32 0.5, %v5943_v2 }
 0x3a8   : > { %4523 = vtanh.f32 %v1764_v28  ;;  %v1768_v33 = vmul.f32 0.7978846, %v1752_v21  ;;  %v1678_v5 = vmul.f32 0.5, %v5923_v53  ;;  %v1680_v43 = vmul.f32 0.5, %v5937_v63 }
 0x3a9   : > { %4525 = vtanh.f32 %v1767_v35  ;;  %v1683_v2 = vmul.f32 0.5, %v5973_v34  ;;  %v1685_v28 = vmul.f32 0.5, %v5992_v52  ;;  %v1682_v53 = vmul.f32 0.5, %v5961_v25 }
 0x3aa   : > { %v4510_v36 = vpop.eup %4509  ;;  %4527 = vtanh.f32 %v1769_v9  ;;  %v1684_v63 = vmul.f32 0.5, %v5980_v26  ;;  %v1689_v52 = vmul.f32 0.5, %v6058_v58 }
 0x3ab   : > { %v4512_v46 = vpop.eup %4511  ;;  %v1791_v41 = vadd.f32 1.0, %v4510_v36  ;;  %4529 = vtanh.f32 %v1766_v31 }
 0x3ac   : > { %v1793_v57 = vadd.f32 1.0, %v4512_v46  ;;  %4531 = vtanh.f32 %v1768_v33  ;;  %v1687_v46 = vmul.f32 0.5, %v6038_v32 }
 0x3ad   : > { %v4514_v13 = vpop.eup %4513  ;;  %v6118_v15 = vmul.f32 %v1791_v41, %v1679_v51 }
 0x3ae   : > { %v4516_v0 = vpop.eup %4515  ;;  %v6120_v59 = vmul.f32 %v1793_v57, %v1681_v47  ;;  %v1790_v61 = vadd.f32 1.0, %v4514_v13 }
 0x3af   : > { %v4518_v42 = vpop.eup %4517  ;;  %v1792_v38 = vadd.f32 1.0, %v4516_v0  ;;  %v1686_v0 = vmul.f32 0.5, %v6029_v22 }
 0x3b0   : > { %v4520_v4 = vpop.eup %4519  ;;  %v1795_v8 = vadd.f32 1.0, %v4518_v42  ;;  %v6127_v24 = vmul.f32 %v1790_v61, %v1678_v5  ;;  %v1688_v61 = vmul.f32 0.5, %v6045_v48 }
 0x3b1   : > { %v4522_v30 = vpop.eup %4521  ;;  %v6129_v27 = vmul.f32 %v1792_v38, %v1680_v43  ;;  %v1797_v37 = vadd.f32 1.0, %v4520_v4 }
 0x3b2   : > { %v4524_v35 = vpop.eup %4523  ;;  %v1794_v7 = vadd.f32 1.0, %v4522_v30  ;;  %v6136_v34 = vmul.f32 %v1795_v8, %v1683_v2 }
 0x3b3   : > { %v4526_v9 = vpop.eup %4525  ;;  %v6138_v31 = vmul.f32 %v1797_v37, %v1685_v28  ;;  %v1796_v36 = vadd.f32 1.0, %v4524_v35 }
 0x3b4   : > { %v4528_v33 = vpop.eup %4527  ;;  %v1799_v41 = vadd.f32 1.0, %v4526_v9  ;;  %v6144_v26 = vmul.f32 %v1794_v7, %v1682_v53 }
 0x3b5   : > { %v4530_v51 = vpop.eup %4529  ;;  %v6146_v47 = vmul.f32 %v1796_v36, %v1684_v63  ;;  %v1801_v57 = vadd.f32 1.0, %v4528_v33 }
 0x3b6   : > { %v4532_v13 = vpop.eup %4531  ;;  %v1798_v42 = vadd.f32 1.0, %v4530_v51  ;;  %v6152_v58 = vmul.f32 %v1799_v41, %v1687_v46 }
 0x3b7   : > { %v6154_v5 = vmul.f32 %v1801_v57, %v1689_v52  ;;  %v1800_v43 = vadd.f32 1.0, %v4532_v13  ;;  %v3840_v52 = vld [vmem:[%s991_s11] ss:$0 sm:$0xff] }
 0x3b8   : > { %v6158_v4 = vmul.f32 %v1798_v42, %v1686_v0 }
 0x3b9   : > { %v6160_v2 = vmul.f32 %v1800_v43, %v1688_v61 }
 0x3ba   : > { %6891 = vst [vmem:[#allocation45_spill] sm:$0xff] %v6158_v4 }
 0x3bb   : > { %6892 = vst [vmem:[#allocation46_spill] sm:$0xff] %v6160_v2 }
 0x3f9   : > { %v1975_v48 = vpop.permute.xlu0 %1974 }
 0x3fa   : > { %4099 = vmatprep.mubr.msk.bf16.mxu0 %vm1075_vm1, %v1975_v48 }
 0x401   : > { %v1977_v8 = vpop.permute.xlu1 %1976 }
 0x402   : > { %4100 = vmatmul.mubr.msk.bf16.vlgmr.msra.gmra.mrb[24].mxu0 %vm1075_vm1, %v1977_v8 }
 0x403   : > { %4124 = vmatpush3.bf16.msra.mxu0 %v5887_v16 }
 0x404   : > { %4125 = vmatprep.subr.bf16.mxu0 %v5988_v50 }
 0x407   : > { %4126 = vmatpush3.bf16.msra.mxu0 %v5988_v50 }
 0x408   : > { %4127 = vmatprep.subr.bf16.mxu0 %v6024_v18 }
 0x409   : > { %v1979_v30 = vpop.permute.xlu1 %1978 }
 0x40a   : > { %4103 = vmatprep.mubr.msk.bf16.mxu0 %vm1075_vm1, %v1979_v30 }
 0x40b   : > { %4128 = vmatpush3.bf16.msra.mxu0 %v6024_v18 }
 0x40c   : > { %4129 = vmatprep.subr.bf16.mxu0 %v6053_v56 }
 0x40f   : > { %4130 = vmatpush3.bf16.msra.mxu0 %v6053_v56 }
 0x410   : > { %4155 = vmatprep.subr.bf16.mxu0 %v5916_v40 }
 0x412   : > { %v1981_v28 = vpop.permute.xlu1 %1980 }
 0x413   : > { %4104 = vmatmul.mubr.msk.bf16.gmra.mrb[28].mxu0 %vm1075_vm1, %v1981_v28 }
 0x462   : > { %v4085_v16 = vpop.f32.mrb[20].mxu1 }
 0x463   : > { %v1917_v37 = vadd.f32 1e-06, %v4085_v16  ;;  %v1908_v50 = vpop.f32.mrb[21].mxu1 }
 0x464   : > { %v1909_v35 = vadd.f32 1e-06, %v1908_v50  ;;  %v4086_v53 = vpop.f32.mrb[22].mxu1 }
 0x465   : > { %4533 = vrsqrt.f32 %v1917_v37  ;;  %v1920_v63 = vadd.f32 1e-06, %v4086_v53  ;;  %v1911_v7 = vpop.f32.mrb[23].mxu1 }
 0x466   : > { %4535 = vrsqrt.f32 %v1909_v35  ;;  %v1912_v18 = vadd.f32 1e-06, %v1911_v7 }
 0x467   : > { %4537 = vrsqrt.f32 %v1920_v63 }
 0x468   : > { %4539 = vrsqrt.f32 %v1912_v18 }
 0x46f   : > { %v4534_v9 = vpop.eup %4533 }
 0x470   : > { %v4536_v56 = vpop.eup %4535  ;;  %v1949_v36 = vmul.f32 %v4534_v9, %v5926_v54 }
 0x471   : > { %v4538_v46 = vpop.eup %4537  ;;  %v1947_v57 = vmul.f32 %v4536_v56, %v5893_v19 }
 0x472   : > { %v4540_v13 = vpop.eup %4539  ;;  %v1950_v0 = vmul.f32 %v4538_v46, %v5940_v10  ;;  %v6185_v30 = vmul.f32 %v3840_v52, %v1949_v36 }
 0x473   : > { %v4089_v33 = vpop.f32.mrb[24].mxu1  ;;  %v1948_v8 = vmul.f32 %v4540_v13, %v5904_v29  ;;  %v6189_v37 = vmul.f32 %v3840_v52, %v1947_v57 }
 0x474   : > { %v1933_v41 = vadd.f32 1e-06, %v4089_v33  ;;  %v1924_v51 = vpop.f32.mrb[25].mxu1  ;;  %v6187_v28 = vmul.f32 %v3840_v52, %v1950_v0 }
 0x475   : > { %v1925_v61 = vadd.f32 1e-06, %v1924_v51  ;;  %v4090_v42 = vpop.f32.mrb[26].mxu1  ;;  %v6191_v50 = vmul.f32 %v3840_v52, %v1948_v8 }
 0x476   : > { %4541 = vrsqrt.f32 %v1933_v41  ;;  %v1936_v43 = vadd.f32 1e-06, %v4090_v42  ;;  %v1927_v48 = vpop.f32.mrb[27].mxu1  ;;  %v2157_v35 = vpack.c.bf16 %v6187_v28, %v6185_v30 }
 0x477   : > { %4543 = vrsqrt.f32 %v1925_v61  ;;  %v1928_v16 = vadd.f32 1e-06, %v1927_v48  ;;  %v2156_v53 = vpack.c.bf16 %v6191_v50, %v6189_v37 }
 0x478   : > { %4545 = vrsqrt.f32 %v1936_v43 }
 0x479   : > { %4547 = vrsqrt.f32 %v1928_v16  ;;  %4115 = vmatprep.mubr.msk.bf16.mxu1 %vm1075_vm1, %v2156_v53 }
 0x47a   : > { %4116 = vmatmul.mubr.msk.bf16.vlgmr.msra.gmra.mrb[28].mxu1 %vm1075_vm1, %v2157_v35 }
 0x480   : > { %v4542_v63 = vpop.eup %4541 }
 0x481   : > { %v4544_v7 = vpop.eup %4543  ;;  %v1953_v18 = vmul.f32 %v4542_v63, %v6032_v23 }
 0x482   : > { %v4546_v9 = vpop.eup %4545  ;;  %v1951_v56 = vmul.f32 %v4544_v7, %v5964_v14 }
 0x483   : > { %v4548_v36 = vpop.eup %4547  ;;  %v1954_v33 = vmul.f32 %v4546_v9, %v6048_v49  ;;  %v6203_v41 = vmul.f32 %v3840_v52, %v1953_v18 }
 0x484   : > { %v1952_v46 = vmul.f32 %v4548_v36, %v5983_v45  ;;  %v6207_v57 = vmul.f32 %v3840_v52, %v1951_v56 }
 0x485   : > { %v6205_v51 = vmul.f32 %v3840_v52, %v1954_v33 }
 0x486   : > { %v6209_v13 = vmul.f32 %v3840_v52, %v1952_v46 }
 0x487   : > { %v2159_v0 = vpack.c.bf16 %v6205_v51, %v6203_v41 }
 0x488   : > { %v2158_v61 = vpack.c.bf16 %v6209_v13, %v6207_v57 }
 0x48a   : > { %4119 = vmatprep.mubr.msk.bf16.mxu1 %vm1075_vm1, %v2158_v61 }
 0x48b   : > { %4120 = vmatmul.mubr.msk.bf16.gmra.mrb[32].mxu1 %vm1075_vm1, %v2159_v0 }
 0x4d5   : > { %v4101_v42 = vpop.f32.mrb[24].mxu0 }
 0x4d6   : > { %v2037_v43 = vadd.f32 1e-06, %v4101_v42  ;;  %v2028_v48 = vpop.f32.mrb[25].mxu0  ;;  %v3845_v42 = vld [vmem:[%s994_s13] ss:$0 sm:$0xff]  ;;  %s5058_s13 = smov 32  }
 0x4d7   : > { %v4102_v8 = vpop.f32.mrb[26].mxu0  ;;  %v2029_v16 = vadd.f32 1e-06, %v2028_v48 }
 0x4d8   : > { %4549 = vrsqrt.f32 %v2037_v43  ;;  %v2031_v35 = vpop.f32.mrb[27].mxu0  ;;  %v2040_v52 = vadd.f32 1e-06, %v4102_v8 }
 0x4d9   : > { %v2032_v53 = vadd.f32 1e-06, %v2031_v35 }
 0x4db   : > { %4551 = vrsqrt.f32 %v2032_v53 }
 0x4dc   : > { %4553 = vrsqrt.f32 %v2029_v16 }
 0x4dd   : > { %4555 = vrsqrt.f32 %v2040_v52  ;;  %v6231_v52 = vld [vmem:[#allocation5 + $0x10] sm:$0xff] }
 0x4e2   : > { %v4550_v63 = vpop.eup %4549 }
 0x4e3   : > { %2079 = vrot.lane.b32.xlu0 %v4550_v63, %s5057_s30  ;;  %v6233_v63 = vld [vmem:[#allocation2 + $0x10] sm:$0xff] }
 0x4e5   : > { %v4552_v18 = vpop.eup %4551 }
 0x4e6   : > { %v4105_v7 = vpop.f32.mrb[28].mxu0  ;;  %v4554_v56 = vpop.eup %4553  ;;  %2077 = vrot.lane.b32.xlu1 %v4552_v18, %s5057_s30  ;;  %v6237_v18 = vld [vmem:[#allocation5] sm:$0xff] }
 0x4e7   : > { %v2044_v9 = vpop.f32.mrb[29].mxu0  ;;  %2075 = vrot.lane.b32.xlu0 %v4554_v56, %s5057_s30  ;;  %v2053_v0 = vadd.f32 1e-06, %v4105_v7  ;;  %v4556_v43 = vpop.eup %4555  ;;  %v6235_v7 = vld [vmem:[#allocation2] sm:$0xff]  ;;  %v6239_v56 = vld [vmem:[#allocation5 + $0x18] sm:$0xff] }
 0x4e8   : > { %v2045_v36 = vadd.f32 1e-06, %v2044_v9  ;;  %v4106_v33 = vpop.f32.mrb[30].mxu0 }
 0x4e9   : > { %v2047_v46 = vpop.f32.mrb[31].mxu0  ;;  %v2056_v48 = vadd.f32 1e-06, %v4106_v33 }
 0x4ea   : > { %4557 = vrsqrt.f32 %v2045_v36  ;;  %v2048_v61 = vadd.f32 1e-06, %v2047_v46  ;;  %2081 = vrot.lane.b32.xlu1 %v4556_v43, %s5057_s30  ;;  %v6241_v36 = vld [vmem:[#allocation2 + $0x18] sm:$0xff]  ;;  %v2148_v43 = vmul.f32 %v6235_v7, %v6189_v37 }
 0x4eb   : > { %2113 = vrot.lane.b32.xlu0 %v3845_v42, %s5057_s30  ;;  %v2150_v42 = vmul.f32 %v6233_v63, %v6185_v30 }
 0x4ec   : > { %4559 = vrsqrt.f32 %v2048_v61  ;;  %v6246_v61 = vld [vmem:[#allocation5 + $0x8] sm:$0xff] }
 0x4ed   : > { %4561 = vrsqrt.f32 %v2053_v0  ;;  %v6244_v0 = vld [vmem:[#allocation2 + $0x8] sm:$0xff] }
 0x4ee   : > { %4563 = vrsqrt.f32 %v2056_v48  ;;  %v2149_v38 = vmul.f32 %v6244_v0, %v6191_v50  ;;  %v6269_v50 = vld [vmem:[#allocation2 + $0x30] sm:$0xff] }
 0x4f4   : > { %v4558_v8 = vpop.eup %4557 }
 0x4f5   : > { %2083 = vrot.lane.b32.xlu1 %v4558_v8, %s5057_s30 }
 0x4f6   : > { %v4560_v16 = vpop.eup %4559 }
 0x4f7   : > { %2085 = vrot.lane.b32.xlu0 %v4560_v16, %s5057_s30  ;;  %v4562_v35 = vpop.eup %4561 }
 0x4f8   : > { %v4564_v53 = vpop.eup %4563 }
 0x4f9   : > { %2087 = vrot.lane.b32.xlu1 %v4562_v35, %s5057_s30 }
 0x4fb   : > { %2089 = vrot.lane.b32.xlu0 %v4564_v53, %s5057_s30 }
 0x54d   : > { %v4117_v9 = vpop.f32.mrb[28].mxu1 }
 0x54e   : > { %v2263_v33 = vmul.f32 %v4117_v9, %v6231_v52  ;;  %v2230_v46 = vpop.f32.mrb[29].mxu1  ;;  %v2151_v9 = vmul.f32 %v6241_v36, %v6187_v28  ;;  %v6265_v28 = vld [vmem:[#allocation5 + $0x30] sm:$0xff] }
 0x54f   : > { %v2261_v48 = vmul.f32 %v2230_v46, %v6237_v18  ;;  %v4118_v8 = vpop.f32.mrb[30].mxu1 }
 0x550   : > { %v2264_v16 = vmul.f32 %v4118_v8, %v6239_v56  ;;  %v2233_v35 = vpop.f32.mrb[31].mxu1  ;;  %v2271_v53 = vadd.f32 %v2263_v33, %v2150_v42 }
 0x551   : > { %v2269_v22 = vadd.f32 %v2261_v48, %v2148_v43  ;;  %v2262_v32 = vmul.f32 %v2233_v35, %v6246_v61  ;;  %v6267_v43 = vld [vmem:[#allocation2 + $0x20] sm:$0xff]  ;;  %v6278_v35 = vld [vmem:[#allocation2 + $0x38] sm:$0xff] }
 0x552   : > { %v2272_v30 = vadd.f32 %v2264_v16, %v2151_v9  ;;  %v6271_v48 = vld [vmem:[#allocation5 + $0x20] sm:$0xff]  ;;  %v6276_v16 = vld [vmem:[#allocation5 + $0x38] sm:$0xff]  ;;  %v2155_v11 = vmul.f32 %v6278_v35, %v6205_v51 }
 0x553   : > { %v2270_v25 = vadd.f32 %v2262_v32, %v2149_v38 }
 0x554   : > { %v6259_v37 = vpack.c.bf16 %v2272_v30, %v2271_v53 }
 0x555   : > { %v2080_v21 = vpop.permute.xlu0 %2079  ;;  %v6261_v46 = vpack.c.bf16 %v2270_v25, %v2269_v22 }
 0x556   : > { %v2101_v32 = vmul.f32 %v2080_v21, %v5926_v54  ;;  %v2152_v54 = vmul.f32 %v6267_v43, %v6207_v57 }
 0x557   : > { %4147 = vmatprep.mubr.msk.bf16.mxu1 %vm2482_vm3, %v6261_v46 }
 0x558   : > { %v2078_v33 = vpop.permute.xlu1 %2077 }
 0x559   : > { %v2076_v42 = vpop.permute.xlu0 %2075  ;;  %v2100_v38 = vmul.f32 %v2078_v33, %v5904_v29  ;;  %v6286_v29 = vld [vmem:[#allocation2 + $0x28] sm:$0xff] }
 0x55a   : > { %v2099_v25 = vmul.f32 %v2076_v42, %v5893_v19  ;;  %v2154_v19 = vmul.f32 %v6269_v50, %v6203_v41 }
 0x55c   : > { %v2082_v22 = vpop.permute.xlu1 %2081 }
 0x55d   : > { %v2102_v53 = vmul.f32 %v2082_v22, %v5940_v10  ;;  %v2114_v30 = vpop.permute.xlu0 %2113 }
 0x55e   : > { %v4121_v8 = vpop.f32.mrb[32].mxu1  ;;  %v6291_v42 = vmul.f32 %v2114_v30, %v2099_v25  ;;  %v6293_v10 = vmul.f32 %v2114_v30, %v2100_v38  ;;  %v6295_v22 = vmul.f32 %v2114_v30, %v2101_v32  ;;  %v2153_v38 = vmul.f32 %v6286_v29, %v6209_v13 }
 0x55f   : > { %v2267_v9 = vmul.f32 %v4121_v8, %v6265_v28  ;;  %v2246_v55 = vpop.f32.mrb[33].mxu1  ;;  %v6298_v12 = vmul.f32 %v2114_v30, %v2102_v53 }
 0x560   : > { %v2265_v21 = vmul.f32 %v2246_v55, %v6271_v48  ;;  %v4122_v33 = vpop.f32.mrb[34].mxu1  ;;  %v2321_v55 = vpack.c.bf16 %v6293_v10, %v6291_v42 }
 0x561   : > { %v2268_v8 = vmul.f32 %v4122_v33, %v6276_v16  ;;  %v2249_v6 = vpop.f32.mrb[35].mxu1  ;;  %v2275_v57 = vadd.f32 %v2267_v9, %v2154_v19  ;;  %v2322_v32 = vpack.c.bf16 %v6298_v12, %v6295_v22 }
 0x562   : > { %v2266_v41 = vmul.f32 %v2249_v6, %v6282_v20  ;;  %v2273_v25 = vadd.f32 %v2265_v21, %v2152_v54  ;;  %2329 = vrot.lane.b32.xlu1 %v2321_v55, %s5057_s30 }
 0x563   : > { %v2276_v33 = vadd.f32 %v2268_v8, %v2155_v11  ;;  %2331 = vrot.lane.b32.xlu0 %v2322_v32, %s5057_s30 }
 0x564   : > { %v2274_v53 = vadd.f32 %v2266_v41, %v2153_v38 }
 0x565   : > { %v6311_v9 = vpack.c.bf16 %v2276_v33, %v2275_v57 }
 0x566   : > { %v6313_v51 = vpack.c.bf16 %v2274_v53, %v2273_v25 }
 0x567   : > { %v2084_v6 = vpop.permute.xlu1 %2083 }
 0x568   : > { %v2103_v19 = vmul.f32 %v2084_v6, %v5964_v14 }
 0x569   : > { %v2086_v54 = vpop.permute.xlu0 %2085 }
 0x56a   : > { %v2104_v21 = vmul.f32 %v2086_v54, %v5983_v45  ;;  %v6317_v4 = vmul.f32 %v2114_v30, %v2103_v19 }
 0x56b   : > { %v2088_v13 = vpop.permute.xlu1 %2087 }
 0x56c   : > { %v6319_v2 = vmul.f32 %v2114_v30, %v2104_v21  ;;  %v2105_v11 = vmul.f32 %v2088_v13, %v6032_v23 }
 0x56d   : > { %v2090_v8 = vpop.permute.xlu0 %2089 }
 0x56e   : > { %v2106_v41 = vmul.f32 %v2090_v8, %v6048_v49  ;;  %v2323_v57 = vpack.c.bf16 %v6319_v2, %v6317_v4  ;;  %v6325_v55 = vmul.f32 %v2114_v30, %v2105_v11 }
 0x570   : > { %v6327_v25 = vmul.f32 %v2114_v30, %v2106_v41  ;;  %2333 = vrot.lane.b32.xlu1 %v2323_v57, %s5057_s30 }
 0x572   : > { %v2324_v14 = vpack.c.bf16 %v6327_v25, %v6325_v55 }
 0x574   : > { %2289 = vrot.lane.b32.xlu1 %v6235_v7, %s5057_s30  ;;  %2335 = vrot.lane.b32.xlu0 %v2324_v14, %s5057_s30 }
 0x578   : > { %2291 = vrot.lane.b32.xlu0 %v6244_v0, %s5057_s30 }
 0x5d4   : > { %v2330_v45 = vpop.permute.xlu1 %2329 }
 0x5d5   : > { %4131 = vmatprep.mubr.msk.bf16.mxu0 %vm1075_vm1, %v2330_v45  ;;  %v2332_v23 = vpop.permute.xlu0 %2331 }
 0x5d6   : > { %4132 = vmatmul.mubr.msk.bf16.vlgmr.msra.gmra.mrb[32].mxu0 %vm1075_vm1, %v2332_v23 }
 0x5d7   : > { %4156 = vmatpush3.bf16.msra.mxu0 %v5916_v40 }
 0x5d8   : > { %4157 = vmatprep.subr.bf16.mxu0 %v5954_v17 }
 0x5db   : > { %4158 = vmatpush3.bf16.msra.mxu0 %v5954_v17 }
 0x5dc   : > { %4159 = vmatprep.subr.bf16.mxu0 %v6003_v60 }
 0x5df   : > { %4160 = vmatpush3.bf16.msra.mxu0 %v6003_v60 }
 0x5e0   : > { %4161 = vmatprep.subr.bf16.mxu0 %v6075_v3 }
 0x5e2   : > { %v2334_v49 = vpop.permute.xlu1 %2333 }
 0x5e3   : > { %4135 = vmatprep.mubr.msk.bf16.mxu0 %vm1075_vm1, %v2334_v49  ;;  %4162 = vmatpush3.bf16.msra.mxu0 %v6075_v3 }
 0x5e6   : > { %v2336_v7 = vpop.permute.xlu0 %2335 }
 0x5e7   : > { %4136 = vmatmul.mubr.msk.bf16.gmra.mrb[36].mxu0 %vm1075_vm1, %v2336_v7 }
 0x6a9   : > { %v4133_v0 = vpop.f32.mrb[32].mxu0 }
 0x6aa   : > { %v2383_v30 = vpop.f32.mrb[33].mxu0  ;;  %v2416_v6 = vmul.f32 %v4133_v0, %v6231_v52 }
 0x6ab   : > { %v2414_v38 = vmul.f32 %v2383_v30, %v6237_v18  ;;  %v4134_v32 = vpop.f32.mrb[34].mxu0 }
 0x6ac   : > { %v2386_v33 = vpop.f32.mrb[35].mxu0  ;;  %v2417_v19 = vmul.f32 %v4134_v32, %v6239_v56 }
 0x6ad   : > { %v2415_v53 = vmul.f32 %v2386_v33, %v6246_v61  ;;  %2430 = vrot.lane.b32.xlu1 %v2414_v38, %s5057_s30 }
 0x6af   : > { %2432 = vrot.lane.b32.xlu0 %v2415_v53, %s5057_s30 }
 0x6b1   : > { %2293 = vrot.lane.b32.xlu1 %v6233_v63, %s5057_s30 }
 0x6b3   : > { %2295 = vrot.lane.b32.xlu0 %v6241_v36, %s5057_s30 }
 0x6b5   : > { %2434 = vrot.lane.b32.xlu1 %v2416_v6, %s5057_s30 }
 0x6b7   : > { %2436 = vrot.lane.b32.xlu0 %v2417_v19, %s5057_s30 }
 0x6b9   : > { %2297 = vrot.lane.b32.xlu1 %v6267_v43, %s5057_s30  ;;  %v2290_v43 = vpop.permute.xlu1 %2289 }
 0x6ba   : > { %v4137_v18 = vpop.f32.mrb[36].mxu0 }
 0x6bb   : > { %v2399_v61 = vpop.f32.mrb[37].mxu0  ;;  %2299 = vrot.lane.b32.xlu0 %v6286_v29, %s5057_s30  ;;  %v2420_v56 = vmul.f32 %v4137_v18, %v6265_v28  ;;  %v2313_v29 = vmul.f32 %v2290_v43, %v6291_v42 }
 0x6bc   : > { %v2418_v54 = vmul.f32 %v2399_v61, %v6271_v48  ;;  %v4138_v21 = vpop.f32.mrb[38].mxu0 }
 0x6bd   : > { %v2402_v52 = vpop.f32.mrb[39].mxu0  ;;  %v2421_v36 = vmul.f32 %v4138_v21, %v6276_v16 }
 0x6be   : > { %v2419_v63 = vmul.f32 %v2402_v52, %v6282_v20  ;;  %2438 = vrot.lane.b32.xlu1 %v2418_v54, %s5057_s30  ;;  %v2292_v20 = vpop.permute.xlu0 %2291 }
 0x6bf   : > { %v2314_v13 = vmul.f32 %v2292_v20, %v6293_v10 }
 0x6c0   : > { %2440 = vrot.lane.b32.xlu0 %v2419_v63, %s5057_s30 }
 0x6c2   : > { %2301 = vrot.lane.b32.xlu1 %v6269_v50, %s5057_s30 }
 0x6c4   : > { %2303 = vrot.lane.b32.xlu0 %v6278_v35, %s5057_s30 }
 0x6c6   : > { %2442 = vrot.lane.b32.xlu1 %v2420_v56, %s5057_s30 }
 0x6c8   : > { %2444 = vrot.lane.b32.xlu0 %v2421_v36, %s5057_s30 }
 0x71f   : > { %v2431_v48 = vpop.permute.xlu1 %2430 }
 0x720   : > { %v2454_v50 = vadd.f32 %v2431_v48, %v2313_v29 }
 0x721   : > { %v2433_v11 = vpop.permute.xlu0 %2432 }
 0x722   : > { %v2455_v8 = vadd.f32 %v2433_v11, %v2314_v13 }
 0x723   : > { %v2294_v28 = vpop.permute.xlu1 %2293 }
 0x724   : > { %v6378_v41 = vpack.c.bf16 %v2455_v8, %v2454_v50  ;;  %v2315_v57 = vmul.f32 %v2294_v28, %v6295_v22 }
 0x725   : > { %v2296_v35 = vpop.permute.xlu0 %2295 }
 0x726   : > { %2474 = vrot.lane.b32.xlu1 %v6378_v41, %s5057_s30  ;;  %v2316_v14 = vmul.f32 %v2296_v35, %v6298_v12 }
 0x727   : > { %v2435_v16 = vpop.permute.xlu1 %2434 }
 0x728   : > { %v2456_v23 = vadd.f32 %v2435_v16, %v2315_v57 }
 0x729   : > { %v2437_v45 = vpop.permute.xlu0 %2436 }
 0x72a   : > { %v2457_v42 = vadd.f32 %v2437_v45, %v2316_v14 }
 0x72b   : > { %v2298_v49 = vpop.permute.xlu1 %2297 }
 0x72c   : > { %v6384_v10 = vpack.c.bf16 %v2457_v42, %v2456_v23  ;;  %v2317_v30 = vmul.f32 %v2298_v49, %v6317_v4 }
 0x72d   : > { %v2300_v7 = vpop.permute.xlu0 %2299 }
 0x72e   : > { %2476 = vrot.lane.b32.xlu0 %v6384_v10, %s5057_s30  ;;  %v2318_v38 = vmul.f32 %v2300_v7, %v6319_v2 }
 0x730   : > { %v2439_v0 = vpop.permute.xlu1 %2438 }
 0x731   : > { %v2458_v33 = vadd.f32 %v2439_v0, %v2317_v30 }
 0x732   : > { %v2441_v32 = vpop.permute.xlu0 %2440 }
 0x733   : > { %v2459_v22 = vadd.f32 %v2441_v32, %v2318_v38 }
 0x734   : > { %v2302_v53 = vpop.permute.xlu1 %2301 }
 0x735   : > { %v6390_v12 = vpack.c.bf16 %v2459_v22, %v2458_v33  ;;  %v2319_v18 = vmul.f32 %v2302_v53, %v6325_v55 }
 0x736   : > { %v2304_v6 = vpop.permute.xlu0 %2303 }
 0x737   : > { %2478 = vrot.lane.b32.xlu1 %v6390_v12, %s5057_s30  ;;  %v2320_v61 = vmul.f32 %v2304_v6, %v6327_v25 }
 0x738   : > { %v2443_v19 = vpop.permute.xlu1 %2442 }
 0x739   : > { %v2460_v21 = vadd.f32 %v2443_v19, %v2319_v18 }
 0x73a   : > { %v2445_v54 = vpop.permute.xlu0 %2444 }
 0x73b   : > { %v2461_v4 = vadd.f32 %v2445_v54, %v2320_v61 }
 0x73d   : > { %v6396_v52 = vpack.c.bf16 %v2461_v4, %v2460_v21 }
 0x73f   : > { %2480 = vrot.lane.b32.xlu0 %v6396_v52, %s5057_s30  ;;  %s6655_s30 = scalar_lea.sflag [#allocation4], %s6914_s22 }
 0x798   : > { %v2475_v2 = vpop.permute.xlu1 %2474 }
 0x799   : > { %v2496_v63 = vsel %vm2482_vm3, %v2475_v2, 0  ;;  %4219 = vmatprep.subr.msk.bf16.mxu1 %vm2482_vm3, %v2475_v2 }
 0x79a   : > { %4140 = vmatpush3.bf16.xpose.msra.mxu1 %v2496_v63 }
 0x7a0   : > { %v2477_v56 = vpop.permute.xlu0 %2476 }
 0x7a1   : > { %v2499_v36 = vsel %vm2482_vm3, %v2477_v56, 0  ;;  %4220 = vmatprep.subr.msk.bf16.mxu1 %vm2482_vm3, %v2477_v56 }
 0x7a2   : > { %4142 = vmatpush3.bf16.xpose.msra.mxu1 %v2499_v36 }
 0x7a9   : > { %v2479_v55 = vpop.permute.xlu1 %2478 }
 0x7aa   : > { %v2502_v25 = vsel %vm2482_vm3, %v2479_v55, 0  ;;  %4221 = vmatprep.subr.msk.bf16.mxu1 %vm2482_vm3, %v2479_v55 }
 0x7ab   : > { %4144 = vmatpush3.bf16.xpose.msra.mxu1 %v2502_v25 }
 0x7b1   : > { %v2481_v43 = vpop.permute.xlu0 %2480 }
 0x7b2   : > { %v2505_v20 = vsel %vm2482_vm3, %v2481_v43, 0  ;;  %4222 = vmatprep.subr.msk.bf16.mxu1 %vm2482_vm3, %v2481_v43 }
 0x7b3   : > { %4146 = vmatpush3.bf16.xpose.msra.mxu1 %v2505_v20 }
 0x7ba   : > { %4148 = vmatmul.mubr.msk.bf16.vlgmr.msra.gmra.mrb[36].mxu1 %vm2482_vm3, %v6259_v37 }
 0x7bb   : > { %4151 = vmatprep.mubr.msk.bf16.mxu1 %vm2482_vm3, %v6313_v51 }
 0x7c2   : > { %4152 = vmatmul.mubr.msk.bf16.gmra.mrb[40].mxu1 %vm2482_vm3, %v6311_v9 }
 0x88d   : > { %v4149_v48 = vpop.f32.mrb[36].mxu1 }
 0x88e   : > { %v2541_v29 = vpop.f32.mrb[37].mxu1  ;;  %v2578_v13 = vsel %vm1075_vm1, %v4149_v48, -inf }
 0x88f   : > { %2579 = vmax.xlane.f32.xlu0 %v2578_v13  ;;  %v4150_v11 = vpop.f32.mrb[38].mxu1  ;;  %v2572_v50 = vsel %vm1075_vm1, %v2541_v29, -inf }
 0x890   : > { %2573 = vmax.xlane.f32.xlu1 %v2572_v50  ;;  %v2544_v8 = vpop.f32.mrb[39].mxu1  ;;  %v2581_v57 = vsel %vm1075_vm1, %v4150_v11, -inf }
 0x891   : > { %v2575_v28 = vsel %vm1075_vm1, %v2544_v8, -inf }
 0x893   : > { %2576 = vmax.xlane.f32.xlu0 %v2575_v28 }
 0x895   : > { %v4153_v35 = vpop.f32.mrb[40].mxu1 }
 0x896   : > { %v6417_v16 = vpop.f32.mrb[41].mxu1  ;;  %v2590_v49 = vsel %vm1075_vm1, %v4153_v35, -inf }
 0x897   : > { %2582 = vmax.xlane.f32.xlu0 %v2581_v57  ;;  %v4154_v14 = vpop.f32.mrb[42].mxu1  ;;  %v2584_v45 = vsel %vm1075_vm1, %v6417_v16, -inf }
 0x898   : > { %2585 = vmax.xlane.f32.xlu1 %v2584_v45  ;;  %v2560_v23 = vpop.f32.mrb[43].mxu1  ;;  %v2593_v7 = vsel %vm1075_vm1, %v4154_v14, -inf }
 0x899   : > { %v2587_v42 = vsel %vm1075_vm1, %v2560_v23, -inf }
 0x89b   : > { %2588 = vmax.xlane.f32.xlu0 %v2587_v42 }
 0x89c   : > { %2591 = vmax.xlane.f32.xlu1 %v2590_v49 }
 0x89f   : > { %2594 = vmax.xlane.f32.xlu0 %v2593_v7 }
 0x91c   : > { %v2580_v0 = vpop.xlane.xlu0 %2579 }
 0x91d   : > { %v2598_v30 = vsub.f32 %v4149_v48, %v2580_v0  ;;  %v2574_v38 = vpop.xlane.xlu1 %2573 }
 0x91e   : > { %v2596_v32 = vsub.f32 %v2541_v29, %v2574_v38 }
 0x91f   : > { %v2608_v33 = vmul.f32 1.442695, %v2598_v30 }
 0x920   : > { %v2604_v22 = vmul.f32 1.442695, %v2596_v32  ;;  %v2577_v53 = vpop.xlane.xlu0 %2576 }
 0x921   : > { %4565 = vpow2.f32 %v2608_v33  ;;  %v2597_v6 = vsub.f32 %v2544_v8, %v2577_v53 }
 0x922   : > { %4567 = vpow2.f32 %v2604_v22 }
 0x923   : > { %v2606_v61 = vmul.f32 1.442695, %v2597_v6 }
 0x924   : > { %v2583_v19 = vpop.xlane.xlu0 %2582 }
 0x925   : > { %v2599_v18 = vsub.f32 %v4150_v11, %v2583_v19 }
 0x927   : > { %v2610_v54 = vmul.f32 1.442695, %v2599_v18 }
 0x928   : > { %v2589_v21 = vpop.xlane.xlu0 %2588 }
 0x929   : > { %4569 = vpow2.f32 %v2610_v54  ;;  %v2601_v2 = vsub.f32 %v2560_v23, %v2589_v21 }
 0x92a   : > { %4571 = vpow2.f32 %v2606_v61 }
 0x92b   : > { %v6425_v4 = vpop.eup %4565  ;;  %v2614_v25 = vmul.f32 1.442695, %v2601_v2 }
 0x92c   : > { %v2595_v63 = vpop.xlane.xlu0 %2594  ;;  %v2626_v56 = vsel %vm1075_vm1, %v6425_v4, 0.0  ;;  %v4568_v36 = vpop.eup %4567 }
 0x92d   : > { %v2603_v55 = vsub.f32 %v4154_v14, %v2595_v63  ;;  %2627 = vadd.xlane.f32.xlu1 %v2626_v56  ;;  %v2620_v20 = vsel %vm1075_vm1, %v4568_v36, 0.0  ;;  %v2586_v14 = vpop.xlane.xlu1 %2585 }
 0x92e   : > { %v2600_v42 = vsub.f32 %v6417_v16, %v2586_v14 }
 0x92f   : > { %v2618_v43 = vmul.f32 1.442695, %v2603_v55 }
 0x930   : > { %v2612_v7 = vmul.f32 1.442695, %v2600_v42 }
 0x931   : > { %4573 = vpow2.f32 %v2618_v43  ;;  %2621 = vadd.xlane.f32.xlu1 %v2620_v20  ;;  %v2592_v45 = vpop.xlane.xlu1 %2591 }
 0x932   : > { %4575 = vpow2.f32 %v2614_v25  ;;  %v2602_v23 = vsub.f32 %v4153_v35, %v2592_v45 }
 0x933   : > { %v4570_v48 = vpop.eup %4569 }
 0x934   : > { %v2629_v29 = vsel %vm1075_vm1, %v4570_v48, 0.0  ;;  %v4572_v13 = vpop.eup %4571  ;;  %v2616_v49 = vmul.f32 1.442695, %v2602_v23 }
 0x935   : > { %2630 = vadd.xlane.f32.xlu0 %v2629_v29  ;;  %v2623_v11 = vsel %vm1075_vm1, %v4572_v13, 0.0 }
 0x936   : > { %4577 = vpow2.f32 %v2616_v49 }
 0x937   : > { %4579 = vpow2.f32 %v2612_v7 }
 0x939   : > { %2624 = vadd.xlane.f32.xlu0 %v2623_v11 }
 0x93b   : > { %v6432_v50 = vpop.eup %4573 }
 0x93c   : > { %v2641_v8 = vsel %vm1075_vm1, %v6432_v50, 0.0  ;;  %v6436_v28 = vpop.eup %4575 }
 0x93d   : > { %2642 = vadd.xlane.f32.xlu0 %v2641_v8  ;;  %v2635_v57 = vsel %vm1075_vm1, %v6436_v28, 0.0 }
 0x941   : > { %2636 = vadd.xlane.f32.xlu0 %v2635_v57 }
 0x942   : > { %2753 = vrot.lane.b32.xlu1 %v6378_v41, %s5058_s13  ;;  %v4578_v41 = vpop.eup %4577 }
 0x943   : > { %v2638_v0 = vsel %vm1075_vm1, %v4578_v41, 0.0  ;;  %v4580_v35 = vpop.eup %4579 }
 0x944   : > { %v2632_v16 = vsel %vm1075_vm1, %v4580_v35, 0.0 }
 0x957   : > { %2755 = vrot.lane.b32.xlu0 %v6384_v10, %s5058_s13 }
 0x95b   : > { %2747 = vrot.lane.b32.xlu0 %v6259_v37, %s5059_s4 }
 0x95f   : > { %2751 = vrot.lane.b32.xlu0 %v6311_v9, %s5059_s4 }
 0x966   : > { %2639 = vadd.xlane.f32.xlu1 %v2638_v0 }
 0x96a   : > { %2633 = vadd.xlane.f32.xlu1 %v2632_v16 }
 0x97b   : > { %2757 = vrot.lane.b32.xlu1 %v6390_v12, %s5058_s13 }
 0x97f   : > { %2759 = vrot.lane.b32.xlu1 %v6396_v52, %s5058_s13 }
 0x983   : > { %2745 = vrot.lane.b32.xlu1 %v6261_v46, %s5059_s4 }
 0x987   : > { %2749 = vrot.lane.b32.xlu1 %v6313_v51, %s5059_s4 }
 0x9ba   : > { %v2628_v37 = vpop.xlane.xlu1 %2627 }
 0x9be   : > { %v2622_v9 = vpop.xlane.xlu1 %2621 }
 0x9c2   : > { %v2754_v10 = vpop.permute.xlu1 %2753  ;;  %v2631_v30 = vpop.xlane.xlu0 %2630 }
 0x9c3   : > { %4223 = vmatprep.subr.msk.bf16.mxu0 %vm2482_vm3, %v2754_v10  ;;  %4581 = vrcp.f32 %v2631_v30  ;;  %v2774_v54 = vsel %vm2482_vm3, %v2754_v10, 0 }
 0x9c4   : > { %4583 = vrcp.f32 %v2622_v9 }
 0x9c5   : > { %4585 = vrcp.f32 %v2628_v37 }
 0x9c6   : > { %v2625_v38 = vpop.xlane.xlu0 %2624 }
 0x9c7   : > { %4587 = vrcp.f32 %v2625_v38 }
 0x9ca   : > { %v2643_v12 = vpop.xlane.xlu0 %2642 }
 0x9cd   : > { %v4582_v32 = vpop.eup %4581 }
 0x9ce   : > { %v4584_v52 = vpop.eup %4583  ;;  %v2655_v46 = vmul.f32 %v4582_v32, %v4570_v48  ;;  %v2637_v53 = vpop.xlane.xlu0 %2636 }
 0x9cf   : > { %v4586_v33 = vpop.eup %4585  ;;  %v2652_v6 = vmul.f32 %v4584_v52, %v4568_v36 }
 0x9d0   : > { %v2654_v19 = vmul.f32 %v4586_v33, %v6425_v4 }
 0x9d1   : > { %v4588_v22 = vpop.eup %4587 }
 0x9d2   : > { %v2653_v51 = vmul.f32 %v4588_v22, %v4572_v13  ;;  %v2661_v61 = vpack.c.bf16 %v2655_v46, %v2654_v19  ;;  %v2756_v21 = vpop.permute.xlu0 %2755 }
 0x9d3   : > { %v2777_v2 = vsel %vm2482_vm3, %v2756_v21, 0 }
 0x9d4   : > { %v2660_v18 = vpack.c.bf16 %v2653_v51, %v2652_v6 }
 0x9d6   : > { %4163 = vmatprep.mubr.msk.bf16.mxu0 %vm1075_vm1, %v2660_v18  ;;  %v2748_v42 = vpop.permute.xlu0 %2747 }
 0x9d7   : > { %4164 = vmatmul.mubr.msk.bf16.vlgmr.msra.gmra.mrb[40].mxu0 %vm1075_vm1, %v2661_v61 }
 0x9d8   : > { %4172 = vmatpush3.bf16.xpose.msra.mxu0 %v2774_v54 }
 0x9d9   : > { %4224 = vmatprep.subr.msk.bf16.mxu0 %vm2482_vm3, %v2756_v21 }
 0x9e0   : > { %4174 = vmatpush3.bf16.xpose.msra.mxu0 %v2777_v2 }
 0x9f3   : > { %v2640_v63 = vpop.xlane.xlu1 %2639 }
 0x9f4   : > { %4589 = vrcp.f32 %v2640_v63 }
 0x9f5   : > { %4591 = vrcp.f32 %v2637_v53 }
 0x9f6   : > { %4593 = vrcp.f32 %v2643_v12 }
 0x9f7   : > { %v2634_v4 = vpop.xlane.xlu1 %2633 }
 0x9f8   : > { %4595 = vrcp.f32 %v2634_v4 }
 0x9fb   : > { %v2758_v56 = vpop.permute.xlu1 %2757 }
 0x9fc   : > { %v2780_v36 = vsel %vm2482_vm3, %v2758_v56, 0  ;;  %4225 = vmatprep.subr.msk.bf16.mxu0 %vm2482_vm3, %v2758_v56 }
 0x9fd   : > { %4176 = vmatpush3.bf16.xpose.msra.mxu0 %v2780_v36 }
 0x9fe   : > { %v4590_v55 = vpop.eup %4589 }
 0x9ff   : > { %v2760_v25 = vpop.permute.xlu1 %2759  ;;  %v4592_v43 = vpop.eup %4591  ;;  %v2658_v29 = vmul.f32 %v4590_v55, %v4578_v41 }
 0xa00   : > { %4226 = vmatprep.subr.msk.bf16.mxu0 %vm2482_vm3, %v2760_v25  ;;  %v4594_v20 = vpop.eup %4593  ;;  %v2657_v11 = vmul.f32 %v4592_v43, %v6436_v28  ;;  %v2783_v8 = vsel %vm2482_vm3, %v2760_v25, 0  ;;  %v2752_v28 = vpop.permute.xlu0 %2751 }
 0xa01   : > { %v2659_v57 = vmul.f32 %v4594_v20, %v6432_v50 }
 0xa02   : > { %v4596_v48 = vpop.eup %4595 }
 0xa03   : > { %v2656_v13 = vmul.f32 %v4596_v48, %v4580_v35  ;;  %v2663_v45 = vpack.c.bf16 %v2659_v57, %v2658_v29  ;;  %v2746_v23 = vpop.permute.xlu1 %2745 }
 0xa05   : > { %4178 = vmatpush3.bf16.xpose.msra.mxu0 %v2783_v8  ;;  %v2662_v14 = vpack.c.bf16 %v2657_v11, %v2656_v13 }
 0xa07   : > { %4167 = vmatprep.mubr.msk.bf16.mxu0 %vm1075_vm1, %v2662_v14  ;;  %v2750_v49 = vpop.permute.xlu1 %2749 }
 0xa08   : > { %4168 = vmatmul.mubr.msk.bf16.gmra.mrb[44].mxu0 %vm1075_vm1, %v2663_v45 }
 0xa09   : > { %4179 = vmatprep.mubr.msk.bf16.mxu0 %vm2482_vm3, %v2746_v23 }
 0xa10   : > { %4180 = vmatmul.mubr.msk.bf16.vlgmr.msra.gmra.mrb[48].mxu0 %vm2482_vm3, %v2748_v42 }
 0xa11   : > { %4183 = vmatprep.mubr.msk.bf16.mxu0 %vm2482_vm3, %v2750_v49 }
 0xa18   : > { %4184 = vmatmul.mubr.msk.bf16.gmra.mrb[52].mxu0 %vm2482_vm3, %v2752_v28 }
 0xaaa   : > { %v6478_v50 = vpop.f32.mrb[40].mxu0 }
 0xaab   : > { %v6480_v7 = vpop.f32.mrb[41].mxu0 }
 0xaac   : > { %v6482_v41 = vpop.f32.mrb[42].mxu0 }
 0xaad   : > { %v6484_v0 = vpop.f32.mrb[43].mxu0 }
 0xadb   : > { %v6486_v35 = vpop.f32.mrb[44].mxu0 }
 0xadc   : > { %v6488_v16 = vpop.f32.mrb[45].mxu0 }
 0xadd   : > { %v6490_v37 = vpop.f32.mrb[46].mxu0 }
 0xade   : > { %v6492_v9 = vpop.f32.mrb[47].mxu0 }
 0xae3   : > { %v4181_v10 = vpop.f32.mrb[48].mxu0 }
 0xae4   : > { %v2819_v30 = vpop.f32.mrb[49].mxu0  ;;  %v2856_v38 = vsel %vm1075_vm1, %v4181_v10, -inf }
 0xae5   : > { %2857 = vmax.xlane.f32.xlu0 %v2856_v38  ;;  %v4182_v12 = vpop.f32.mrb[50].mxu0  ;;  %v2850_v32 = vsel %vm1075_vm1, %v2819_v30, -inf }
 0xae6   : > { %2851 = vmax.xlane.f32.xlu1 %v2850_v32  ;;  %v2822_v52 = vpop.f32.mrb[51].mxu0  ;;  %v2859_v53 = vsel %vm1075_vm1, %v4182_v12, -inf }
 0xae7   : > { %v2853_v33 = vsel %vm1075_vm1, %v2822_v52, -inf }
 0xae9   : > { %2854 = vmax.xlane.f32.xlu0 %v2853_v33 }
 0xaeb   : > { %v4185_v22 = vpop.f32.mrb[52].mxu0 }
 0xaec   : > { %v2835_v46 = vpop.f32.mrb[53].mxu0  ;;  %v2868_v61 = vsel %vm1075_vm1, %v4185_v22, -inf }
 0xaed   : > { %2860 = vmax.xlane.f32.xlu0 %v2859_v53  ;;  %v4186_v6 = vpop.f32.mrb[54].mxu0  ;;  %v2862_v51 = vsel %vm1075_vm1, %v2835_v46, -inf }
 0xaee   : > { %2863 = vmax.xlane.f32.xlu1 %v2862_v51  ;;  %v2838_v19 = vpop.f32.mrb[55].mxu0  ;;  %v2871_v54 = vsel %vm1075_vm1, %v4186_v6, -inf }
 0xaef   : > { %v2865_v18 = vsel %vm1075_vm1, %v2838_v19, -inf }
 0xaf1   : > { %2866 = vmax.xlane.f32.xlu0 %v2865_v18 }
 0xaf2   : > { %2869 = vmax.xlane.f32.xlu1 %v2868_v61 }
 0xaf5   : > { %2872 = vmax.xlane.f32.xlu0 %v2871_v54 }
 0xb03   : > { %2946 = vrot.lane.b32.xlu1 %v5916_v40, %s5059_s4 }
 0xb72   : > { %v2858_v21 = vpop.xlane.xlu0 %2857 }
 0xb73   : > { %v2876_v2 = vsub.f32 %v4181_v10, %v2858_v21  ;;  %v2852_v63 = vpop.xlane.xlu1 %2851 }
 0xb74   : > { %v2874_v4 = vsub.f32 %v2819_v30, %v2852_v63 }
 0xb75   : > { %v2886_v56 = vmul.f32 1.442695, %v2876_v2 }
 0xb76   : > { %v2882_v36 = vmul.f32 1.442695, %v2874_v4  ;;  %v2855_v55 = vpop.xlane.xlu0 %2854 }
 0xb77   : > { %4597 = vpow2.f32 %v2886_v56  ;;  %v2875_v25 = vsub.f32 %v2822_v52, %v2855_v55 }
 0xb78   : > { %4599 = vpow2.f32 %v2882_v36 }
 0xb79   : > { %v2884_v29 = vmul.f32 1.442695, %v2875_v25 }
 0xb7a   : > { %v2861_v43 = vpop.xlane.xlu0 %2860 }
 0xb7b   : > { %v2877_v20 = vsub.f32 %v4182_v12, %v2861_v43  ;;  %v2864_v48 = vpop.xlane.xlu1 %2863 }
 0xb7c   : > { %v2878_v11 = vsub.f32 %v2835_v46, %v2864_v48 }
 0xb7d   : > { %v2888_v13 = vmul.f32 1.442695, %v2877_v20 }
 0xb7e   : > { %v2867_v8 = vpop.xlane.xlu0 %2866  ;;  %v2890_v23 = vmul.f32 1.442695, %v2878_v11 }
 0xb7f   : > { %4601 = vpow2.f32 %v2888_v13  ;;  %v2870_v57 = vpop.xlane.xlu1 %2869  ;;  %v2879_v45 = vsub.f32 %v2838_v19, %v2867_v8 }
 0xb80   : > { %v2880_v40 = vsub.f32 %v4185_v22, %v2870_v57  ;;  %4603 = vpow2.f32 %v2884_v29 }
 0xb81   : > { %v6504_v14 = vpop.eup %4597  ;;  %v2892_v12 = vmul.f32 1.442695, %v2879_v45 }
 0xb82   : > { %v2894_v42 = vmul.f32 1.442695, %v2880_v40  ;;  %v2873_v49 = vpop.xlane.xlu0 %2872  ;;  %v2904_v28 = vsel %vm1075_vm1, %v6504_v14, 0.0  ;;  %v4600_v10 = vpop.eup %4599 }
 0xb83   : > { %v2881_v30 = vsub.f32 %v4186_v6, %v2873_v49  ;;  %v2947_v38 = vpop.permute.xlu1 %2946  ;;  %2905 = vadd.xlane.f32.xlu1 %v2904_v28  ;;  %v2898_v52 = vsel %vm1075_vm1, %v4600_v10, 0.0  ;;  %v4461_v49 = vld [vmem:[%s5663_s21 + $0x40] sm:$0xff]  }
 0xb84   : > { %4605 = vpow2.f32 %v2894_v42  ;;  %4187 = vmatprep.subr.bf16.mxu1 %v2947_v38 }
 0xb85   : > { %v2896_v32 = vmul.f32 1.442695, %v2881_v30  ;;  %4188 = vmatpush3.bf16.msra.mxu1 %v2947_v38  ;;  %4607 = vpow2.f32 %v2890_v23  ;;  %v4462_v38 = vld [vmem:[%s5663_s21] sm:$0xff]  }
 0xb87   : > { %4609 = vpow2.f32 %v2896_v32  ;;  %2899 = vadd.xlane.f32.xlu1 %v2898_v52  ;;  %v4463_v32 = vld [vmem:[%s5663_s21 + $0x48] sm:$0xff]  }
 0xb88   : > { %4611 = vpow2.f32 %v2892_v12 }
 0xb89   : > { %v4602_v33 = vpop.eup %4601 }
 0xb8a   : > { %v2907_v22 = vsel %vm1075_vm1, %v4602_v33, 0.0  ;;  %v4604_v46 = vpop.eup %4603 }
 0xb8b   : > { %2908 = vadd.xlane.f32.xlu0 %v2907_v22  ;;  %v2901_v6 = vsel %vm1075_vm1, %v4604_v46, 0.0 }
 0xb8e   : > { %v6510_v53 = vpop.eup %4605 }
 0xb8f   : > { %2902 = vadd.xlane.f32.xlu0 %v2901_v6  ;;  %v2916_v51 = vsel %vm1075_vm1, %v6510_v53, 0.0  ;;  %v4608_v19 = vpop.eup %4607  ;;  %v4465_v6 = vld [vmem:[%s5663_s21 + $0x50] sm:$0xff]  }
 0xb90   : > { %2917 = vadd.xlane.f32.xlu1 %v2916_v51  ;;  %v2910_v21 = vsel %vm1075_vm1, %v4608_v19, 0.0 }
 0xb91   : > { %v6515_v18 = vpop.eup %4609 }
 0xb92   : > { %v2919_v61 = vsel %vm1075_vm1, %v6515_v18, 0.0  ;;  %v4612_v54 = vpop.eup %4611 }
 0xb93   : > { %2920 = vadd.xlane.f32.xlu0 %v2919_v61  ;;  %v2913_v2 = vsel %vm1075_vm1, %v4612_v54, 0.0 }
 0xb94   : > { %2911 = vadd.xlane.f32.xlu1 %v2910_v21  ;;  %v6895_v21 = vpack.c.bf16 %v6098_v44, %v6095_v39  ;;  %v4475_v39 = vld [vmem:[%s5663_s21 + $0x78] sm:$0xff]  }
 0xb95   : > { %v4476_v44 = vld [vmem:[%s5663_s21 + $0x38] sm:$0xff]  }
 0xb97   : > { %2914 = vadd.xlane.f32.xlu0 %v2913_v2  ;;  %v4470_v2 = vld [vmem:[%s5663_s21 + $0x20] sm:$0xff]  }
 0xba5   : > { %2950 = vrot.lane.b32.xlu1 %v6003_v60, %s5059_s4 }
 0xba9   : > { %2952 = vrot.lane.b32.xlu1 %v6075_v3, %s5059_s4 }
 0xbad   : > { %2948 = vrot.lane.b32.xlu0 %v5954_v17, %s5059_s4 }
 0xc10   : > { %v2906_v63 = vpop.xlane.xlu1 %2905 }
 0xc14   : > { %v2900_v4 = vpop.xlane.xlu1 %2899 }
 0xc15   : > { %4613 = vrcp.f32 %v2900_v4  ;;  %v4472_v4 = vld [vmem:[%s5663_s21 + $0x28] sm:$0xff]  }
 0xc18   : > { %v2909_v56 = vpop.xlane.xlu0 %2908 }
 0xc1c   : > { %v2903_v36 = vpop.xlane.xlu0 %2902 }
 0xc1d   : > { %4615 = vrcp.f32 %v2903_v36  ;;  %v2918_v55 = vpop.xlane.xlu1 %2917  ;;  %v4474_v36 = vld [vmem:[%s5663_s21 + $0x30] sm:$0xff]  }
 0xc1e   : > { %4617 = vrcp.f32 %v2909_v56  ;;  %v4473_v56 = vld [vmem:[%s5663_s21 + $0x70] sm:$0xff]  }
 0xc1f   : > { %4619 = vrcp.f32 %v2906_v63  ;;  %v4614_v60 = vpop.eup %4613  ;;  %v4471_v63 = vld [vmem:[%s5663_s21 + $0x68] sm:$0xff]  }
 0xc20   : > { %v2921_v25 = vpop.xlane.xlu0 %2920  ;;  %v2930_v13 = vmul.f32 %v4614_v60, %v4600_v10  ;;  %v6900_v60 = vpack.c.bf16 %v6146_v47, %v6144_v26 }
 0xc21   : > { %v2912_v43 = vpop.xlane.xlu1 %2911 }
 0xc22   : > { %4621 = vrcp.f32 %v2912_v43  ;;  %v6898_v43 = vpack.c.bf16 %v6129_v27, %v6127_v24  ;;  %v4479_v24 = vld [vmem:[%s5670_s8 + $0x10] sm:$0xff]   ;;  %v4480_v27 = vld [vmem:[%s5670_s8 + $0x18] sm:$0xff]  }
 0xc24   : > { %v2915_v20 = vpop.xlane.xlu0 %2914 }
 0xc25   : > { %4623 = vrcp.f32 %v2915_v20  ;;  %v2951_v3 = vpop.permute.xlu1 %2950  ;;  %v6899_v20 = vpack.c.bf16 %v6138_v31, %v6136_v34 }
 0xc26   : > { %4625 = vrcp.f32 %v2921_v25  ;;  %v6897_v25 = vpack.c.bf16 %v6120_v59, %v6118_v15  ;;  %v6903_v15 = vld [vmem:[#allocation45_spill] sm:$0xff] }
 0xc27   : > { %v4616_v48 = vpop.eup %4615  ;;  %4627 = vrcp.f32 %v2918_v55  ;;  %v6896_v55 = vpack.c.bf16 %v6071_v62, %v6068_v1  ;;  %v6901_v1 = vpack.c.bf16 %v6154_v5, %v6152_v58  ;;  %v6902_v62 = vld [vmem:[#allocation46_spill] sm:$0xff] }
 0xc28   : > { %v2949_v29 = vpop.permute.xlu0 %2948  ;;  %v2931_v17 = vmul.f32 %v4616_v48, %v4604_v46  ;;  %v4618_v8 = vpop.eup %4617  ;;  %v6904_v59 = vpack.c.bf16 %v6902_v62, %v6903_v15  ;;  %v4477_v48 = vld [vmem:[%s5670_s8] sm:$0xff]  }
 0xc29   : > { %4189 = vmatprep.subr.bf16.mxu1 %v2949_v29  ;;  %v4620_v57 = vpop.eup %4619  ;;  %v2953_v45 = vpop.permute.xlu1 %2952  ;;  %v2933_v42 = vmul.f32 %v4618_v8, %v4602_v33  ;;  %4203 = vmatprep.subr.bf16.mxu0 %v4477_v48 }
 0xc2a   : > { %4190 = vmatpush3.bf16.msra.mxu1 %v2949_v29  ;;  %v2938_v11 = vpack.c.bf16 %v2931_v17, %v2930_v13  ;;  %v2932_v10 = vmul.f32 %v4620_v57, %v6504_v14  ;;  %v4464_v14 = vld [vmem:[%s5663_s21 + $0x8] sm:$0xff]   ;;  %4204 = vmatpush3.bf16.msra.mxu0 %v4477_v48 }
 0xc2b   : > { %4191 = vmatprep.subr.bf16.mxu1 %v2951_v3 }
 0xc2c   : > { %4195 = vmatprep.mubr.msk.bf16.mxu1 %vm1075_vm1, %v2938_v11  ;;  %v4622_v40 = vpop.eup %4621  ;;  %v2939_v12 = vpack.c.bf16 %v2933_v42, %v2932_v10 }
 0xc2d   : > { %v2934_v30 = vmul.f32 %v4622_v40, %v4608_v19  ;;  %v4466_v19 = vld [vmem:[%s5663_s21 + $0x10] sm:$0xff]  }
 0xc2e   : > { %4192 = vmatpush3.bf16.msra.mxu1 %v2951_v3  ;;  %v4478_v3 = vld [vmem:[%s5670_s8 + $0x8] sm:$0xff]  }
 0xc2f   : > { %v4624_v23 = vpop.eup %4623  ;;  %4193 = vmatprep.subr.bf16.mxu1 %v2953_v45  ;;  %4205 = vmatprep.subr.bf16.mxu0 %v4478_v3 }
 0xc30   : > { %v2935_v28 = vmul.f32 %v4624_v23, %v4612_v54  ;;  %v4626_v52 = vpop.eup %4625  ;;  %v4467_v54 = vld [vmem:[%s5663_s21 + $0x58] sm:$0xff]   ;;  %4206 = vmatpush3.bf16.msra.mxu0 %v4478_v3 }
 0xc31   : > { %v4628_v33 = vpop.eup %4627  ;;  %v2937_v46 = vmul.f32 %v4626_v52, %v6515_v18  ;;  %v4468_v18 = vld [vmem:[%s5663_s21 + $0x18] sm:$0xff]   ;;  %4207 = vmatprep.subr.bf16.mxu0 %v4479_v24 }
 0xc32   : > { %4194 = vmatpush3.bf16.msra.mxu1 %v2953_v45  ;;  %v2940_v22 = vpack.c.bf16 %v2935_v28, %v2934_v30  ;;  %v2936_v51 = vmul.f32 %v4628_v33, %v6510_v53  ;;  %v4469_v53 = vld [vmem:[%s5663_s21 + $0x60] sm:$0xff]   ;;  %s6905_s21 = scalar_lea.vmem [#allocation14], %s6883_s15  ;;  %s3446_s15 = sshll.u32 %s5672_s10, 4  ;;  %s6644_s15 = int_to_ptr.vmem [resolvable:$true] %s3446_s15 }
 0xc33   : > { %3991 = vmatprep.subr.bf16.mxu1 %v4461_v49  ;;  %s4901_s20 = scalar_lea.vmem %s6644_s15, 1024  ;;  %p4908_p6 = scmp.lt.s32.totalorder %s6644_s15, %s4906_s12 }
 0xc34   : > { %v2941_v61 = vpack.c.bf16 %v2937_v46, %v2936_v51  ;;  %4208 = vmatpush3.bf16.msra.mxu0 %v4479_v24  ;;  %p4902_p2 = scmp.ne.s32.totalorder %s6644_s15, %s4901_s20  ;;  %p4909_p10 = scmp.lt.s32.totalorder %s4907_s26, %s4901_s20 }
 0xc35   : > { %4196 = vmatmul.mubr.msk.bf16.vlgmr.msra.gmra.mrb[44].mxu1 %vm1075_vm1, %v2939_v12  ;;  %4209 = vmatprep.subr.bf16.mxu0 %v4480_v27 }
 0xc36   : > { %4199 = vmatprep.mubr.msk.bf16.mxu1 %vm1075_vm1, %v2940_v22  ;;  %3992 = vmatpush3.bf16.msra.mxu1 %v4462_v38  ;;  %p4903_p12 = pnand %p4902_p2, %p6915_p5  ;;  %p4910_p3 = por %p4909_p10, %p4908_p6 }
 0xc37   : > { %3993 = vmatprep.subr.bf16.mxu1 %v4463_v32 }
 0xc38   : > { %4210 = vmatpush3.bf16.msra.mxu0 %v4480_v27  ;;  %p4904_p4 = pneg %p4903_p12 }
 0xc3a   : > { %3994 = vmatpush3.bf16.msra.mxu1 %v4464_v14  ;;  %p4911_p0 = pnand %p4910_p3, %p4904_p4 }
 0xc3b   : > { %3995 = vmatprep.subr.bf16.mxu1 %v4465_v6 }
 0xc3d   : > { %4200 = vmatmul.mubr.msk.bf16.gmra.mrb[48].mxu1 %vm1075_vm1, %v2941_v61 }
 0xc3e   : > { %3996 = vmatpush3.bf16.msra.mxu1 %v4466_v19  ;;  %3255 = vmatprep.mubr.bf16.mxu1 %v6895_v21 }
 0xc3f   : > { %3997 = vmatprep.subr.bf16.mxu1 %v4467_v54 }
 0xc42   : > { %3998 = vmatpush3.bf16.msra.mxu1 %v4468_v18 }
 0xc43   : > { %3999 = vmatprep.subr.bf16.mxu1 %v4469_v53 }
 0xc46   : > { %4000 = vmatpush3.bf16.msra.mxu1 %v4470_v2 }
 0xc47   : > { %4001 = vmatprep.subr.bf16.mxu1 %v4471_v63 }
 0xc4a   : > { %4002 = vmatpush3.bf16.msra.mxu1 %v4472_v4 }
 0xc4b   : > { %4003 = vmatprep.subr.bf16.mxu1 %v4473_v56 }
 0xc4e   : > { %4004 = vmatpush3.bf16.msra.mxu1 %v4474_v36 }
 0xc4f   : > { %4005 = vmatprep.subr.bf16.mxu1 %v4475_v39 }
 0xc52   : > { %4006 = vmatpush3.bf16.msra.mxu1 %v4476_v44 }
 0xc55   : > { %3256 = vmatmul.mubr.bf16.vlgmr.msra.gmra.mrb[52].mxu1 %v6896_v55 }
 0xc56   : > { %3263 = vmatprep.mubr.bf16.mxu1 %v6897_v25 }
 0xc5d   : > { %3264 = vmatmul.mubr.bf16.gmra.mrb[56].mxu1 %v6898_v43 }
 0xc5e   : > { %3271 = vmatprep.mubr.bf16.mxu1 %v6899_v20 }
 0xc65   : > { %3272 = vmatmul.mubr.bf16.gmra.mrb[60].mxu1 %v6900_v60 }
 0xc66   : > { %3279 = vmatprep.mubr.bf16.mxu1 %v6901_v1 }
 0xc6d   : > { %3280 = vmatmul.mubr.bf16.gmra.mrb[64].mxu1 %v6904_v59 }
 0xd08   : > { %v4197_v34 = vpop.f32.mrb[44].mxu1 }
 0xd09   : > { %v3004_v31 = vpop.f32.mrb[45].mxu1 }
 0xd0a   : > { %v4198_v26 = vpop.f32.mrb[46].mxu1 }
 0xd0b   : > { %v4402_v47 = vpack.i.bf16 %v4198_v26, %v4197_v34  ;;  %v3007_v58 = vpop.f32.mrb[47].mxu1  ;;  %v1200_v34 = vld [vmem:[%s6905_s21] sm:$0x1] }
 0xd0c   : > { %v4397_v5 = vpack.i.bf16 %v3007_v58, %v3004_v31  ;;  %v6906_v31 = vld [vmem:[#allocation44_spill] sm:$0xff] }
 0xd0d   : > { %4403 = vrot.lane.b32.xlu0 %v4402_v47, %s5058_s13  ;;  %v1260_v26 = vadd.f32 %v6906_v31, %v1200_v34 }
 0xd0e   : > { %4398 = vrot.lane.b32.xlu1 %v4397_v5, %s5058_s13  ;;  %v6908_v5 = vld [vmem:[#allocation43_spill] sm:$0xff] }
 0xd10   : > { %v4201_v29 = vpop.f32.mrb[48].mxu1 }
 0xd11   : > { %v3020_v13 = vpop.f32.mrb[49].mxu1 }
 0xd12   : > { %v4202_v17 = vpop.f32.mrb[50].mxu1 }
 0xd13   : > { %v4412_v11 = vpack.i.bf16 %v4202_v17, %v4201_v29  ;;  %v3023_v8 = vpop.f32.mrb[51].mxu1  ;;  %v3407_v29 = vrot.slane %v1260_v26, %v6908_v5 }
 0xd14   : > { %v4407_v57 = vpack.i.bf16 %v3023_v8, %v3020_v13 }
 0xd15   : > { %4413 = vrot.lane.b32.xlu0 %v4412_v11, %s5058_s13 }
 0xd16   : > { %4408 = vrot.lane.b32.xlu1 %v4407_v57, %s5058_s13 }
 0xd28   : > { %v4007_v40 = vpop.f32.mrb[52].mxu1 }
 0xd29   : > { %v4008_v45 = vpop.f32.mrb[53].mxu1 }
 0xd2a   : > { %v4009_v23 = vadd.f32 %v4008_v45, %v4007_v40  ;;  %v4010_v42 = vpop.f32.mrb[54].mxu1 }
 0xd2b   : > { %v4011_v49 = vpop.f32.mrb[55].mxu1 }
 0xd2c   : > { %v4012_v28 = vadd.f32 %v4011_v49, %v4010_v42 }
 0xd30   : > { %v4013_v10 = vpop.f32.mrb[56].mxu1 }
 0xd31   : > { %v4014_v30 = vpop.f32.mrb[57].mxu1 }
 0xd32   : > { %v4015_v38 = vadd.f32 %v4014_v30, %v4013_v10  ;;  %v4016_v12 = vpop.f32.mrb[58].mxu1  ;;  %v4629_v10 = vld [vmem:[%s5672_s10 + $0x10] sm:$0xff] }
 0xd33   : > { %v4017_v32 = vpop.f32.mrb[59].mxu1 }
 0xd34   : > { %v4018_v52 = vadd.f32 %v4017_v32, %v4016_v12 }
 0xd38   : > { %v4019_v22 = vpop.f32.mrb[60].mxu1 }
 0xd39   : > { %v4020_v33 = vpop.f32.mrb[61].mxu1 }
 0xd3a   : > { %v6582_v14 = vadd.f32 %v4020_v33, %v4019_v22  ;;  %v4022_v46 = vpop.f32.mrb[62].mxu1 }
 0xd3b   : > { %v4023_v6 = vpop.f32.mrb[63].mxu1 }
 0xd3c   : > { %v6584_v51 = vadd.f32 %v4023_v6, %v4022_v46  ;;  %v4632_v6 = vld [vmem:[%s5672_s10 + $0x8] sm:$0xff] }
 0xd40   : > { %v4025_v19 = vpop.f32.mrb[64].mxu1 }
 0xd41   : > { %v4026_v61 = vpop.f32.mrb[65].mxu1 }
 0xd42   : > { %v4027_v54 = vadd.f32 %v4026_v61, %v4025_v19  ;;  %v4028_v21 = vpop.f32.mrb[66].mxu1 }
 0xd43   : > { %v4029_v18 = vpop.f32.mrb[67].mxu1 }
 0xd44   : > { %v6586_v53 = vadd.f32 %v4029_v18, %v4028_v21 }
 0xd7f   : > { %v4404_v2 = vpop.permute.xlu0 %4403 }
 0xd80   : > { %v4406_v63 = vunpack.i.h.bf16 %v4404_v2  ;;  %v4405_v4 = vunpack.i.l.bf16 %v4404_v2  ;;  %v4399_v56 = vpop.permute.xlu1 %4398 }
 0xd81   : > { %v4401_v36 = vunpack.i.h.bf16 %v4399_v56  ;;  %v4400_v39 = vunpack.i.l.bf16 %v4399_v56 }
 0xd82   : > { %v3070_v44 = vsel %vm2482_vm3, %v6482_v41, %v4406_v63  ;;  %v3069_v55 = vsel %vm2482_vm3, %v6478_v50, %v4405_v4 }
 0xd83   : > { %v3076_v25 = vpack.c.bf16 %v3070_v44, %v3069_v55  ;;  %v3068_v43 = vsel %vm2482_vm3, %v6484_v0, %v4401_v36  ;;  %v3067_v20 = vsel %vm2482_vm3, %v6480_v7, %v4400_v39  ;;  %v4633_v44 = vld [vmem:[%s5672_s10 + $0x30] sm:$0xff] }
 0xd84   : > { %v3075_v60 = vpack.c.bf16 %v3068_v43, %v3067_v20 }
 0xd86   : > { %4211 = vmatprep.mubr.msk.bf16.mxu0 %vm1075_vm1, %v3075_v60 }
 0xd87   : > { %4212 = vmatmul.mubr.msk.bf16.vlgmr.msra.gmra.mrb[56].mxu0 %vm1075_vm1, %v3076_v25  ;;  %v4414_v1 = vpop.permute.xlu0 %4413  ;;  %v4634_v25 = vld [vmem:[%s5672_s10 + $0x20] sm:$0xff] }
 0xd88   : > { %v4416_v62 = vunpack.i.h.bf16 %v4414_v1  ;;  %v4415_v41 = vunpack.i.l.bf16 %v4414_v1  ;;  %v4409_v15 = vpop.permute.xlu1 %4408  ;;  %v4636_v1 = vld [vmem:[%s5672_s10 + $0x28] sm:$0xff] }
 0xd89   : > { %v4411_v59 = vunpack.i.h.bf16 %v4409_v15  ;;  %v4410_v50 = vunpack.i.l.bf16 %v4409_v15 }
 0xd8a   : > { %v3074_v48 = vsel %vm2482_vm3, %v6490_v37, %v4416_v62  ;;  %v3073_v0 = vsel %vm2482_vm3, %v6486_v35, %v4415_v41  ;;  %v3898_v35 = vld [vmem:[%s1002_s7] ss:$0 sm:$0xff]  ;;  %s6909_s7 = sld [smem:[#allocation30_spill]] }
 0xd8b   : > { %v3078_v7 = vpack.c.bf16 %v3074_v48, %v3073_v0  ;;  %v3072_v3 = vsel %vm2482_vm3, %v6492_v9, %v4411_v59  ;;  %v3071_v24 = vsel %vm2482_vm3, %v6488_v16, %v4410_v50 }
 0xd8c   : > { %v3077_v27 = vpack.c.bf16 %v3072_v3, %v3071_v24 }
 0xd8e   : > { %4215 = vmatprep.mubr.msk.bf16.mxu0 %vm1075_vm1, %v3077_v27 }
 0xd8f   : > { %4216 = vmatmul.mubr.msk.bf16.gmra.mrb[60].mxu0 %vm1075_vm1, %v3078_v7 }
 0xd90   : > { %s3911_s25 = sshll.u32 %s6909_s7, 10 }
 0xd91   : > { %s6642_s24 = scalar_lea.hbm %s6912_s2, %s3911_s25 }
 0xe5a   : > { %v4213_v37 = vpop.f32.mrb[56].mxu0 }
 0xe5b   : > { %v3367_v9 = vadd.f32 %v4213_v37, %v4015_v38  ;;  %v3358_v47 = vpop.f32.mrb[57].mxu0  ;;  %v4630_v38 = vld [vmem:[%s5672_s10] sm:$0xff] }
 0xe5c   : > { %v3359_v16 = vadd.f32 %v4009_v23, %v3358_v47  ;;  %v4214_v58 = vpop.f32.mrb[58].mxu0 }
 0xe5d   : > { %v3398_v13 = vadd.f32 %v3898_v35, %v3367_v9  ;;  %v3370_v17 = vadd.f32 %v4214_v58, %v4018_v52  ;;  %v3361_v11 = vpop.f32.mrb[59].mxu0  ;;  %v4631_v52 = vld [vmem:[%s5672_s10 + $0x18] sm:$0xff] }
 0xe5e   : > { %v3396_v8 = vadd.f32 %v3898_v35, %v3359_v16  ;;  %v3362_v57 = vadd.f32 %v4012_v28, %v3361_v11 }
 0xe5f   : > { %v3410_v40 = vmul.f32 %v3407_v29, %v3398_v13  ;;  %v3399_v45 = vadd.f32 %v3898_v35, %v3370_v17 }
 0xe60   : > { %v3408_v42 = vmul.f32 %v3407_v29, %v3396_v8  ;;  %v3397_v49 = vadd.f32 %v3898_v35, %v3362_v57 }
 0xe61   : > { %v3418_v30 = vadd.f32 %v4629_v10, %v3410_v40  ;;  %v3411_v23 = vmul.f32 %v3407_v29, %v3399_v45 }
 0xe62   : > { %v3416_v12 = vadd.f32 %v4630_v38, %v3408_v42  ;;  %v3409_v32 = vmul.f32 %v3407_v29, %v3397_v49  ;;  %v4217_v22 = vpop.f32.mrb[60].mxu0 }
 0xe63   : > { %3426 = vst.msk [vmem:[%s5672_s10 + $0x10] sm:$0xff] %vm1075_vm1, %v3418_v30  ;;  %v3419_v33 = vadd.f32 %v4631_v52, %v3411_v23  ;;  %v3383_v28 = vadd.f32 %v4217_v22, %v4027_v54  ;;  %v3374_v46 = vpop.f32.mrb[61].mxu0 }
 0xe64   : > { %3424 = vst.msk [vmem:[%s5672_s10] sm:$0xff] %vm1075_vm1, %v3416_v12  ;;  %v3417_v19 = vadd.f32 %v4632_v6, %v3409_v32  ;;  %v3375_v61 = vadd.f32 %v6582_v14, %v3374_v46  ;;  %v4218_v21 = vpop.f32.mrb[62].mxu0 }
 0xe65   : > { %3427 = vst.msk [vmem:[%s5672_s10 + $0x18] sm:$0xff] %vm1075_vm1, %v3419_v33  ;;  %v3402_v18 = vadd.f32 %v3898_v35, %v3383_v28  ;;  %v3386_v2 = vadd.f32 %v4218_v21, %v6586_v53  ;;  %v3377_v63 = vpop.f32.mrb[63].mxu0 }
 0xe66   : > { %3425 = vst.msk [vmem:[%s5672_s10 + $0x8] sm:$0xff] %vm1075_vm1, %v3417_v19  ;;  %v3400_v54 = vadd.f32 %v3898_v35, %v3375_v61  ;;  %v3378_v4 = vadd.f32 %v6584_v51, %v3377_v63  ;;  %v4635_v51 = vld [vmem:[%s5672_s10 + $0x38] sm:$0xff] }
 0xe67   : > { %v3414_v56 = vmul.f32 %v3407_v29, %v3402_v18  ;;  %v3403_v36 = vadd.f32 %v3898_v35, %v3386_v2 }
 0xe68   : > { %v3412_v39 = vmul.f32 %v3407_v29, %v3400_v54  ;;  %v3401_v14 = vadd.f32 %v3898_v35, %v3378_v4 }
 0xe69   : > { %v3422_v53 = vadd.f32 %v4633_v44, %v3414_v56  ;;  %v3415_v55 = vmul.f32 %v3407_v29, %v3403_v36 }
 0xe6a   : > { %v3420_v43 = vadd.f32 %v4634_v25, %v3412_v39  ;;  %v3413_v20 = vmul.f32 %v3407_v29, %v3401_v14 }
 0xe6b   : > { %3430 = vst.msk [vmem:[%s5672_s10 + $0x30] sm:$0xff] %vm1075_vm1, %v3422_v53  ;;  %v3423_v60 = vadd.f32 %v4635_v51, %v3415_v55 }
 0xe6c   : > { %3428 = vst.msk [vmem:[%s5672_s10 + $0x20] sm:$0xff] %vm1075_vm1, %v3420_v43  ;;  %v3421_v62 = vadd.f32 %v4636_v1, %v3413_v20 }
 0xe6d   : > { %3431 = vst.msk [vmem:[%s5672_s10 + $0x38] sm:$0xff] %vm1075_vm1, %v3423_v60 }
 0xe6e   : > { %3429 = vst.msk [vmem:[%s5672_s10 + $0x28] sm:$0xff] %vm1075_vm1, %v3421_v62 }
 0xe6f   : > { %4914 = shalt.err (!%p4911_p0)
}
 0xe70   : > { %s4915_s10 = scalar_lea.hbm %s6642_s24, 1024  ;;  %s4919_s14 = scalar_lea.hbm %s6913_s29, 2048 }
 0xe71   : > { %p4916_p8 = scmp.ne.s32.totalorder %s6642_s24, %s4915_s10  ;;  %p4920_p7 = scmp.lt.u32.totalorder %s6642_s24, %s6913_s29 }
 0xe72   : > { %p4921_p13 = scmp.lt.u32.totalorder %s4919_s14, %s4915_s10  ;;  %p4923_p2 = scmp.lt.u32.totalorder %s4915_s10, %s6642_s24 }
 0xe73   : > { %p4917_p11 = pnand %p4916_p8, %p6915_p5 }
 0xe74   : > { %p4922_p1 = por %p4921_p13, %p4920_p7 }
 0xe75   : > { %p4918_p9 = pneg %p4917_p11 }
 0xe76   : > { %p4924_p12 = por %p4923_p2, %p4922_p1 }
 0xe78   : > { %p4925_p4 = pnand %p4924_p12, %p4918_p9 }
 0xe7a   : > { %4928 = shalt.err (!%p4925_p4)
}
 0xe7b   : > { %s5061_s28 = smov 128   ;;  %s5062_s3 = smov 8  }
 0xe7c   : > { %4251 = dma.vmem_to_hbm [thread:$0]  (%p6915_p5), %s6644_s15, 1024, %s6642_s24, %s6655_s30, %s5061_s28, %s5061_s28, %s5062_s3  }
 0xe7d PF: > { %s6916_s13 = sld [smem:[#allocation33_spill]]  ;;  %s6917_s4 = sld [smem:[#allocation24_spill]] }
 0xe7e   : > { %s6918_s21 = sld [smem:[#allocation36_spill]] }
 0xe83   : > { %p4293_p6 = scmp.ge.s32.totalorder %s6916_s13, 2  ;;  %s3461_s8 = sand.u32 1, %s6917_s4  }
 0xe84   : > { %p6919_p10 = scmp.ne.s32.totalorder %s6918_s21, 0  ;;  %s3462_s19 = scalar_lea.sflag [#allocation4], %s3461_s8 }
 0xe86   : > { %p4283_p3 = pnand %p4293_p6, %p6919_p10 }
 0xe88   : > { %4994 = dma.done.wait (!%p4283_p3), %s3462_s19, 1024  }
 0xe89   : > { %4996 = vsyncadd (!%p4283_p3), %s3462_s19, 4294966272  ;;  %s43_s3 = sadd.s32 1, %s6916_s13   ;;  %s6920_s0 = sld [smem:[#allocation25_spill]] }
 0xe8a   : > { %p40_p0 = scmp.ge.s32.totalorder %s43_s3, 6   ;;  %s6921_s30 = sld [smem:[#allocation26_spill]] }
 0xe8b   : > { %s6922_s20 = sld [smem:[#allocation40_spill]]  ;;  %s6923_s21 = sld [smem:[#allocation27_spill]] }
 0xe8c   : > { %s6924_s1 = sld [smem:[#allocation28_spill]]  ;;  %s6925_s22 = sld [smem:[#allocation39_spill]] }
 0xe8d   : > { %s6926_s2 = sld [smem:[#allocation31_spill]]  ;;  %s6927_s23 = sld [smem:[#allocation32_spill]] }
 0xe8e   : > { %s6928_s24 = sld [smem:[#allocation37_spill]]  ;;  %s6929_s25 = sld [smem:[#allocation38_spill]] }
 0xe8f   :  { %42 = sbr.rel (!%p40_p0) target bundleno = 36 (0x24), region = 244 }
 0xe96   :  { %3467 = vsyncpa [#allocation3], 1 }
 0xe97   :  { %3469 = vsyncpa [#allocation3 + $0x1], 1 }
 0xe98   :  { %3470 = vsyncpa [#allocation6], 1 }
 0xe99   :  { %3471 = vsyncpa [#allocation9], 1 }
 0xe9a   :  { %3473 = vsyncpa [#allocation9 + $0x1], 1 }
 0xe9b   :  { %3474 = vsyncpa [#allocation12], 1 }
 0xe9c   :  { %3476 = vsyncpa [#allocation12 + $0x1], 1 }
 0xe9d   :  { %3477 = vsyncpa [#allocation15], 1 }
 0xe9e   :  { %3479 = vsyncpa [#allocation15 + $0x1], 1 }
 0xe9f   :  { %3480 = vsyncpa [#allocation4], 1 }
 0xea0   :  { %3482 = vsyncpa [#allocation4 + $0x1], 1 }

</bundles_post_ra>
